<compile_context>
chip_gen: v5e
topology: v5e:2x2
jax: 0.10.0
libtpu: 0.0.40
codegen_flags: <defaults>
</compile_context>

<pallas_src>
import numpy as np

import jax
import jax.numpy as jnp
from jax.experimental import pallas as pl
from jax.experimental.pallas import tpu as pltpu

_LANE = 128


def _ceil_to(n, m):
    return ((n + m - 1) // m) * m


# ---------------------------------------------------------------------------
# Parameter construction (deterministic) -- "module" layout, used by the ref.
# ---------------------------------------------------------------------------
def _dense_init(key, out_dim, in_dim):
    kw, kb = jax.random.split(key)
    scale = 1.0 / jnp.sqrt(jnp.float32(in_dim))
    w = jax.random.normal(kw, (out_dim, in_dim), jnp.float32) * scale
    b = jax.random.normal(kb, (out_dim,), jnp.float32) * 0.01
    return w, b


def init_params(key, obs_dim, n_features, n_actions):
    C, H, W = obs_dim
    keys = jax.random.split(key, 12)
    conv_chans = [(C, 16), (16, 16), (16, 16)]
    convs = []
    h, w = H, W
    for idx, (ci, co) in enumerate(conv_chans):
        kk, kb = jax.random.split(keys[idx])
        fan_in = ci * 9
        cw = jax.random.normal(kk, (co, ci, 3, 3), jnp.float32) / jnp.sqrt(
            jnp.float32(fan_in))
        cb = jax.random.normal(kb, (co,), jnp.float32) * 0.01
        convs.append((cw, cb))
        h, w = h - 2, w - 2
    flat = conv_chans[-1][1] * h * w
    fe_linear = _dense_init(keys[3], n_features, flat)

    def head(kbase, out_dim):
        k1, k2, k3 = jax.random.split(kbase, 3)
        return [_dense_init(k1, 256, n_features),
                _dense_init(k2, 128, 256),
                _dense_init(k3, out_dim, 128)]

    return {
        "convs": convs,
        "fe_linear": fe_linear,
        "critic": head(keys[4], 1),
        "actor": head(keys[5], n_actions),
    }


# ---------------------------------------------------------------------------
# One-time weight re-layout into kernel-ready, 128-lane-padded form.
# ---------------------------------------------------------------------------
def prepare_kernel_params(params, obs_dim, compute_dtype=jnp.float32):
    """Build block-Toeplitz conv weights, NHWC-ordered fe weights and
    block-diagonal fused-head weights, all zero-padded to 128-lane multiples.
    Done once on the host."""
    C, H, W = obs_dim
    kp = {}

    # --- convs: for each kernel row i, a [Kp, Np] banded matrix so that
    #     out[h*TB+b, w*Co+co] = sum_i in[(h+i)*TB+b, :] @ mats[i]
    #     (cross-correlation).  Padded rows/cols are zero.
    Hi, Wi, Ci = H, W, C
    Kp = _ceil_to(Wi * Ci, _LANE)
    for l, (cw, cb) in enumerate(params["convs"], start=1):
        cw = np.asarray(cw)            # [Co, Ci, 3, 3] (OIHW, PyTorch layout)
        cb = np.asarray(cb)
        Co = cw.shape[0]
        Ho, Wo = Hi - 2, Wi - 2
        Np = _ceil_to(Wo * Co, _LANE)
        wk = np.transpose(cw, (2, 3, 1, 0))          # [3, 3, Ci, Co]
        mats = np.zeros((3, Kp, Np), np.float32)
        for i in range(3):
            for j in range(3):
                for w in range(Wo):
                    mats[i, (w + j) * Ci:(w + j + 1) * Ci,
                         w * Co:(w + 1) * Co] = wk[i, j]
        kp[f"cw{l}"] = jnp.asarray(mats, dtype=compute_dtype)
        bias = np.zeros((1, Np), np.float32)
        bias[0, :Wo * Co] = np.tile(cb, Wo)
        kp[f"cb{l}"] = jnp.asarray(bias)
        Hi, Wi, Ci = Ho, Wo, Co
        Kp = Np                                       # next layer's padded K

    # --- fe_linear: original flatten is NCHW (c, h, w); re-order to the
    #     kernel's per-row channels-last layout; pad K and nf lanes.
    wl, bl = params["fe_linear"]
    wl = np.asarray(wl)                               # [nf, C3*H3*W3]
    bl = np.asarray(bl)
    nf = wl.shape[0]
    nfp = _ceil_to(nf, _LANE)
    wl_r = wl.reshape(nf, Ci, Hi, Wi).transpose(2, 3, 1, 0)   # [H3, W3, C3, nf]
    wfe = np.zeros((Hi, Kp, nfp), np.float32)
    wfe[:, :Wi * Ci, :nf] = wl_r.reshape(Hi, Wi * Ci, nf)
    kp["wfe"] = jnp.asarray(wfe, dtype=compute_dtype)
    bfe = np.zeros((1, nfp), np.float32)
    bfe[0, :nf] = bl
    kp["bfe"] = jnp.asarray(bfe)

    # --- fused actor+critic heads (block-diagonal), lane-dense 128-wide out.
    (w1c, b1c), (w2c, b2c), (w3c, b3c) = [
        (np.asarray(w), np.asarray(b)) for w, b in params["critic"]]
    (w1a, b1a), (w2a, b2a), (w3a, b3a) = [
        (np.asarray(w), np.asarray(b)) for w, b in params["actor"]]
    H1, H2 = w1c.shape[0], w2c.shape[0]               # 256, 128
    A = w3a.shape[0]
    NOUT = _LANE
    assert 1 + A <= NOUT, "action space too large for the 128-lane output slab"

    w1 = np.zeros((nfp, 2 * H1), np.float32)          # padded nf rows are zero
    w1[:nf, :H1] = w1c.T
    w1[:nf, H1:] = w1a.T
    b1 = np.concatenate([b1c, b1a])[None, :]
    w2 = np.zeros((2 * H1, 2 * H2), np.float32)
    w2[:H1, :H2] = w2c.T
    w2[H1:, H2:] = w2a.T
    b2 = np.concatenate([b2c, b2a])[None, :]
    w3 = np.zeros((2 * H2, NOUT), np.float32)
    w3[:H2, 0:1] = w3c.T                              # -> column 0 (value)
    w3[H2:, 1:1 + A] = w3a.T                          # -> columns 1..1+A
    b3 = np.zeros((1, NOUT), np.float32)
    b3[0, 0] = b3c[0]
    b3[0, 1:1 + A] = b3a

    kp["w1"] = jnp.asarray(w1, dtype=compute_dtype)
    kp["b1"] = jnp.asarray(b1)
    kp["w2"] = jnp.asarray(w2, dtype=compute_dtype)
    kp["b2"] = jnp.asarray(b2)
    kp["w3"] = jnp.asarray(w3, dtype=compute_dtype)
    kp["b3"] = jnp.asarray(b3)
    return kp


# ---------------------------------------------------------------------------
# Fused forward pass: one pallas_call for the whole network, TB images / step.
# ---------------------------------------------------------------------------
def a2c_forward(x, kp, n_actions, tb=None):
    """x: [B, C, H, W] f32 (NCHW at the public boundary).
    Returns (state_values [B, 1], action_logits [B, n_actions])."""
    B, C, H, W = x.shape
    compute_dtype = kp["cw1"].dtype
    NOUT = kp["w3"].shape[1]
    assert 1 + n_actions <= NOUT, "1 + n_actions must fit the 128-lane slab"

    # Static layer geometry (3x Conv3x3 stride-1 VALID) + padded lane widths.
    Ho1, Ho2, Ho3 = H - 2, H - 4, H - 6
    K1p, N1p = kp["cw1"].shape[1], kp["cw1"].shape[2]
    K2p, N2p = kp["cw2"].shape[1], kp["cw2"].shape[2]
    K3p, N3p = kp["cw3"].shape[1], kp["cw3"].shape[2]
    H3f, Kfp, nfp = kp["wfe"].shape
    assert (K2p, K3p, Kfp, H3f) == (N1p, N2p, N3p, Ho3)

    # Images per grid step.  TB % 8 == 0 keeps every row-shift slice
    # sublane-aligned; batch is zero-padded up to a multiple of TB.
    if tb is None:
        tb = min(64, _ceil_to(B, 8))
    TB = _ceil_to(tb, 8)
    B_pad = _ceil_to(max(B, TB), TB)
    G = B_pad // TB

    # Host relayout: NCHW -> h-major per-group 2-D slabs [G, H*TB, K1p]
    # (row h*TB + b_local, lane w*C + c), zero-padded batch & lanes, cast once.
    WC = W * C
    xr = jnp.transpose(x, (0, 2, 3, 1)).reshape(B, H, WC)          # [B,H,WC]
    xr = jnp.transpose(xr, (1, 0, 2))                              # [H,B,WC]
    xr = jnp.pad(xr, ((0, 0), (0, B_pad - B), (0, K1p - WC)))
    xr = xr.reshape(H, G, TB, K1p).transpose(1, 0, 2, 3).reshape(G, H * TB, K1p)
    xr = xr.astype(compute_dtype)

    def kernel(x_ref, cw1, cb1, cw2, cb2, cw3, cb3, wfe, bfe,
               w1, b1, w2, b2, w3, b3, out_ref, a1_s, a2_s, a3_s):
        def conv_layer(load, w_ref, b_ref, out_s):
            acc = None
            for i in range(3):
                lhs = load(i)                       # [Ho*TB, Kp], compute dt
                t = jnp.dot(lhs, w_ref[i], preferred_element_type=jnp.float32)
                acc = t if acc is None else acc + t
            # Fused bias+ReLU epilogue: single store, single cast.
            out_s[...] = jnp.maximum(acc + b_ref[...], 0.0).astype(out_s.dtype)

        # conv stack -- activations stay resident h-major in VMEM scratch.
        conv_layer(lambda i: x_ref[0, i * TB:(i + Ho1) * TB, :], cw1, cb1, a1_s)
        conv_layer(lambda i: a1_s[i * TB:(i + Ho2) * TB, :], cw2, cb2, a2_s)
        conv_layer(lambda i: a2_s[i * TB:(i + Ho3) * TB, :], cw3, cb3, a3_s)

        # fe_linear: contraction over (h, w, c) as Ho3 matmuls with M = TB
        # (each a3 slab is a contiguous [TB, K3p] block; no reshapes).
        facc = None
        for h in range(Ho3):
            t = jnp.dot(a3_s[h * TB:(h + 1) * TB, :], wfe[h],
                        preferred_element_type=jnp.float32)
            facc = t if facc is None else facc + t
        f = jnp.maximum(facc + bfe[...], 0.0).astype(compute_dtype)  # [TB,nfp]

        # fused actor+critic heads (block-diagonal weights), M = TB.
        h1 = jnp.maximum(
            jnp.dot(f, w1[...], preferred_element_type=jnp.float32)
            + b1[...], 0.0).astype(compute_dtype)
        h2 = jnp.maximum(
            jnp.dot(h1, w2[...], preferred_element_type=jnp.float32)
            + b2[...], 0.0).astype(compute_dtype)
        out_ref[...] = (jnp.dot(h2, w3[...],
                                preferred_element_type=jnp.float32)
                        + b3[...])                   # [TB, 128] lane-dense

    weight_names = ["cw1", "cb1", "cw2", "cb2", "cw3", "cb3",
                    "wfe", "bfe", "w1", "b1", "w2", "b2", "w3", "b3"]
    weights = [kp[n] for n in weight_names]

    def const_spec(a):
        nd = a.ndim
        return pl.BlockSpec(a.shape, lambda g, _n=nd: (0,) * _n)

    in_specs = ([pl.BlockSpec((1, H * TB, K1p), lambda g: (g, 0, 0))]
                + [const_spec(a) for a in weights])
    out_specs = pl.BlockSpec((TB, NOUT), lambda g: (g, 0))
    scratch_shapes = [pltpu.VMEM((Ho1 * TB, N1p), compute_dtype),
                      pltpu.VMEM((Ho2 * TB, N2p), compute_dtype),
                      pltpu.VMEM((Ho3 * TB, N3p), compute_dtype)]

    # Advisory cost estimate for XLA scheduling (padded MXU work, per call).
    flops = 0
    for (Ho, Kp, Np) in [(Ho1, K1p, N1p), (Ho2, K2p, N2p), (Ho3, K3p, N3p)]:
        flops += 2 * 3 * Ho * Kp * Np
    flops += 2 * Ho3 * Kfp * nfp
    flops += 2 * (nfp * kp["w1"].shape[1]
                  + kp["w2"].shape[0] * kp["w2"].shape[1]
                  + kp["w3"].shape[0] * NOUT)
    flops *= B_pad
    bytes_accessed = (int(xr.size) * xr.dtype.itemsize
                      + sum(int(a.size) * a.dtype.itemsize for a in weights)
                      + B_pad * NOUT * 4)

    out = pl.pallas_call(
        kernel,
        out_shape=jax.ShapeDtypeStruct((B_pad, NOUT), jnp.float32),
        grid=(G,),
        in_specs=in_specs,
        out_specs=out_specs,
        scratch_shapes=scratch_shapes,
        compiler_params=pltpu.CompilerParams(
            dimension_semantics=("parallel",),
            vmem_limit_bytes=32 * 1024 * 1024),
        cost_estimate=pl.CostEstimate(flops=int(flops), transcendentals=0,
                                      bytes_accessed=int(bytes_accessed)),
    )(xr, *weights)

    slab = out[:B]                                   # drop batch padding
    state_values = slab[:, 0:1]
    action_logits = slab[:, 1:1 + n_actions]
    return state_values, action_logits


# ---------------------------------------------------------------------------
# Pure-JAX reference (correctness check).
# ---------------------------------------------------------------------------
def a2c_forward_ref(x, params):
    h = x
    for (cw, cb) in params["convs"]:
        h = jax.lax.conv_general_dilated(
            h, cw, (1, 1), "VALID",
            dimension_numbers=("NCHW", "OIHW", "NCHW"))
        h = jax.nn.relu(h + cb[None, :, None, None])
    f = h.reshape(h.shape[0], -1)
    wl, bl = params["fe_linear"]
    feats = jax.nn.relu(f @ wl.T + bl)

    def mlp(f_, layers):
        (w1, b1), (w2, b2), (w3, b3) = layers
        h_ = jax.nn.relu(f_ @ w1.T + b1)
        h_ = jax.nn.relu(h_ @ w2.T + b2)
        return h_ @ w3.T + b3

    return mlp(feats, params["critic"]), mlp(feats, params["actor"])


# ---------------------------------------------------------------------------
if __name__ == "__main__":
    B, C, H, W = 2, 4, 16, 16
    n_features, n_actions = 32, 8

    key = jax.random.PRNGKey(0)
    kx, kparam = jax.random.split(key)
    x = jax.random.normal(kx, (B, C, H, W), jnp.float32)
    params = init_params(kparam, (C, H, W), n_features, n_actions)

    # compute_dtype=jnp.bfloat16 is the one-line switch for v6e/v7x MXU inputs
    # at RL batch sizes; f32 kept here for the correctness check.
    kp = prepare_kernel_params(params, (C, H, W), compute_dtype=jnp.float32)

    fwd = jax.jit(a2c_forward, static_argnums=(2, 3))
    state_values, action_logits = fwd(x, kp, n_actions, 8)
    jax.block_until_ready((state_values, action_logits))

    sv_ref, al_ref = a2c_forward_ref(x, params)

    assert state_values.shape == (B, 1)
    assert action_logits.shape == (B, n_actions)
    assert bool(jnp.all(jnp.isfinite(state_values)))
    assert bool(jnp.all(jnp.isfinite(action_logits)))
    # Layout bugs manifest as O(1) errors; matmul-precision differences between
    # the MXU path and the XLA default-precision reference stay well below this.
    assert bool(jnp.allclose(state_values, sv_ref, rtol=2e-2, atol=2e-2))
    assert bool(jnp.allclose(action_logits, al_ref, rtol=2e-2, atol=2e-2))

    print("KERNEL_OK")
</pallas_src>

<mosaic_0001>
module attributes {stable_mosaic.version = 11 : i64} {
  func.func @kernel(%arg0: i32, %arg1: memref<1x128x128xf32, #tpu.memory_space<vmem>>, %arg2: memref<3x128x256xf32, #tpu.memory_space<vmem>>, %arg3: memref<1x256xf32, #tpu.memory_space<vmem>>, %arg4: memref<3x256x256xf32, #tpu.memory_space<vmem>>, %arg5: memref<1x256xf32, #tpu.memory_space<vmem>>, %arg6: memref<3x256x256xf32, #tpu.memory_space<vmem>>, %arg7: memref<1x256xf32, #tpu.memory_space<vmem>>, %arg8: memref<10x256x128xf32, #tpu.memory_space<vmem>>, %arg9: memref<1x128xf32, #tpu.memory_space<vmem>>, %arg10: memref<128x512xf32, #tpu.memory_space<vmem>>, %arg11: memref<1x512xf32, #tpu.memory_space<vmem>>, %arg12: memref<512x256xf32, #tpu.memory_space<vmem>>, %arg13: memref<1x256xf32, #tpu.memory_space<vmem>>, %arg14: memref<256x128xf32, #tpu.memory_space<vmem>>, %arg15: memref<1x128xf32, #tpu.memory_space<vmem>>, %arg16: memref<8x128xf32, #tpu.memory_space<vmem>>, %arg17: memref<112x256xf32, #tpu.memory_space<vmem>>, %arg18: memref<96x256xf32, #tpu.memory_space<vmem>>, %arg19: memref<80x256xf32, #tpu.memory_space<vmem>>) attributes {dimension_semantics = [#tpu.dimension_semantics<parallel>], iteration_bounds = array<i64: 1>, scalar_prefetch = 0 : i64, scratch_operands = 3 : i64, tpu.core_type = #tpu.core_type<tc>, window_params = [{transform_indices = @transform_0, window_bounds = array<i64: 1, 128, 128>}, {pipeline_mode = #tpu.pipeline_mode<synchronous>, transform_indices = @transform_1, window_bounds = array<i64: 3, 128, 256>}, {pipeline_mode = #tpu.pipeline_mode<synchronous>, transform_indices = @transform_2, window_bounds = array<i64: 1, 256>}, {pipeline_mode = #tpu.pipeline_mode<synchronous>, transform_indices = @transform_3, window_bounds = array<i64: 3, 256, 256>}, {pipeline_mode = #tpu.pipeline_mode<synchronous>, transform_indices = @transform_4, window_bounds = array<i64: 1, 256>}, {pipeline_mode = #tpu.pipeline_mode<synchronous>, transform_indices = @transform_5, window_bounds = array<i64: 3, 256, 256>}, {pipeline_mode = #tpu.pipeline_mode<synchronous>, transform_indices = @transform_6, window_bounds = array<i64: 1, 256>}, {pipeline_mode = #tpu.pipeline_mode<synchronous>, transform_indices = @transform_7, window_bounds = array<i64: 10, 256, 128>}, {pipeline_mode = #tpu.pipeline_mode<synchronous>, transform_indices = @transform_8, window_bounds = array<i64: 1, 128>}, {pipeline_mode = #tpu.pipeline_mode<synchronous>, transform_indices = @transform_9, window_bounds = array<i64: 128, 512>}, {pipeline_mode = #tpu.pipeline_mode<synchronous>, transform_indices = @transform_10, window_bounds = array<i64: 1, 512>}, {pipeline_mode = #tpu.pipeline_mode<synchronous>, transform_indices = @transform_11, window_bounds = array<i64: 512, 256>}, {pipeline_mode = #tpu.pipeline_mode<synchronous>, transform_indices = @transform_12, window_bounds = array<i64: 1, 256>}, {pipeline_mode = #tpu.pipeline_mode<synchronous>, transform_indices = @transform_13, window_bounds = array<i64: 256, 128>}, {pipeline_mode = #tpu.pipeline_mode<synchronous>, transform_indices = @transform_14, window_bounds = array<i64: 1, 128>}, {transform_indices = @transform_15, window_bounds = array<i64: 8, 128>}]} {
    %c0 = arith.constant 0 : index
    %c0_0 = arith.constant 0 : index
    %c0_1 = arith.constant 0 : index
    %0 = vector.load %arg1[%c0, %c0_0, %c0_1] : memref<1x128x128xf32, #tpu.memory_space<vmem>>, vector<1x112x128xf32>
    %1 = vector.shape_cast %0 : vector<1x112x128xf32> to vector<112x128xf32>
    %c0_2 = arith.constant 0 : index
    %c0_3 = arith.constant 0 : index
    %c0_4 = arith.constant 0 : index
    %2 = vector.load %arg2[%c0_2, %c0_3, %c0_4] : memref<3x128x256xf32, #tpu.memory_space<vmem>>, vector<1x128x256xf32>
    %3 = vector.shape_cast %2 : vector<1x128x256xf32> to vector<128x256xf32>
    %cst = arith.constant dense<0.000000e+00> : vector<112x256xf32>
    %4 = tpu.matmul %1, %3, %cst {dimension_numbers = #tpu.dot_dimension_numbers<[1], [0], [0], [1], [0, 0, 1, 1], [], []>} : vector<112x128xf32>, vector<128x256xf32>, vector<112x256xf32> -> vector<112x256xf32>
    %c0_5 = arith.constant 0 : index
    %c8 = arith.constant 8 : index
    %c0_6 = arith.constant 0 : index
    %5 = vector.load %arg1[%c0_5, %c8, %c0_6] : memref<1x128x128xf32, #tpu.memory_space<vmem>>, vector<1x112x128xf32>
    %6 = vector.shape_cast %5 : vector<1x112x128xf32> to vector<112x128xf32>
    %c1 = arith.constant 1 : index
    %c0_7 = arith.constant 0 : index
    %c0_8 = arith.constant 0 : index
    %7 = vector.load %arg2[%c1, %c0_7, %c0_8] : memref<3x128x256xf32, #tpu.memory_space<vmem>>, vector<1x128x256xf32>
    %8 = vector.shape_cast %7 : vector<1x128x256xf32> to vector<128x256xf32>
    %cst_9 = arith.constant dense<0.000000e+00> : vector<112x256xf32>
    %9 = tpu.matmul %6, %8, %cst_9 {dimension_numbers = #tpu.dot_dimension_numbers<[1], [0], [0], [1], [0, 0, 1, 1], [], []>} : vector<112x128xf32>, vector<128x256xf32>, vector<112x256xf32> -> vector<112x256xf32>
    %10 = arith.addf %4, %9 : vector<112x256xf32>
    %c0_10 = arith.constant 0 : index
    %c16 = arith.constant 16 : index
    %c0_11 = arith.constant 0 : index
    %11 = vector.load %arg1[%c0_10, %c16, %c0_11] : memref<1x128x128xf32, #tpu.memory_space<vmem>>, vector<1x112x128xf32>
    %12 = vector.shape_cast %11 : vector<1x112x128xf32> to vector<112x128xf32>
    %c2 = arith.constant 2 : index
    %c0_12 = arith.constant 0 : index
    %c0_13 = arith.constant 0 : index
    %13 = vector.load %arg2[%c2, %c0_12, %c0_13] : memref<3x128x256xf32, #tpu.memory_space<vmem>>, vector<1x128x256xf32>
    %14 = vector.shape_cast %13 : vector<1x128x256xf32> to vector<128x256xf32>
    %cst_14 = arith.constant dense<0.000000e+00> : vector<112x256xf32>
    %15 = tpu.matmul %12, %14, %cst_14 {dimension_numbers = #tpu.dot_dimension_numbers<[1], [0], [0], [1], [0, 0, 1, 1], [], []>} : vector<112x128xf32>, vector<128x256xf32>, vector<112x256xf32> -> vector<112x256xf32>
    %16 = arith.addf %10, %15 : vector<112x256xf32>
    %c0_15 = arith.constant 0 : index
    %c0_16 = arith.constant 0 : index
    %17 = vector.load %arg3[%c0_15, %c0_16] : memref<1x256xf32, #tpu.memory_space<vmem>>, vector<1x256xf32>
    %18 = vector.broadcast %17 : vector<1x256xf32> to vector<112x256xf32>
    %19 = arith.addf %16, %18 : vector<112x256xf32>
    %cst_17 = arith.constant 0.000000e+00 : f32
    %20 = vector.broadcast %cst_17 : f32 to vector<112x256xf32>
    %21 = arith.maximumf %19, %20 : vector<112x256xf32>
    %c0_18 = arith.constant 0 : index
    %c0_19 = arith.constant 0 : index
    %22 = vector.load %arg17[%c0_18, %c0_19] : memref<112x256xf32, #tpu.memory_space<vmem>>, vector<112x256xf32>
    tpu.vector_store %arg17[%c0_18, %c0_19], %21 {strides = array<i32>} : memref<112x256xf32, #tpu.memory_space<vmem>>, vector<112x256xf32>,
    %c0_20 = arith.constant 0 : index
    %c0_21 = arith.constant 0 : index
    %23 = vector.load %arg17[%c0_20, %c0_21] : memref<112x256xf32, #tpu.memory_space<vmem>>, vector<96x256xf32>
    %c0_22 = arith.constant 0 : index
    %c0_23 = arith.constant 0 : index
    %c0_24 = arith.constant 0 : index
    %24 = vector.load %arg4[%c0_22, %c0_23, %c0_24] : memref<3x256x256xf32, #tpu.memory_space<vmem>>, vector<1x256x256xf32>
    %25 = vector.shape_cast %24 : vector<1x256x256xf32> to vector<256x256xf32>
    %cst_25 = arith.constant dense<0.000000e+00> : vector<96x256xf32>
    %26 = tpu.matmul %23, %25, %cst_25 {dimension_numbers = #tpu.dot_dimension_numbers<[1], [0], [0], [1], [0, 0, 1, 1], [], []>} : vector<96x256xf32>, vector<256x256xf32>, vector<96x256xf32> -> vector<96x256xf32>
    %c8_26 = arith.constant 8 : index
    %c0_27 = arith.constant 0 : index
    %27 = vector.load %arg17[%c8_26, %c0_27] : memref<112x256xf32, #tpu.memory_space<vmem>>, vector<96x256xf32>
    %c1_28 = arith.constant 1 : index
    %c0_29 = arith.constant 0 : index
    %c0_30 = arith.constant 0 : index
    %28 = vector.load %arg4[%c1_28, %c0_29, %c0_30] : memref<3x256x256xf32, #tpu.memory_space<vmem>>, vector<1x256x256xf32>
    %29 = vector.shape_cast %28 : vector<1x256x256xf32> to vector<256x256xf32>
    %cst_31 = arith.constant dense<0.000000e+00> : vector<96x256xf32>
    %30 = tpu.matmul %27, %29, %cst_31 {dimension_numbers = #tpu.dot_dimension_numbers<[1], [0], [0], [1], [0, 0, 1, 1], [], []>} : vector<96x256xf32>, vector<256x256xf32>, vector<96x256xf32> -> vector<96x256xf32>
    %31 = arith.addf %26, %30 : vector<96x256xf32>
    %c16_32 = arith.constant 16 : index
    %c0_33 = arith.constant 0 : index
    %32 = vector.load %arg17[%c16_32, %c0_33] : memref<112x256xf32, #tpu.memory_space<vmem>>, vector<96x256xf32>
    %c2_34 = arith.constant 2 : index
    %c0_35 = arith.constant 0 : index
    %c0_36 = arith.constant 0 : index
    %33 = vector.load %arg4[%c2_34, %c0_35, %c0_36] : memref<3x256x256xf32, #tpu.memory_space<vmem>>, vector<1x256x256xf32>
    %34 = vector.shape_cast %33 : vector<1x256x256xf32> to vector<256x256xf32>
    %cst_37 = arith.constant dense<0.000000e+00> : vector<96x256xf32>
    %35 = tpu.matmul %32, %34, %cst_37 {dimension_numbers = #tpu.dot_dimension_numbers<[1], [0], [0], [1], [0, 0, 1, 1], [], []>} : vector<96x256xf32>, vector<256x256xf32>, vector<96x256xf32> -> vector<96x256xf32>
    %36 = arith.addf %31, %35 : vector<96x256xf32>
    %c0_38 = arith.constant 0 : index
    %c0_39 = arith.constant 0 : index
    %37 = vector.load %arg5[%c0_38, %c0_39] : memref<1x256xf32, #tpu.memory_space<vmem>>, vector<1x256xf32>
    %38 = vector.broadcast %37 : vector<1x256xf32> to vector<96x256xf32>
    %39 = arith.addf %36, %38 : vector<96x256xf32>
    %cst_40 = arith.constant 0.000000e+00 : f32
    %40 = vector.broadcast %cst_40 : f32 to vector<96x256xf32>
    %41 = arith.maximumf %39, %40 : vector<96x256xf32>
    %c0_41 = arith.constant 0 : index
    %c0_42 = arith.constant 0 : index
    %42 = vector.load %arg18[%c0_41, %c0_42] : memref<96x256xf32, #tpu.memory_space<vmem>>, vector<96x256xf32>
    tpu.vector_store %arg18[%c0_41, %c0_42], %41 {strides = array<i32>} : memref<96x256xf32, #tpu.memory_space<vmem>>, vector<96x256xf32>,
    %c0_43 = arith.constant 0 : index
    %c0_44 = arith.constant 0 : index
    %43 = vector.load %arg18[%c0_43, %c0_44] : memref<96x256xf32, #tpu.memory_space<vmem>>, vector<80x256xf32>
    %c0_45 = arith.constant 0 : index
    %c0_46 = arith.constant 0 : index
    %c0_47 = arith.constant 0 : index
    %44 = vector.load %arg6[%c0_45, %c0_46, %c0_47] : memref<3x256x256xf32, #tpu.memory_space<vmem>>, vector<1x256x256xf32>
    %45 = vector.shape_cast %44 : vector<1x256x256xf32> to vector<256x256xf32>
    %cst_48 = arith.constant dense<0.000000e+00> : vector<80x256xf32>
    %46 = tpu.matmul %43, %45, %cst_48 {dimension_numbers = #tpu.dot_dimension_numbers<[1], [0], [0], [1], [0, 0, 1, 1], [], []>} : vector<80x256xf32>, vector<256x256xf32>, vector<80x256xf32> -> vector<80x256xf32>
    %c8_49 = arith.constant 8 : index
    %c0_50 = arith.constant 0 : index
    %47 = vector.load %arg18[%c8_49, %c0_50] : memref<96x256xf32, #tpu.memory_space<vmem>>, vector<80x256xf32>
    %c1_51 = arith.constant 1 : index
    %c0_52 = arith.constant 0 : index
    %c0_53 = arith.constant 0 : index
    %48 = vector.load %arg6[%c1_51, %c0_52, %c0_53] : memref<3x256x256xf32, #tpu.memory_space<vmem>>, vector<1x256x256xf32>
    %49 = vector.shape_cast %48 : vector<1x256x256xf32> to vector<256x256xf32>
    %cst_54 = arith.constant dense<0.000000e+00> : vector<80x256xf32>
    %50 = tpu.matmul %47, %49, %cst_54 {dimension_numbers = #tpu.dot_dimension_numbers<[1], [0], [0], [1], [0, 0, 1, 1], [], []>} : vector<80x256xf32>, vector<256x256xf32>, vector<80x256xf32> -> vector<80x256xf32>
    %51 = arith.addf %46, %50 : vector<80x256xf32>
    %c16_55 = arith.constant 16 : index
    %c0_56 = arith.constant 0 : index
    %52 = vector.load %arg18[%c16_55, %c0_56] : memref<96x256xf32, #tpu.memory_space<vmem>>, vector<80x256xf32>
    %c2_57 = arith.constant 2 : index
    %c0_58 = arith.constant 0 : index
    %c0_59 = arith.constant 0 : index
    %53 = vector.load %arg6[%c2_57, %c0_58, %c0_59] : memref<3x256x256xf32, #tpu.memory_space<vmem>>, vector<1x256x256xf32>
    %54 = vector.shape_cast %53 : vector<1x256x256xf32> to vector<256x256xf32>
    %cst_60 = arith.constant dense<0.000000e+00> : vector<80x256xf32>
    %55 = tpu.matmul %52, %54, %cst_60 {dimension_numbers = #tpu.dot_dimension_numbers<[1], [0], [0], [1], [0, 0, 1, 1], [], []>} : vector<80x256xf32>, vector<256x256xf32>, vector<80x256xf32> -> vector<80x256xf32>
    %56 = arith.addf %51, %55 : vector<80x256xf32>
    %c0_61 = arith.constant 0 : index
    %c0_62 = arith.constant 0 : index
    %57 = vector.load %arg7[%c0_61, %c0_62] : memref<1x256xf32, #tpu.memory_space<vmem>>, vector<1x256xf32>
    %58 = vector.broadcast %57 : vector<1x256xf32> to vector<80x256xf32>
    %59 = arith.addf %56, %58 : vector<80x256xf32>
    %cst_63 = arith.constant 0.000000e+00 : f32
    %60 = vector.broadcast %cst_63 : f32 to vector<80x256xf32>
    %61 = arith.maximumf %59, %60 : vector<80x256xf32>
    %c0_64 = arith.constant 0 : index
    %c0_65 = arith.constant 0 : index
    %62 = vector.load %arg19[%c0_64, %c0_65] : memref<80x256xf32, #tpu.memory_space<vmem>>, vector<80x256xf32>
    tpu.vector_store %arg19[%c0_64, %c0_65], %61 {strides = array<i32>} : memref<80x256xf32, #tpu.memory_space<vmem>>, vector<80x256xf32>,
    %c0_66 = arith.constant 0 : index
    %c0_67 = arith.constant 0 : index
    %63 = vector.load %arg19[%c0_66, %c0_67] : memref<80x256xf32, #tpu.memory_space<vmem>>, vector<8x256xf32>
    %c0_68 = arith.constant 0 : index
    %c0_69 = arith.constant 0 : index
    %c0_70 = arith.constant 0 : index
    %64 = vector.load %arg8[%c0_68, %c0_69, %c0_70] : memref<10x256x128xf32, #tpu.memory_space<vmem>>, vector<1x256x128xf32>
    %65 = vector.shape_cast %64 : vector<1x256x128xf32> to vector<256x128xf32>
    %cst_71 = arith.constant dense<0.000000e+00> : vector<8x128xf32>
    %66 = tpu.matmul %63, %65, %cst_71 {dimension_numbers = #tpu.dot_dimension_numbers<[1], [0], [0], [1], [0, 0, 1, 1], [], []>} : vector<8x256xf32>, vector<256x128xf32>, vector<8x128xf32> -> vector<8x128xf32>
    %c8_72 = arith.constant 8 : index
    %c0_73 = arith.constant 0 : index
    %67 = vector.load %arg19[%c8_72, %c0_73] : memref<80x256xf32, #tpu.memory_space<vmem>>, vector<8x256xf32>
    %c1_74 = arith.constant 1 : index
    %c0_75 = arith.constant 0 : index
    %c0_76 = arith.constant 0 : index
    %68 = vector.load %arg8[%c1_74, %c0_75, %c0_76] : memref<10x256x128xf32, #tpu.memory_space<vmem>>, vector<1x256x128xf32>
    %69 = vector.shape_cast %68 : vector<1x256x128xf32> to vector<256x128xf32>
    %cst_77 = arith.constant dense<0.000000e+00> : vector<8x128xf32>
    %70 = tpu.matmul %67, %69, %cst_77 {dimension_numbers = #tpu.dot_dimension_numbers<[1], [0], [0], [1], [0, 0, 1, 1], [], []>} : vector<8x256xf32>, vector<256x128xf32>, vector<8x128xf32> -> vector<8x128xf32>
    %71 = arith.addf %66, %70 : vector<8x128xf32>
    %c16_78 = arith.constant 16 : index
    %c0_79 = arith.constant 0 : index
    %72 = vector.load %arg19[%c16_78, %c0_79] : memref<80x256xf32, #tpu.memory_space<vmem>>, vector<8x256xf32>
    %c2_80 = arith.constant 2 : index
    %c0_81 = arith.constant 0 : index
    %c0_82 = arith.constant 0 : index
    %73 = vector.load %arg8[%c2_80, %c0_81, %c0_82] : memref<10x256x128xf32, #tpu.memory_space<vmem>>, vector<1x256x128xf32>
    %74 = vector.shape_cast %73 : vector<1x256x128xf32> to vector<256x128xf32>
    %cst_83 = arith.constant dense<0.000000e+00> : vector<8x128xf32>
    %75 = tpu.matmul %72, %74, %cst_83 {dimension_numbers = #tpu.dot_dimension_numbers<[1], [0], [0], [1], [0, 0, 1, 1], [], []>} : vector<8x256xf32>, vector<256x128xf32>, vector<8x128xf32> -> vector<8x128xf32>
    %76 = arith.addf %71, %75 : vector<8x128xf32>
    %c24 = arith.constant 24 : index
    %c0_84 = arith.constant 0 : index
    %77 = vector.load %arg19[%c24, %c0_84] : memref<80x256xf32, #tpu.memory_space<vmem>>, vector<8x256xf32>
    %c3 = arith.constant 3 : index
    %c0_85 = arith.constant 0 : index
    %c0_86 = arith.constant 0 : index
    %78 = vector.load %arg8[%c3, %c0_85, %c0_86] : memref<10x256x128xf32, #tpu.memory_space<vmem>>, vector<1x256x128xf32>
    %79 = vector.shape_cast %78 : vector<1x256x128xf32> to vector<256x128xf32>
    %cst_87 = arith.constant dense<0.000000e+00> : vector<8x128xf32>
    %80 = tpu.matmul %77, %79, %cst_87 {dimension_numbers = #tpu.dot_dimension_numbers<[1], [0], [0], [1], [0, 0, 1, 1], [], []>} : vector<8x256xf32>, vector<256x128xf32>, vector<8x128xf32> -> vector<8x128xf32>
    %81 = arith.addf %76, %80 : vector<8x128xf32>
    %c32 = arith.constant 32 : index
    %c0_88 = arith.constant 0 : index
    %82 = vector.load %arg19[%c32, %c0_88] : memref<80x256xf32, #tpu.memory_space<vmem>>, vector<8x256xf32>
    %c4 = arith.constant 4 : index
    %c0_89 = arith.constant 0 : index
    %c0_90 = arith.constant 0 : index
    %83 = vector.load %arg8[%c4, %c0_89, %c0_90] : memref<10x256x128xf32, #tpu.memory_space<vmem>>, vector<1x256x128xf32>
    %84 = vector.shape_cast %83 : vector<1x256x128xf32> to vector<256x128xf32>
    %cst_91 = arith.constant dense<0.000000e+00> : vector<8x128xf32>
    %85 = tpu.matmul %82, %84, %cst_91 {dimension_numbers = #tpu.dot_dimension_numbers<[1], [0], [0], [1], [0, 0, 1, 1], [], []>} : vector<8x256xf32>, vector<256x128xf32>, vector<8x128xf32> -> vector<8x128xf32>
    %86 = arith.addf %81, %85 : vector<8x128xf32>
    %c40 = arith.constant 40 : index
    %c0_92 = arith.constant 0 : index
    %87 = vector.load %arg19[%c40, %c0_92] : memref<80x256xf32, #tpu.memory_space<vmem>>, vector<8x256xf32>
    %c5 = arith.constant 5 : index
    %c0_93 = arith.constant 0 : index
    %c0_94 = arith.constant 0 : index
    %88 = vector.load %arg8[%c5, %c0_93, %c0_94] : memref<10x256x128xf32, #tpu.memory_space<vmem>>, vector<1x256x128xf32>
    %89 = vector.shape_cast %88 : vector<1x256x128xf32> to vector<256x128xf32>
    %cst_95 = arith.constant dense<0.000000e+00> : vector<8x128xf32>
    %90 = tpu.matmul %87, %89, %cst_95 {dimension_numbers = #tpu.dot_dimension_numbers<[1], [0], [0], [1], [0, 0, 1, 1], [], []>} : vector<8x256xf32>, vector<256x128xf32>, vector<8x128xf32> -> vector<8x128xf32>
    %91 = arith.addf %86, %90 : vector<8x128xf32>
    %c48 = arith.constant 48 : index
    %c0_96 = arith.constant 0 : index
    %92 = vector.load %arg19[%c48, %c0_96] : memref<80x256xf32, #tpu.memory_space<vmem>>, vector<8x256xf32>
    %c6 = arith.constant 6 : index
    %c0_97 = arith.constant 0 : index
    %c0_98 = arith.constant 0 : index
    %93 = vector.load %arg8[%c6, %c0_97, %c0_98] : memref<10x256x128xf32, #tpu.memory_space<vmem>>, vector<1x256x128xf32>
    %94 = vector.shape_cast %93 : vector<1x256x128xf32> to vector<256x128xf32>
    %cst_99 = arith.constant dense<0.000000e+00> : vector<8x128xf32>
    %95 = tpu.matmul %92, %94, %cst_99 {dimension_numbers = #tpu.dot_dimension_numbers<[1], [0], [0], [1], [0, 0, 1, 1], [], []>} : vector<8x256xf32>, vector<256x128xf32>, vector<8x128xf32> -> vector<8x128xf32>
    %96 = arith.addf %91, %95 : vector<8x128xf32>
    %c56 = arith.constant 56 : index
    %c0_100 = arith.constant 0 : index
    %97 = vector.load %arg19[%c56, %c0_100] : memref<80x256xf32, #tpu.memory_space<vmem>>, vector<8x256xf32>
    %c7 = arith.constant 7 : index
    %c0_101 = arith.constant 0 : index
    %c0_102 = arith.constant 0 : index
    %98 = vector.load %arg8[%c7, %c0_101, %c0_102] : memref<10x256x128xf32, #tpu.memory_space<vmem>>, vector<1x256x128xf32>
    %99 = vector.shape_cast %98 : vector<1x256x128xf32> to vector<256x128xf32>
    %cst_103 = arith.constant dense<0.000000e+00> : vector<8x128xf32>
    %100 = tpu.matmul %97, %99, %cst_103 {dimension_numbers = #tpu.dot_dimension_numbers<[1], [0], [0], [1], [0, 0, 1, 1], [], []>} : vector<8x256xf32>, vector<256x128xf32>, vector<8x128xf32> -> vector<8x128xf32>
    %101 = arith.addf %96, %100 : vector<8x128xf32>
    %c64 = arith.constant 64 : index
    %c0_104 = arith.constant 0 : index
    %102 = vector.load %arg19[%c64, %c0_104] : memref<80x256xf32, #tpu.memory_space<vmem>>, vector<8x256xf32>
    %c8_105 = arith.constant 8 : index
    %c0_106 = arith.constant 0 : index
    %c0_107 = arith.constant 0 : index
    %103 = vector.load %arg8[%c8_105, %c0_106, %c0_107] : memref<10x256x128xf32, #tpu.memory_space<vmem>>, vector<1x256x128xf32>
    %104 = vector.shape_cast %103 : vector<1x256x128xf32> to vector<256x128xf32>
    %cst_108 = arith.constant dense<0.000000e+00> : vector<8x128xf32>
    %105 = tpu.matmul %102, %104, %cst_108 {dimension_numbers = #tpu.dot_dimension_numbers<[1], [0], [0], [1], [0, 0, 1, 1], [], []>} : vector<8x256xf32>, vector<256x128xf32>, vector<8x128xf32> -> vector<8x128xf32>
    %106 = arith.addf %101, %105 : vector<8x128xf32>
    %c72 = arith.constant 72 : index
    %c0_109 = arith.constant 0 : index
    %107 = vector.load %arg19[%c72, %c0_109] : memref<80x256xf32, #tpu.memory_space<vmem>>, vector<8x256xf32>
    %c9 = arith.constant 9 : index
    %c0_110 = arith.constant 0 : index
    %c0_111 = arith.constant 0 : index
    %108 = vector.load %arg8[%c9, %c0_110, %c0_111] : memref<10x256x128xf32, #tpu.memory_space<vmem>>, vector<1x256x128xf32>
    %109 = vector.shape_cast %108 : vector<1x256x128xf32> to vector<256x128xf32>
    %cst_112 = arith.constant dense<0.000000e+00> : vector<8x128xf32>
    %110 = tpu.matmul %107, %109, %cst_112 {dimension_numbers = #tpu.dot_dimension_numbers<[1], [0], [0], [1], [0, 0, 1, 1], [], []>} : vector<8x256xf32>, vector<256x128xf32>, vector<8x128xf32> -> vector<8x128xf32>
    %111 = arith.addf %106, %110 : vector<8x128xf32>
    %c0_113 = arith.constant 0 : index
    %c0_114 = arith.constant 0 : index
    %112 = vector.load %arg9[%c0_113, %c0_114] : memref<1x128xf32, #tpu.memory_space<vmem>>, vector<1x128xf32>
    %113 = vector.broadcast %112 : vector<1x128xf32> to vector<8x128xf32>
    %114 = arith.addf %111, %113 : vector<8x128xf32>
    %cst_115 = arith.constant 0.000000e+00 : f32
    %115 = vector.broadcast %cst_115 : f32 to vector<8x128xf32>
    %116 = arith.maximumf %114, %115 : vector<8x128xf32>
    %c0_116 = arith.constant 0 : index
    %c0_117 = arith.constant 0 : index
    %117 = vector.load %arg10[%c0_116, %c0_117] : memref<128x512xf32, #tpu.memory_space<vmem>>, vector<128x512xf32>
    %cst_118 = arith.constant dense<0.000000e+00> : vector<8x512xf32>
    %118 = tpu.matmul %116, %117, %cst_118 {dimension_numbers = #tpu.dot_dimension_numbers<[1], [0], [0], [1], [0, 0, 1, 1], [], []>} : vector<8x128xf32>, vector<128x512xf32>, vector<8x512xf32> -> vector<8x512xf32>
    %c0_119 = arith.constant 0 : index
    %c0_120 = arith.constant 0 : index
    %119 = vector.load %arg11[%c0_119, %c0_120] : memref<1x512xf32, #tpu.memory_space<vmem>>, vector<1x512xf32>
    %120 = vector.broadcast %119 : vector<1x512xf32> to vector<8x512xf32>
    %121 = arith.addf %118, %120 : vector<8x512xf32>
    %cst_121 = arith.constant 0.000000e+00 : f32
    %122 = vector.broadcast %cst_121 : f32 to vector<8x512xf32>
    %123 = arith.maximumf %121, %122 : vector<8x512xf32>
    %c0_122 = arith.constant 0 : index
    %c0_123 = arith.constant 0 : index
    %124 = vector.load %arg12[%c0_122, %c0_123] : memref<512x256xf32, #tpu.memory_space<vmem>>, vector<512x256xf32>
    %cst_124 = arith.constant dense<0.000000e+00> : vector<8x256xf32>
    %125 = tpu.matmul %123, %124, %cst_124 {dimension_numbers = #tpu.dot_dimension_numbers<[1], [0], [0], [1], [0, 0, 1, 1], [], []>} : vector<8x512xf32>, vector<512x256xf32>, vector<8x256xf32> -> vector<8x256xf32>
    %c0_125 = arith.constant 0 : index
    %c0_126 = arith.constant 0 : index
    %126 = vector.load %arg13[%c0_125, %c0_126] : memref<1x256xf32, #tpu.memory_space<vmem>>, vector<1x256xf32>
    %127 = vector.broadcast %126 : vector<1x256xf32> to vector<8x256xf32>
    %128 = arith.addf %125, %127 : vector<8x256xf32>
    %cst_127 = arith.constant 0.000000e+00 : f32
    %129 = vector.broadcast %cst_127 : f32 to vector<8x256xf32>
    %130 = arith.maximumf %128, %129 : vector<8x256xf32>
    %c0_128 = arith.constant 0 : index
    %c0_129 = arith.constant 0 : index
    %131 = vector.load %arg14[%c0_128, %c0_129] : memref<256x128xf32, #tpu.memory_space<vmem>>, vector<256x128xf32>
    %cst_130 = arith.constant dense<0.000000e+00> : vector<8x128xf32>
    %132 = tpu.matmul %130, %131, %cst_130 {dimension_numbers = #tpu.dot_dimension_numbers<[1], [0], [0], [1], [0, 0, 1, 1], [], []>} : vector<8x256xf32>, vector<256x128xf32>, vector<8x128xf32> -> vector<8x128xf32>
    %c0_131 = arith.constant 0 : index
    %c0_132 = arith.constant 0 : index
    %133 = vector.load %arg15[%c0_131, %c0_132] : memref<1x128xf32, #tpu.memory_space<vmem>>, vector<1x128xf32>
    %134 = vector.broadcast %133 : vector<1x128xf32> to vector<8x128xf32>
    %135 = arith.addf %132, %134 : vector<8x128xf32>
    %c0_133 = arith.constant 0 : index
    %c0_134 = arith.constant 0 : index
    %136 = vector.load %arg16[%c0_133, %c0_134] : memref<8x128xf32, #tpu.memory_space<vmem>>, vector<8x128xf32>
    tpu.vector_store %arg16[%c0_133, %c0_134], %135 {strides = array<i32>} : memref<8x128xf32, #tpu.memory_space<vmem>>, vector<8x128xf32>,
    return
  }
  func.func @transform_0(%arg0: i32) -> (i32, i32, i32) {
    %c0_i32 = arith.constant 0 : i32
    %c0_i32_0 = arith.constant 0 : i32
    %c0_i32_1 = arith.constant 0 : i32
    return %arg0, %c0_i32, %c0_i32_0 : i32, i32, i32
  }
  func.func @transform_1(%arg0: i32) -> (i32, i32, i32) {
    %c0_i32 = arith.constant 0 : i32
    %c0_i32_0 = arith.constant 0 : i32
    %c0_i32_1 = arith.constant 0 : i32
    %c0_i32_2 = arith.constant 0 : i32
    return %c0_i32, %c0_i32_0, %c0_i32_1 : i32, i32, i32
  }
  func.func @transform_2(%arg0: i32) -> (i32, i32) {
    %c0_i32 = arith.constant 0 : i32
    %c0_i32_0 = arith.constant 0 : i32
    %c0_i32_1 = arith.constant 0 : i32
    return %c0_i32, %c0_i32_0 : i32, i32
  }
  func.func @transform_3(%arg0: i32) -> (i32, i32, i32) {
    %c0_i32 = arith.constant 0 : i32
    %c0_i32_0 = arith.constant 0 : i32
    %c0_i32_1 = arith.constant 0 : i32
    %c0_i32_2 = arith.constant 0 : i32
    return %c0_i32, %c0_i32_0, %c0_i32_1 : i32, i32, i32
  }
  func.func @transform_4(%arg0: i32) -> (i32, i32) {
    %c0_i32 = arith.constant 0 : i32
    %c0_i32_0 = arith.constant 0 : i32
    %c0_i32_1 = arith.constant 0 : i32
    return %c0_i32, %c0_i32_0 : i32, i32
  }
  func.func @transform_5(%arg0: i32) -> (i32, i32, i32) {
    %c0_i32 = arith.constant 0 : i32
    %c0_i32_0 = arith.constant 0 : i32
    %c0_i32_1 = arith.constant 0 : i32
    %c0_i32_2 = arith.constant 0 : i32
    return %c0_i32, %c0_i32_0, %c0_i32_1 : i32, i32, i32
  }
  func.func @transform_6(%arg0: i32) -> (i32, i32) {
    %c0_i32 = arith.constant 0 : i32
    %c0_i32_0 = arith.constant 0 : i32
    %c0_i32_1 = arith.constant 0 : i32
    return %c0_i32, %c0_i32_0 : i32, i32
  }
  func.func @transform_7(%arg0: i32) -> (i32, i32, i32) {
    %c0_i32 = arith.constant 0 : i32
    %c0_i32_0 = arith.constant 0 : i32
    %c0_i32_1 = arith.constant 0 : i32
    %c0_i32_2 = arith.constant 0 : i32
    return %c0_i32, %c0_i32_0, %c0_i32_1 : i32, i32, i32
  }
  func.func @transform_8(%arg0: i32) -> (i32, i32) {
    %c0_i32 = arith.constant 0 : i32
    %c0_i32_0 = arith.constant 0 : i32
    %c0_i32_1 = arith.constant 0 : i32
    return %c0_i32, %c0_i32_0 : i32, i32
  }
  func.func @transform_9(%arg0: i32) -> (i32, i32) {
    %c0_i32 = arith.constant 0 : i32
    %c0_i32_0 = arith.constant 0 : i32
    %c0_i32_1 = arith.constant 0 : i32
    return %c0_i32, %c0_i32_0 : i32, i32
  }
  func.func @transform_10(%arg0: i32) -> (i32, i32) {
    %c0_i32 = arith.constant 0 : i32
    %c0_i32_0 = arith.constant 0 : i32
    %c0_i32_1 = arith.constant 0 : i32
    return %c0_i32, %c0_i32_0 : i32, i32
  }
  func.func @transform_11(%arg0: i32) -> (i32, i32) {
    %c0_i32 = arith.constant 0 : i32
    %c0_i32_0 = arith.constant 0 : i32
    %c0_i32_1 = arith.constant 0 : i32
    return %c0_i32, %c0_i32_0 : i32, i32
  }
  func.func @transform_12(%arg0: i32) -> (i32, i32) {
    %c0_i32 = arith.constant 0 : i32
    %c0_i32_0 = arith.constant 0 : i32
    %c0_i32_1 = arith.constant 0 : i32
    return %c0_i32, %c0_i32_0 : i32, i32
  }
  func.func @transform_13(%arg0: i32) -> (i32, i32) {
    %c0_i32 = arith.constant 0 : i32
    %c0_i32_0 = arith.constant 0 : i32
    %c0_i32_1 = arith.constant 0 : i32
    return %c0_i32, %c0_i32_0 : i32, i32
  }
  func.func @transform_14(%arg0: i32) -> (i32, i32) {
    %c0_i32 = arith.constant 0 : i32
    %c0_i32_0 = arith.constant 0 : i32
    %c0_i32_1 = arith.constant 0 : i32
    return %c0_i32, %c0_i32_0 : i32, i32
  }
  func.func @transform_15(%arg0: i32) -> (i32, i32) {
    %c0_i32 = arith.constant 0 : i32
    %c0_i32_0 = arith.constant 0 : i32
    return %arg0, %c0_i32 : i32, i32
  }
}

</mosaic_0001>

<bundles_post_ra>
// kernel: a2c_forward.1
= control target key start
LH: loop header
LB: loop body
LE: loop exit
PB: predicated region body
PF: predicated region fallthrough
CT: control target
= control target key end

     0   :  { %20 = vsyncpa [#allocation6], 0  ;;  %s5775_s0 = inlined_call_operand.vmem [shape: f32[1,128,128], index: 0, kind: input, shape index: {}]   ;;  %s5776_s1 = inlined_call_operand.hbm [shape: f32[3,128,256], index: 1, kind: input, shape index: {}]   ;;  %s5777_s2 = inlined_call_operand.hbm [shape: f32[1,256], index: 2, kind: input, shape index: {}]   ;;  %s5778_s3 = inlined_call_operand.hbm [shape: f32[3,256,256], index: 3, kind: input, shape index: {}]   ;;  %s5779_s4 = inlined_call_operand.hbm [shape: f32[1,256], index: 4, kind: input, shape index: {}]   ;;  %s5780_s5 = inlined_call_operand.hbm [shape: f32[3,256,256], index: 5, kind: input, shape index: {}]   ;;  %s5781_s6 = inlined_call_operand.hbm [shape: f32[1,256], index: 6, kind: input, shape index: {}]   ;;  %s5782_s7 = inlined_call_operand.hbm [shape: f32[10,256,128], index: 7, kind: input, shape index: {}]   ;;  %s5783_s8 = inlined_call_operand.hbm [shape: f32[1,128], index: 8, kind: input, shape index: {}]   ;;  %s5784_s9 = inlined_call_operand.hbm [shape: f32[128,512], index: 9, kind: input, shape index: {}]   ;;  %s5785_s10 = inlined_call_operand.hbm [shape: f32[1,512], index: 10, kind: input, shape index: {}]   ;;  %s5786_s11 = inlined_call_operand.hbm [shape: f32[512,256], index: 11, kind: input, shape index: {}]   ;;  %s5787_s12 = inlined_call_operand.hbm [shape: f32[1,256], index: 12, kind: input, shape index: {}]   ;;  %s5788_s13 = inlined_call_operand.hbm [shape: f32[256,128], index: 13, kind: input, shape index: {}]   ;;  %s5789_s14 = inlined_call_operand.hbm [shape: f32[1,128], index: 14, kind: input, shape index: {}]   ;;  %s5790_s15 = inlined_call_operand.vmem [shape: f32[8,128], index: 15, kind: output, shape index: {}]  }
   0x1   :  { %21 = vsyncpa [#allocation8], 0 }
   0x2   :  { %22 = vsyncpa [#allocation11], 0 }
   0x3   :  { %23 = vsyncpa [#allocation14], 0 }
   0x4   :  { %24 = vsyncpa [#allocation17], 0 }
   0x5   :  { %25 = vsyncpa [#allocation20], 0 }
   0x6   :  { %26 = vsyncpa [#allocation23], 0  ;;  %s48_s20 = sshll.u32 %s5777_s2, 4  ;;  %s49_s20 = int_to_ptr.hbm [resolvable:$true] %s48_s20 }
   0x7   :  { %27 = vsyncpa [#allocation26], 0  ;;  %s4401_s21 = smov [#allocation7]   ;;  %s72_s25 = sshll.u32 %s5779_s4, 4  ;;  %s73_s25 = int_to_ptr.hbm [resolvable:$true] %s72_s25 }
   0x8   :  { %s50_s22 = sshll.u32 %s4401_s21, 4  ;;  %s4402_s26 = smov [#allocation10]   ;;  %s51_s22 = int_to_ptr.vmem [resolvable:$true] %s50_s22 }
   0x9   :  { %53 = dma.hbm_to_vmem [thread:$0]  %s49_s20, 32, %s51_s22, [#allocation8]  }
   0xa   :  { %s74_s27 = sshll.u32 %s4402_s26, 4  ;;  %s96_s30 = sshll.u32 %s5781_s6, 4  ;;  %s75_s27 = int_to_ptr.vmem [resolvable:$true] %s74_s27  ;;  %s97_s30 = int_to_ptr.hbm [resolvable:$true] %s96_s30 }
   0xb   :  { %77 = dma.hbm_to_vmem [thread:$0]  %s73_s25, 32, %s75_s27, [#allocation11]  }
   0xc   :  { %s120_s17 = sshll.u32 %s5783_s8, 4  ;;  %s4403_s18 = smov [#allocation13]   ;;  %s121_s17 = int_to_ptr.hbm [resolvable:$true] %s120_s17 }
   0xd   :  { %s98_s19 = sshll.u32 %s4403_s18, 4  ;;  %s4404_s4 = smov [#allocation16]   ;;  %s99_s19 = int_to_ptr.vmem [resolvable:$true] %s98_s19 }
   0xe   :  { %101 = dma.hbm_to_vmem [thread:$0]  %s97_s30, 32, %s99_s19, [#allocation14]  }
   0xf   :  { %s122_s20 = sshll.u32 %s4404_s4, 4  ;;  %s144_s23 = sshll.u32 %s5785_s10, 4  ;;  %s123_s20 = int_to_ptr.vmem [resolvable:$true] %s122_s20  ;;  %s145_s23 = int_to_ptr.hbm [resolvable:$true] %s144_s23 }
  0x10   :  { %125 = dma.hbm_to_vmem [thread:$0]  %s121_s17, 16, %s123_s20, [#allocation17]  }
  0x11   :  { %s168_s25 = sshll.u32 %s5787_s12, 4  ;;  %s4405_s26 = smov [#allocation19]   ;;  %s169_s25 = int_to_ptr.hbm [resolvable:$true] %s168_s25 }
  0x12   :  { %s146_s8 = sshll.u32 %s4405_s26, 4  ;;  %s4406_s27 = smov [#allocation22]   ;;  %s147_s8 = int_to_ptr.vmem [resolvable:$true] %s146_s8 }
  0x13   :  { %149 = dma.hbm_to_vmem [thread:$0]  %s145_s23, 64, %s147_s8, [#allocation20]  }
  0x14   :  { %s170_s28 = sshll.u32 %s4406_s27, 4  ;;  %s34_s2 = sshll.u32 %s5776_s1, 4  ;;  %s171_s28 = int_to_ptr.vmem [resolvable:$true] %s170_s28  ;;  %s35_s2 = int_to_ptr.hbm [resolvable:$true] %s34_s2 }
  0x15   :  { %173 = dma.hbm_to_vmem [thread:$0]  %s169_s25, 32, %s171_s28, [#allocation23]  }
  0x16   :  { %s4407_s10 = smov [#allocation5]   ;;  %s58_s12 = sshll.u32 %s5778_s3, 4  ;;  %s59_s12 = int_to_ptr.hbm [resolvable:$true] %s58_s12 }
  0x17   :  { %s36_s16 = sshll.u32 %s4407_s10, 4  ;;  %s4408_s19 = smov 256   ;;  %s37_s16 = int_to_ptr.vmem [resolvable:$true] %s36_s16 }
  0x18   :  { %s4409_s4 = smov 16   ;;  %s4410_s20 = smov [#allocation9]  }
  0x19   :  { %42 = dma.hbm_to_vmem [thread:$0]  %s35_s2, 12288, %s37_s16, [#allocation6], %s4408_s19, %s4408_s19, %s4409_s4  }
  0x1a   :  { %s60_s21 = sshll.u32 %s4410_s20, 4  ;;  %s82_s23 = sshll.u32 %s5780_s5, 4  ;;  %s61_s21 = int_to_ptr.vmem [resolvable:$true] %s60_s21  ;;  %s83_s23 = int_to_ptr.hbm [resolvable:$true] %s82_s23 }
  0x1b   :  { %66 = dma.hbm_to_vmem [thread:$0]  %s59_s12, 24576, %s61_s21, [#allocation8], %s4408_s19, %s4408_s19, %s4409_s4  }
  0x1c   :  { %s106_s24 = sshll.u32 %s5782_s7, 4  ;;  %s4411_s25 = smov [#allocation12]   ;;  %s107_s24 = int_to_ptr.hbm [resolvable:$true] %s106_s24 }
  0x1d   :  { %s84_s26 = sshll.u32 %s4411_s25, 4  ;;  %s4412_s8 = smov [#allocation15]   ;;  %s85_s26 = int_to_ptr.vmem [resolvable:$true] %s84_s26 }
  0x1e   :  { %90 = dma.hbm_to_vmem [thread:$0]  %s83_s23, 24576, %s85_s26, [#allocation11], %s4408_s19, %s4408_s19, %s4409_s4  }
  0x1f   :  { %s108_s5 = sshll.u32 %s4412_s8, 4  ;;  %s4413_s27 = smov 128   ;;  %s109_s5 = int_to_ptr.vmem [resolvable:$true] %s108_s5 }
  0x20   :  { %s4414_s28 = smov 8   ;;  %s130_s2 = sshll.u32 %s5784_s9, 4  ;;  %s131_s2 = int_to_ptr.hbm [resolvable:$true] %s130_s2 }
  0x21   :  { %114 = dma.hbm_to_vmem [thread:$0]  %s107_s24, 40960, %s109_s5, [#allocation14], %s4413_s27, %s4413_s27, %s4414_s28  }
  0x22   :  { %s4415_s7 = smov [#allocation18]   ;;  %s154_s18 = sshll.u32 %s5786_s11, 4  ;;  %s155_s18 = int_to_ptr.hbm [resolvable:$true] %s154_s18 }
  0x23   :  { %s132_s10 = sshll.u32 %s4415_s7, 4  ;;  %s4416_s12 = smov 512   ;;  %s133_s10 = int_to_ptr.vmem [resolvable:$true] %s132_s10 }
  0x24   :  { %s4417_s20 = smov 32   ;;  %s4418_s21 = smov [#allocation21]  }
  0x25   :  { %138 = dma.hbm_to_vmem [thread:$0]  %s131_s2, 8192, %s133_s10, [#allocation17], %s4416_s12, %s4416_s12, %s4417_s20  }
  0x26   :  { %s156_s1 = sshll.u32 %s4418_s21, 4  ;;  %s178_s3 = sshll.u32 %s5788_s13, 4  ;;  %s157_s1 = int_to_ptr.vmem [resolvable:$true] %s156_s1  ;;  %s179_s3 = int_to_ptr.hbm [resolvable:$true] %s178_s3 }
  0x27   :  { %162 = dma.hbm_to_vmem [thread:$0]  %s155_s18, 16384, %s157_s1, [#allocation20], %s4408_s19, %s4408_s19, %s4409_s4  }
  0x28   :  { %s192_s11 = sshll.u32 %s5789_s14, 4  ;;  %s4419_s24 = smov [#allocation24]   ;;  %s193_s11 = int_to_ptr.hbm [resolvable:$true] %s192_s11 }
  0x29   :  { %s180_s25 = sshll.u32 %s4419_s24, 4  ;;  %s4420_s26 = smov [#allocation25]   ;;  %s181_s25 = int_to_ptr.vmem [resolvable:$true] %s180_s25 }
  0x2a   :  { %186 = dma.hbm_to_vmem [thread:$0]  %s179_s3, 4096, %s181_s25, [#allocation23], %s4413_s27, %s4413_s27, %s4414_s28  }
  0x2b   :  { %s194_s8 = sshll.u32 %s4420_s26, 4  ;;  %s195_s8 = int_to_ptr.vmem [resolvable:$true] %s194_s8 }
  0x2c   :  { %197 = dma.hbm_to_vmem [thread:$0]  %s193_s11, 16, %s195_s8, [#allocation26]  }
  0x2d   :  { %4385 = dma.done.wait [#allocation6], 12288  }
  0x2e   :  { %4386 = vsyncadd [#allocation6], 4294955008 }
  0x2f   :  { %4387 = dma.done.wait [#allocation8], 24608  }
  0x30   :  { %4388 = vsyncadd [#allocation8], 4294942688 }
  0x31   :  { %4389 = dma.done.wait [#allocation11], 24608  }
  0x32   :  { %4390 = vsyncadd [#allocation11], 4294942688 }
  0x33   :  { %4391 = dma.done.wait [#allocation14], 40992  }
  0x34   :  { %4392 = vsyncadd [#allocation14], 4294926304 }
  0x35   :  { %4393 = dma.done.wait [#allocation17], 8208  }
  0x36   :  { %4394 = vsyncadd [#allocation17], 4294959088 }
  0x37   :  { %4395 = dma.done.wait [#allocation20], 16448  }
  0x38   :  { %4396 = vsyncadd [#allocation20], 4294950848 }
  0x39   :  { %4397 = dma.done.wait [#allocation23], 4128  }
  0x3a   :  { %4398 = vsyncadd [#allocation23], 4294963168 }
  0x3b   :  { %4399 = dma.done.wait [#allocation26], 16  }
  0x3c   :  { %4400 = vsyncadd [#allocation26], 4294967280  ;;  %v332_v0 = vld [vmem:[#allocation5 + $0x1f0] sm:$0xff]  ;;  %v333_v1 = vld [vmem:[#allocation5 + $0x1f8] sm:$0xff] }
  0x3d   :  { %v298_v2 = vld [vmem:[#allocation5 + $0xf0] sm:$0xff]  ;;  %334 = vmatpush.msra.mxu0 %v332_v0  ;;  %393 = vmatpush.msra.mxu1 %v333_v1  ;;  %v299_v3 = vld [vmem:[#allocation5 + $0xf8] sm:$0xff]  ;;  %v330_v4 = vld [vmem:[#allocation5 + $0x1e0] sm:$0xff] }
  0x3e   :  { %v331_v5 = vld [vmem:[#allocation5 + $0x1e8] sm:$0xff]  ;;  %452 = vmatpush.msra.mxu2 %v298_v2  ;;  %511 = vmatpush.msra.mxu3 %v299_v3  ;;  %v296_v6 = vld [vmem:[#allocation5 + $0xe0] sm:$0xff]  ;;  %v328_v8 = vld [vmem:[#allocation5 + $0x1d0] sm:$0xff] }
  0x3f   :  { %v297_v7 = vld [vmem:[#allocation5 + $0xe8] sm:$0xff]  ;;  %335 = vmatpush.msra.mxu0 %v330_v4  ;;  %394 = vmatpush.msra.mxu1 %v331_v5  ;;  %v329_v9 = vld [vmem:[#allocation5 + $0x1d8] sm:$0xff]  ;;  %v294_v10 = vld [vmem:[#allocation5 + $0xd0] sm:$0xff] }
  0x40   :  { %v295_v11 = vld [vmem:[#allocation5 + $0xd8] sm:$0xff]  ;;  %453 = vmatpush.msra.mxu2 %v296_v6  ;;  %512 = vmatpush.msra.mxu3 %v297_v7  ;;  %v326_v12 = vld [vmem:[#allocation5 + $0x1c0] sm:$0xff]  ;;  %v327_v13 = vld [vmem:[#allocation5 + $0x1c8] sm:$0xff] }
  0x41   :  { %336 = vmatpush.msra.mxu0 %v328_v8  ;;  %395 = vmatpush.msra.mxu1 %v329_v9  ;;  %v292_v14 = vld [vmem:[#allocation5 + $0xc0] sm:$0xff]  ;;  %v293_v15 = vld [vmem:[#allocation5 + $0xc8] sm:$0xff]  ;;  %v324_v16 = vld [vmem:[#allocation5 + $0x1b0] sm:$0xff] }
  0x42   :  { %454 = vmatpush.msra.mxu2 %v294_v10  ;;  %513 = vmatpush.msra.mxu3 %v295_v11  ;;  %v325_v17 = vld [vmem:[#allocation5 + $0x1b8] sm:$0xff]  ;;  %v290_v18 = vld [vmem:[#allocation5 + $0xb0] sm:$0xff]  ;;  %v322_v20 = vld [vmem:[#allocation5 + $0x1a0] sm:$0xff] }
  0x43   :  { %337 = vmatpush.msra.mxu0 %v326_v12  ;;  %396 = vmatpush.msra.mxu1 %v327_v13  ;;  %v291_v19 = vld [vmem:[#allocation5 + $0xb8] sm:$0xff]  ;;  %v323_v21 = vld [vmem:[#allocation5 + $0x1a8] sm:$0xff]  ;;  %v288_v22 = vld [vmem:[#allocation5 + $0xa0] sm:$0xff] }
  0x44   :  { %455 = vmatpush.msra.mxu2 %v292_v14  ;;  %514 = vmatpush.msra.mxu3 %v293_v15  ;;  %v289_v23 = vld [vmem:[#allocation5 + $0xa8] sm:$0xff]  ;;  %v320_v24 = vld [vmem:[#allocation5 + $0x190] sm:$0xff]  ;;  %v321_v25 = vld [vmem:[#allocation5 + $0x198] sm:$0xff] }
  0x45   :  { %338 = vmatpush.msra.mxu0 %v324_v16  ;;  %397 = vmatpush.msra.mxu1 %v325_v17  ;;  %v286_v26 = vld [vmem:[#allocation5 + $0x90] sm:$0xff]  ;;  %v287_v27 = vld [vmem:[#allocation5 + $0x98] sm:$0xff]  ;;  %v318_v28 = vld [vmem:[#allocation5 + $0x180] sm:$0xff] }
  0x46   :  { %456 = vmatpush.msra.mxu2 %v290_v18  ;;  %515 = vmatpush.msra.mxu3 %v291_v19  ;;  %v319_v29 = vld [vmem:[#allocation5 + $0x188] sm:$0xff]  ;;  %v284_v30 = vld [vmem:[#allocation5 + $0x80] sm:$0xff]  ;;  %v316_v32 = vld [vmem:[#allocation5 + $0x170] sm:$0xff] }
  0x47   :  { %339 = vmatpush.msra.mxu0 %v322_v20  ;;  %398 = vmatpush.msra.mxu1 %v323_v21  ;;  %v285_v31 = vld [vmem:[#allocation5 + $0x88] sm:$0xff]  ;;  %v317_v33 = vld [vmem:[#allocation5 + $0x178] sm:$0xff]  ;;  %v282_v34 = vld [vmem:[#allocation5 + $0x70] sm:$0xff] }
  0x48   :  { %457 = vmatpush.msra.mxu2 %v288_v22  ;;  %516 = vmatpush.msra.mxu3 %v289_v23  ;;  %v283_v35 = vld [vmem:[#allocation5 + $0x78] sm:$0xff]  ;;  %v314_v36 = vld [vmem:[#allocation5 + $0x160] sm:$0xff]  ;;  %v315_v37 = vld [vmem:[#allocation5 + $0x168] sm:$0xff] }
  0x49   :  { %340 = vmatpush.msra.mxu0 %v320_v24  ;;  %399 = vmatpush.msra.mxu1 %v321_v25  ;;  %v280_v38 = vld [vmem:[#allocation5 + $0x60] sm:$0xff]  ;;  %v281_v39 = vld [vmem:[#allocation5 + $0x68] sm:$0xff]  ;;  %v312_v40 = vld [vmem:[#allocation5 + $0x150] sm:$0xff] }
  0x4a   :  { %458 = vmatpush.msra.mxu2 %v286_v26  ;;  %517 = vmatpush.msra.mxu3 %v287_v27  ;;  %v313_v41 = vld [vmem:[#allocation5 + $0x158] sm:$0xff]  ;;  %v278_v42 = vld [vmem:[#allocation5 + $0x50] sm:$0xff]  ;;  %v310_v44 = vld [vmem:[#allocation5 + $0x140] sm:$0xff] }
  0x4b   :  { %341 = vmatpush.msra.mxu0 %v318_v28  ;;  %400 = vmatpush.msra.mxu1 %v319_v29  ;;  %v279_v43 = vld [vmem:[#allocation5 + $0x58] sm:$0xff]  ;;  %v311_v45 = vld [vmem:[#allocation5 + $0x148] sm:$0xff]  ;;  %v276_v46 = vld [vmem:[#allocation5 + $0x40] sm:$0xff] }
  0x4c   :  { %459 = vmatpush.msra.mxu2 %v284_v30  ;;  %518 = vmatpush.msra.mxu3 %v285_v31  ;;  %v277_v47 = vld [vmem:[#allocation5 + $0x48] sm:$0xff]  ;;  %v308_v48 = vld [vmem:[#allocation5 + $0x130] sm:$0xff]  ;;  %v309_v49 = vld [vmem:[#allocation5 + $0x138] sm:$0xff] }
  0x4d   :  { %342 = vmatpush.msra.mxu0 %v316_v32  ;;  %401 = vmatpush.msra.mxu1 %v317_v33  ;;  %v274_v50 = vld [vmem:[#allocation5 + $0x30] sm:$0xff]  ;;  %v275_v51 = vld [vmem:[#allocation5 + $0x38] sm:$0xff]  ;;  %v306_v52 = vld [vmem:[#allocation5 + $0x120] sm:$0xff] }
  0x4e   :  { %460 = vmatpush.msra.mxu2 %v282_v34  ;;  %519 = vmatpush.msra.mxu3 %v283_v35  ;;  %v307_v53 = vld [vmem:[#allocation5 + $0x128] sm:$0xff]  ;;  %v272_v54 = vld [vmem:[#allocation5 + $0x20] sm:$0xff]  ;;  %v304_v56 = vld [vmem:[#allocation5 + $0x110] sm:$0xff] }
  0x4f   :  { %343 = vmatpush.msra.mxu0 %v314_v36  ;;  %402 = vmatpush.msra.mxu1 %v315_v37  ;;  %v273_v55 = vld [vmem:[#allocation5 + $0x28] sm:$0xff]  ;;  %v305_v57 = vld [vmem:[#allocation5 + $0x118] sm:$0xff]  ;;  %v270_v58 = vld [vmem:[#allocation5 + $0x10] sm:$0xff] }
  0x50   :  { %461 = vmatpush.msra.mxu2 %v280_v38  ;;  %520 = vmatpush.msra.mxu3 %v281_v39  ;;  %v271_v59 = vld [vmem:[#allocation5 + $0x18] sm:$0xff]  ;;  %v302_v60 = vld [vmem:[#allocation5 + $0x100] sm:$0xff]  ;;  %v303_v61 = vld [vmem:[#allocation5 + $0x108] sm:$0xff] }
  0x51   :  { %344 = vmatpush.msra.mxu0 %v312_v40  ;;  %403 = vmatpush.msra.mxu1 %v313_v41  ;;  %v268_v62 = vld [vmem:[#allocation5] sm:$0xff]  ;;  %v269_v63 = vld [vmem:[#allocation5 + $0x8] sm:$0xff]  ;;  %v4564_v2 = vld [vmem:[%s5775_s0 + $0x10] sm:$0xff] }
  0x52   :  { %462 = vmatpush.msra.mxu2 %v278_v42  ;;  %521 = vmatpush.msra.mxu3 %v279_v43  ;;  %v255_v0 = vld [vmem:[%s5775_s0 + $0x8] sm:$0xff]  ;;  %v254_v1 = vld [vmem:[%s5775_s0] sm:$0xff]  ;;  %v4571_v3 = vld [vmem:[%s5775_s0 + $0x18] sm:$0xff] }
  0x53   :  { %345 = vmatpush.msra.mxu0 %v310_v44  ;;  %404 = vmatpush.msra.mxu1 %v311_v45  ;;  %v615_v4 = vld [vmem:[#allocation5 + $0x2f0] sm:$0xff]  ;;  %v616_v5 = vld [vmem:[#allocation5 + $0x2f8] sm:$0xff]  ;;  %v4580_v6 = vld [vmem:[%s5775_s0 + $0x20] sm:$0xff] }
  0x54   :  { %463 = vmatpush.msra.mxu2 %v276_v46  ;;  %522 = vmatpush.msra.mxu3 %v277_v47  ;;  %v613_v7 = vld [vmem:[#allocation5 + $0x2e0] sm:$0xff]  ;;  %v614_v8 = vld [vmem:[#allocation5 + $0x2e8] sm:$0xff]  ;;  %v611_v10 = vld [vmem:[#allocation5 + $0x2d0] sm:$0xff] }
  0x55   :  { %346 = vmatpush.msra.mxu0 %v308_v48  ;;  %405 = vmatpush.msra.mxu1 %v309_v49  ;;  %v4589_v9 = vld [vmem:[%s5775_s0 + $0x28] sm:$0xff]  ;;  %v612_v11 = vld [vmem:[#allocation5 + $0x2d8] sm:$0xff]  ;;  %v4598_v12 = vld [vmem:[%s5775_s0 + $0x30] sm:$0xff] }
  0x56   :  { %464 = vmatpush.msra.mxu2 %v274_v50  ;;  %523 = vmatpush.msra.mxu3 %v275_v51  ;;  %v609_v13 = vld [vmem:[#allocation5 + $0x2c0] sm:$0xff]  ;;  %v610_v14 = vld [vmem:[#allocation5 + $0x2c8] sm:$0xff]  ;;  %v4607_v15 = vld [vmem:[%s5775_s0 + $0x38] sm:$0xff] }
  0x57   :  { %347 = vmatpush.msra.mxu0 %v306_v52  ;;  %406 = vmatpush.msra.mxu1 %v307_v53  ;;  %v607_v16 = vld [vmem:[#allocation5 + $0x2b0] sm:$0xff]  ;;  %v608_v17 = vld [vmem:[#allocation5 + $0x2b8] sm:$0xff]  ;;  %v4616_v18 = vld [vmem:[%s5775_s0 + $0x40] sm:$0xff] }
  0x58   :  { %465 = vmatpush.msra.mxu2 %v272_v54  ;;  %524 = vmatpush.msra.mxu3 %v273_v55  ;;  %v605_v19 = vld [vmem:[#allocation5 + $0x2a0] sm:$0xff]  ;;  %v606_v20 = vld [vmem:[#allocation5 + $0x2a8] sm:$0xff]  ;;  %v603_v21 = vld [vmem:[#allocation5 + $0x290] sm:$0xff] }
  0x59   :  { %348 = vmatpush.msra.mxu0 %v304_v56  ;;  %407 = vmatpush.msra.mxu1 %v305_v57  ;;  %v604_v22 = vld [vmem:[#allocation5 + $0x298] sm:$0xff]  ;;  %v601_v23 = vld [vmem:[#allocation5 + $0x280] sm:$0xff]  ;;  %v602_v24 = vld [vmem:[#allocation5 + $0x288] sm:$0xff] }
  0x5a   :  { %466 = vmatpush.msra.mxu2 %v270_v58  ;;  %525 = vmatpush.msra.mxu3 %v271_v59  ;;  %v4625_v25 = vld [vmem:[%s5775_s0 + $0x48] sm:$0xff]  ;;  %v599_v26 = vld [vmem:[#allocation5 + $0x270] sm:$0xff]  ;;  %v600_v27 = vld [vmem:[#allocation5 + $0x278] sm:$0xff] }
  0x5b   :  { %349 = vmatpush.msra.mxu0 %v302_v60  ;;  %408 = vmatpush.msra.mxu1 %v303_v61  ;;  %v597_v28 = vld [vmem:[#allocation5 + $0x260] sm:$0xff]  ;;  %v598_v29 = vld [vmem:[#allocation5 + $0x268] sm:$0xff]  ;;  %v595_v30 = vld [vmem:[#allocation5 + $0x250] sm:$0xff] }
  0x5c   :  { %467 = vmatpush.msra.mxu2 %v268_v62  ;;  %526 = vmatpush.msra.mxu3 %v269_v63  ;;  %v596_v31 = vld [vmem:[#allocation5 + $0x258] sm:$0xff]  ;;  %v4634_v32 = vld [vmem:[%s5775_s0 + $0x50] sm:$0xff]  ;;  %v593_v33 = vld [vmem:[#allocation5 + $0x240] sm:$0xff] }
  0x5d   :  { %350 = vmatmul.f32.vlgmr.msra.gmra.mxu0 %v255_v0  ;;  %409 = vmatmul.f32.vlgmr.msra.gmra.mxu1 %v255_v0  ;;  %v594_v34 = vld [vmem:[#allocation5 + $0x248] sm:$0xff]  ;;  %v591_v35 = vld [vmem:[#allocation5 + $0x230] sm:$0xff]  ;;  %v592_v36 = vld [vmem:[#allocation5 + $0x238] sm:$0xff] }
  0x5e   :  { %468 = vmatmul.f32.vlgmr.msra.gmra.mxu2 %v254_v1  ;;  %527 = vmatmul.f32.vlgmr.msra.gmra.mxu3 %v254_v1  ;;  %v589_v37 = vld [vmem:[#allocation5 + $0x220] sm:$0xff]  ;;  %v590_v38 = vld [vmem:[#allocation5 + $0x228] sm:$0xff]  ;;  %v4643_v39 = vld [vmem:[%s5775_s0 + $0x58] sm:$0xff] }
  0x5f   :  { %617 = vmatpush.msrb.mxu0 %v615_v4  ;;  %676 = vmatpush.msrb.mxu1 %v616_v5  ;;  %v587_v40 = vld [vmem:[#allocation5 + $0x210] sm:$0xff]  ;;  %v588_v41 = vld [vmem:[#allocation5 + $0x218] sm:$0xff]  ;;  %v585_v42 = vld [vmem:[#allocation5 + $0x200] sm:$0xff] }
  0x60   :  { %v586_v43 = vld [vmem:[#allocation5 + $0x208] sm:$0xff]  ;;  %v4652_v44 = vld [vmem:[%s5775_s0 + $0x60] sm:$0xff]  ;;  %v4670_v46 = vld [vmem:[%s5775_s0 + $0x70] sm:$0xff] }
  0x61   :  { %618 = vmatpush.msrb.mxu0 %v613_v7  ;;  %677 = vmatpush.msrb.mxu1 %v614_v8  ;;  %v4661_v45 = vld [vmem:[%s5775_s0 + $0x68] sm:$0xff]  ;;  %v974_v57 = vld [vmem:[#allocation9 + $0x2f0] sm:$0xff] }
  0x62   :  { %v1006_v58 = vld [vmem:[#allocation9 + $0x3f0] sm:$0xff]  ;;  %1008 = vmatpush.msrb.mxu2 %v974_v57  ;;  %v972_v61 = vld [vmem:[#allocation9 + $0x2e0] sm:$0xff] }
  0x63   :  { %619 = vmatpush.msrb.mxu0 %v611_v10  ;;  %678 = vmatpush.msrb.mxu1 %v612_v11  ;;  %v1004_v62 = vld [vmem:[#allocation9 + $0x3e0] sm:$0xff]  ;;  %v970_v1 = vld [vmem:[#allocation9 + $0x2d0] sm:$0xff] }
  0x64   :  { %1061 = vmatpush.msrb.mxu3 %v1006_v58  ;;  %1009 = vmatpush.msrb.mxu2 %v972_v61  ;;  %v907_v5 = vld [vmem:[#allocation9 + $0xf0] sm:$0xff]  ;;  %v968_v7 = vld [vmem:[#allocation9 + $0x2c0] sm:$0xff] }
  0x65   :  { %353 = vmatmul.f32.gmra.mxu0 %v4564_v2  ;;  %412 = vmatmul.f32.gmra.mxu1 %v4564_v2  ;;  %v1000_v8 = vld [vmem:[#allocation9 + $0x3c0] sm:$0xff]  ;;  %v903_v11 = vld [vmem:[#allocation9 + $0xd0] sm:$0xff] }
  0x66   :  { %471 = vmatmul.f32.gmra.mxu2 %v255_v0  ;;  %530 = vmatmul.f32.gmra.mxu3 %v255_v0  ;;  %v937_v10 = vld [vmem:[#allocation9 + $0x1e0] sm:$0xff]  ;;  %v990_v57 = vld [vmem:[#allocation9 + $0x370] sm:$0xff] }
  0x67   :  { %620 = vmatpush.msrb.mxu0 %v609_v13  ;;  %679 = vmatpush.msrb.mxu1 %v610_v14  ;;  %v901_v13 = vld [vmem:[#allocation9 + $0xc0] sm:$0xff]  ;;  %v883_v58 = vld [vmem:[#allocation9 + $0x30] sm:$0xff] }
  0x68   :  { %1062 = vmatpush.msrb.mxu3 %v1004_v62  ;;  %1010 = vmatpush.msrb.mxu2 %v970_v1  ;;  %v933_v14 = vld [vmem:[#allocation9 + $0x1c0] sm:$0xff]  ;;  %v915_v61 = vld [vmem:[#allocation9 + $0x130] sm:$0xff] }
  0x69   :  { %621 = vmatpush.msrb.mxu0 %v607_v16  ;;  %680 = vmatpush.msrb.mxu1 %v608_v17  ;;  %v966_v17 = vld [vmem:[#allocation9 + $0x2b0] sm:$0xff]  ;;  %v956_v62 = vld [vmem:[#allocation9 + $0x260] sm:$0xff] }
  0x6a   :  { %1011 = vmatpush.msrb.mxu2 %v968_v7  ;;  %v988_v1 = vld [vmem:[#allocation9 + $0x360] sm:$0xff] }
  0x6b   :  { %622 = vmatpush.msrb.mxu0 %v605_v19  ;;  %681 = vmatpush.msrb.mxu1 %v606_v20  ;;  %v899_v19 = vld [vmem:[#allocation9 + $0xb0] sm:$0xff]  ;;  %v913_v7 = vld [vmem:[#allocation9 + $0x120] sm:$0xff] }
  0x6c   :  { %1012 = vmatpush.msrb.mxu2 %v966_v17  ;;  %v931_v20 = vld [vmem:[#allocation9 + $0x1b0] sm:$0xff]  ;;  %v909_v17 = vld [vmem:[#allocation9 + $0x100] sm:$0xff] }
  0x6d   :  { %356 = vmatmul.f32.gmra.mxu0 %v4571_v3  ;;  %415 = vmatmul.f32.gmra.mxu1 %v4571_v3 }
  0x6e   :  { %474 = vmatmul.f32.gmra.mxu2 %v4564_v2  ;;  %533 = vmatmul.f32.gmra.mxu3 %v4564_v2 }
  0x6f   :  { %623 = vmatpush.msrb.mxu0 %v603_v21  ;;  %682 = vmatpush.msrb.mxu1 %v604_v22  ;;  %v897_v21 = vld [vmem:[#allocation9 + $0xa0] sm:$0xff] }
  0x70   :  { %v929_v22 = vld [vmem:[#allocation9 + $0x1a0] sm:$0xff] }
  0x71   :  { %624 = vmatpush.msrb.mxu0 %v601_v23  ;;  %683 = vmatpush.msrb.mxu1 %v602_v24  ;;  %v895_v23 = vld [vmem:[#allocation9 + $0x90] sm:$0xff] }
  0x72   :  { %v927_v24 = vld [vmem:[#allocation9 + $0x190] sm:$0xff] }
  0x73   :  { %625 = vmatpush.msrb.mxu0 %v599_v26  ;;  %684 = vmatpush.msrb.mxu1 %v600_v27  ;;  %v925_v26 = vld [vmem:[#allocation9 + $0x180] sm:$0xff] }
  0x75   :  { %359 = vmatmul.f32.gmra.mxu0 %v4580_v6  ;;  %418 = vmatmul.f32.gmra.mxu1 %v4580_v6 }
  0x76   :  { %477 = vmatmul.f32.gmra.mxu2 %v4571_v3  ;;  %536 = vmatmul.f32.gmra.mxu3 %v4571_v3 }
  0x77   :  { %626 = vmatpush.msrb.mxu0 %v597_v28  ;;  %685 = vmatpush.msrb.mxu1 %v598_v29  ;;  %v964_v29 = vld [vmem:[#allocation9 + $0x2a0] sm:$0xff] }
  0x78   :  { %1013 = vmatpush.msrb.mxu2 %v964_v29 }
  0x79   :  { %627 = vmatpush.msrb.mxu0 %v595_v30  ;;  %686 = vmatpush.msrb.mxu1 %v596_v31  ;;  %v996_v30 = vld [vmem:[#allocation9 + $0x3a0] sm:$0xff]  ;;  %v891_v31 = vld [vmem:[#allocation9 + $0x70] sm:$0xff] }
  0x7b   :  { %628 = vmatpush.msrb.mxu0 %v593_v33  ;;  %687 = vmatpush.msrb.mxu1 %v594_v34  ;;  %v889_v33 = vld [vmem:[#allocation9 + $0x60] sm:$0xff] }
  0x7c   :  { %v921_v34 = vld [vmem:[#allocation9 + $0x160] sm:$0xff] }
  0x7d   :  { %362 = vmatmul.f32.gmra.mxu0 %v4589_v9  ;;  %421 = vmatmul.f32.gmra.mxu1 %v4589_v9 }
  0x7e   :  { %480 = vmatmul.f32.gmra.mxu2 %v4580_v6  ;;  %539 = vmatmul.f32.gmra.mxu3 %v4580_v6 }
  0x7f   :  { %629 = vmatpush.msrb.mxu0 %v591_v35  ;;  %688 = vmatpush.msrb.mxu1 %v592_v36  ;;  %v962_v35 = vld [vmem:[#allocation9 + $0x290] sm:$0xff] }
  0x80   :  { %v994_v36 = vld [vmem:[#allocation9 + $0x390] sm:$0xff]  ;;  %1014 = vmatpush.msrb.mxu2 %v962_v35 }
  0x81   :  { %630 = vmatpush.msrb.mxu0 %v589_v37  ;;  %689 = vmatpush.msrb.mxu1 %v590_v38  ;;  %v887_v37 = vld [vmem:[#allocation9 + $0x50] sm:$0xff] }
  0x82   :  { %v919_v38 = vld [vmem:[#allocation9 + $0x150] sm:$0xff] }
  0x83   :  { %631 = vmatpush.msrb.mxu0 %v587_v40  ;;  %690 = vmatpush.msrb.mxu1 %v588_v41  ;;  %v992_v40 = vld [vmem:[#allocation9 + $0x380] sm:$0xff] }
  0x84   :  { %v885_v41 = vld [vmem:[#allocation9 + $0x40] sm:$0xff] }
  0x85   :  { %365 = vmatmul.f32.gmra.mxu0 %v4598_v12  ;;  %424 = vmatmul.f32.gmra.mxu1 %v4598_v12 }
  0x86   :  { %483 = vmatmul.f32.gmra.mxu2 %v4589_v9  ;;  %542 = vmatmul.f32.gmra.mxu3 %v4589_v9 }
  0x87   :  { %632 = vmatpush.msrb.mxu0 %v585_v42  ;;  %691 = vmatpush.msrb.mxu1 %v586_v43  ;;  %v917_v42 = vld [vmem:[#allocation9 + $0x140] sm:$0xff] }
  0x89   :  { %1220 = vmatpush.msra.mxu0 %v907_v5 }
  0x8d   :  { %368 = vmatmul.f32.gmra.mxu0 %v4607_v15  ;;  %427 = vmatmul.f32.gmra.mxu1 %v4607_v15 }
  0x8e   :  { %486 = vmatmul.f32.gmra.mxu2 %v4598_v12  ;;  %545 = vmatmul.f32.gmra.mxu3 %v4598_v12 }
  0x95   :  { %371 = vmatmul.f32.gmra.mxu0 %v4616_v18  ;;  %430 = vmatmul.f32.gmra.mxu1 %v4616_v18 }
  0x96   :  { %489 = vmatmul.f32.gmra.mxu2 %v4607_v15  ;;  %548 = vmatmul.f32.gmra.mxu3 %v4607_v15 }
  0x9d   :  { %374 = vmatmul.f32.gmra.mxu0 %v4625_v25  ;;  %433 = vmatmul.f32.gmra.mxu1 %v4625_v25 }
  0x9e   :  { %492 = vmatmul.f32.gmra.mxu2 %v4616_v18  ;;  %551 = vmatmul.f32.gmra.mxu3 %v4616_v18 }
  0xa5   :  { %377 = vmatmul.f32.gmra.mxu0 %v4634_v32  ;;  %436 = vmatmul.f32.gmra.mxu1 %v4634_v32 }
  0xa6   :  { %495 = vmatmul.f32.gmra.mxu2 %v4625_v25  ;;  %554 = vmatmul.f32.gmra.mxu3 %v4625_v25 }
  0xad   :  { %380 = vmatmul.f32.gmra.mxu0 %v4643_v39  ;;  %439 = vmatmul.f32.gmra.mxu1 %v4643_v39 }
  0xae   :  { %498 = vmatmul.f32.gmra.mxu2 %v4634_v32  ;;  %557 = vmatmul.f32.gmra.mxu3 %v4634_v32 }
  0xb5   :  { %383 = vmatmul.f32.gmra.mxu0 %v4652_v44  ;;  %442 = vmatmul.f32.gmra.mxu1 %v4652_v44 }
  0xb6   :  { %501 = vmatmul.f32.gmra.mxu2 %v4643_v39  ;;  %560 = vmatmul.f32.gmra.mxu3 %v4643_v39 }
  0xbd   :  { %386 = vmatmul.f32.gmra.mxu0 %v4661_v45  ;;  %445 = vmatmul.f32.gmra.mxu1 %v4661_v45 }
  0xbe   :  { %504 = vmatmul.f32.gmra.mxu2 %v4652_v44  ;;  %563 = vmatmul.f32.gmra.mxu3 %v4652_v44 }
  0xc5   :  { %389 = vmatmul.f32.gmra.mxu0 %v4670_v46  ;;  %448 = vmatmul.f32.gmra.mxu1 %v4670_v46 }
  0xc6   :  { %507 = vmatmul.f32.gmra.mxu2 %v4661_v45  ;;  %566 = vmatmul.f32.gmra.mxu3 %v4661_v45 }
  0xcd   :  { %633 = vmatmul.f32.vlgmr.msrb.gmra.mxu0 %v4564_v2  ;;  %692 = vmatmul.f32.vlgmr.msrb.gmra.mxu1 %v4564_v2  ;;  %v1002_v2 = vld [vmem:[#allocation9 + $0x3d0] sm:$0xff] }
  0xce   :  { %1063 = vmatpush.msrb.mxu3 %v1002_v2  ;;  %v881_v2 = vld [vmem:[#allocation9 + $0x20] sm:$0xff] }
  0xd0   :  { %1064 = vmatpush.msrb.mxu3 %v1000_v8  ;;  %v954_v8 = vld [vmem:[#allocation9 + $0x250] sm:$0xff] }
  0xd5   :  { %636 = vmatmul.f32.gmra.mxu0 %v4571_v3  ;;  %695 = vmatmul.f32.gmra.mxu1 %v4571_v3 }
  0xda   :  { %v4680_v47 = vpop.f32.mrf.mxu0  ;;  %v4682_v48 = vpop.f32.mrf.mxu1 }
  0xdd   :  { %639 = vmatmul.f32.gmra.mxu0 %v4580_v6  ;;  %698 = vmatmul.f32.gmra.mxu1 %v4580_v6  ;;  %v939_v6 = vld [vmem:[#allocation9 + $0x1f0] sm:$0xff] }
  0xde   :  { %1273 = vmatpush.msra.mxu1 %v939_v6 }
  0xe0   :  { %1274 = vmatpush.msra.mxu1 %v937_v10  ;;  %v879_v10 = vld [vmem:[#allocation9 + $0x10] sm:$0xff] }
  0xe1   :  { %v469_v5 = vpop.f32.mrf.mxu2  ;;  %v528_v6 = vpop.f32.mrf.mxu3 }
  0xe2   :  { %v4686_v49 = vpop.f32.mrf.mxu0  ;;  %v4688_v50 = vpop.f32.mrf.mxu1 }
  0xe5   :  { %642 = vmatmul.f32.gmra.mxu0 %v4589_v9  ;;  %701 = vmatmul.f32.gmra.mxu1 %v4589_v9  ;;  %v905_v9 = vld [vmem:[#allocation9 + $0xe0] sm:$0xff] }
  0xe6   :  { %1221 = vmatpush.msra.mxu0 %v905_v9  ;;  %v986_v9 = vld [vmem:[#allocation9 + $0x350] sm:$0xff] }
  0xe8   :  { %1222 = vmatpush.msra.mxu0 %v903_v11  ;;  %v911_v11 = vld [vmem:[#allocation9 + $0x110] sm:$0xff] }
  0xe9   :  { %v531_v29 = vpop.f32.mrf.mxu3 }
  0xea   :  { %v4692_v51 = vpop.f32.mrf.mxu0  ;;  %v4694_v52 = vpop.f32.mrf.mxu1  ;;  %1223 = vmatpush.msra.mxu0 %v901_v13  ;;  %v984_v13 = vld [vmem:[#allocation9 + $0x340] sm:$0xff] }
  0xec   :  { %1224 = vmatpush.msra.mxu0 %v899_v19  ;;  %v583_v19 = vld [vmem:[%s5775_s0 + $0x78] sm:$0xff] }
  0xed   :  { %645 = vmatmul.f32.gmra.mxu0 %v4598_v12  ;;  %704 = vmatmul.f32.gmra.mxu1 %v4598_v12  ;;  %v935_v12 = vld [vmem:[#allocation9 + $0x1d0] sm:$0xff] }
  0xee   :  { %1275 = vmatpush.msra.mxu1 %v935_v12  ;;  %1225 = vmatpush.msra.mxu0 %v897_v21  ;;  %v952_v12 = vld [vmem:[#allocation9 + $0x240] sm:$0xff]  ;;  %v982_v21 = vld [vmem:[#allocation9 + $0x330] sm:$0xff] }
  0xf0   :  { %1276 = vmatpush.msra.mxu1 %v933_v14  ;;  %1226 = vmatpush.msra.mxu0 %v895_v23  ;;  %v877_v14 = vld [vmem:[#allocation9] sm:$0xff] }
  0xf1   :  { %v980_v23 = vld [vmem:[#allocation9 + $0x320] sm:$0xff]  ;;  %v534_v35 = vpop.f32.mrf.mxu3 }
  0xf2   :  { %v4698_v53 = vpop.f32.mrf.mxu0  ;;  %v4700_v54 = vpop.f32.mrf.mxu1  ;;  %1277 = vmatpush.msra.mxu1 %v931_v20  ;;  %v950_v20 = vld [vmem:[#allocation9 + $0x230] sm:$0xff] }
  0xf4   :  { %1278 = vmatpush.msra.mxu1 %v929_v22  ;;  %v948_v22 = vld [vmem:[#allocation9 + $0x220] sm:$0xff] }
  0xf5   :  { %648 = vmatmul.f32.gmra.mxu0 %v4607_v15  ;;  %707 = vmatmul.f32.gmra.mxu1 %v4607_v15 }
  0xf6   :  { %1279 = vmatpush.msra.mxu1 %v927_v24  ;;  %v946_v24 = vld [vmem:[#allocation9 + $0x210] sm:$0xff] }
  0xf8   :  { %1280 = vmatpush.msra.mxu1 %v925_v26  ;;  %v472_v26 = vpop.f32.mrf.mxu2 }
  0xfa   :  { %v4704_v55 = vpop.f32.mrf.mxu0  ;;  %v4706_v56 = vpop.f32.mrf.mxu1 }
  0xfd   :  { %651 = vmatmul.f32.gmra.mxu0 %v4616_v18  ;;  %710 = vmatmul.f32.gmra.mxu1 %v4616_v18  ;;  %v998_v18 = vld [vmem:[#allocation9 + $0x3b0] sm:$0xff] }
  0xfe   :  { %1065 = vmatpush.msrb.mxu3 %v998_v18 }
 0x100   :  { %1066 = vmatpush.msrb.mxu3 %v996_v30  ;;  %v944_v30 = vld [vmem:[#allocation9 + $0x200] sm:$0xff] }
 0x102   :  { %v4710_v59 = vpop.f32.mrf.mxu0  ;;  %v4712_v60 = vpop.f32.mrf.mxu1  ;;  %1067 = vmatpush.msrb.mxu3 %v994_v36 }
 0x104   :  { %1068 = vmatpush.msrb.mxu3 %v992_v40  ;;  %v529_v40 = vadd.f32 %v528_v6, %v4682_v48  ;;  %v532_v6 = vadd.f32 %v531_v29, %v4688_v50 }
 0x105   :  { %654 = vmatmul.f32.gmra.mxu0 %v4625_v25  ;;  %713 = vmatmul.f32.gmra.mxu1 %v4625_v25  ;;  %v893_v25 = vld [vmem:[#allocation9 + $0x80] sm:$0xff] }
 0x106   :  { %1227 = vmatpush.msra.mxu0 %v893_v25  ;;  %1069 = vmatpush.msrb.mxu3 %v990_v57  ;;  %v978_v25 = vld [vmem:[#allocation9 + $0x310] sm:$0xff] }
 0x108   :  { %1228 = vmatpush.msra.mxu0 %v891_v31  ;;  %1070 = vmatpush.msrb.mxu3 %v988_v1  ;;  %v976_v31 = vld [vmem:[#allocation9 + $0x300] sm:$0xff] }
 0x10a   :  { %v4716_v63 = vpop.f32.mrf.mxu0  ;;  %v4718_v0 = vpop.f32.mrf.mxu1  ;;  %1229 = vmatpush.msra.mxu0 %v889_v33  ;;  %1071 = vmatpush.msrb.mxu3 %v986_v9 }
 0x10c   :  { %1230 = vmatpush.msra.mxu0 %v887_v37  ;;  %1072 = vmatpush.msrb.mxu3 %v984_v13 }
 0x10d   :  { %657 = vmatmul.f32.gmra.mxu0 %v4634_v32  ;;  %716 = vmatmul.f32.gmra.mxu1 %v4634_v32  ;;  %v923_v32 = vld [vmem:[#allocation9 + $0x170] sm:$0xff] }
 0x10e   :  { %1281 = vmatpush.msra.mxu1 %v923_v32  ;;  %1231 = vmatpush.msra.mxu0 %v885_v41 }
 0x10f   :  { %1073 = vmatpush.msrb.mxu3 %v982_v21 }
 0x110   :  { %1282 = vmatpush.msra.mxu1 %v921_v34  ;;  %1232 = vmatpush.msra.mxu0 %v883_v58  ;;  %v475_v34 = vpop.f32.mrf.mxu2 }
 0x111   :  { %1074 = vmatpush.msrb.mxu3 %v980_v23  ;;  %v476_v50 = vadd.f32 %v475_v34, %v4692_v51 }
 0x112   :  { %v4722_v3 = vpop.f32.mrf.mxu0  ;;  %v4724_v4 = vpop.f32.mrf.mxu1  ;;  %1283 = vmatpush.msra.mxu1 %v919_v38  ;;  %1233 = vmatpush.msra.mxu0 %v881_v2  ;;  %v763_v38 = vld [vmem:[#allocation7] sm:$0x3] }
 0x113   :  { %1075 = vmatpush.msrb.mxu3 %v978_v25  ;;  %v4763_v41 = vperm.slane %v763_v38, 0 }
 0x114   :  { %1284 = vmatpush.msra.mxu1 %v917_v42  ;;  %1234 = vmatpush.msra.mxu0 %v879_v10  ;;  %v4765_v42 = vperm.slane %v763_v38, 1 }
 0x115   :  { %660 = vmatmul.f32.gmra.mxu0 %v4643_v39  ;;  %719 = vmatmul.f32.gmra.mxu1 %v4643_v39  ;;  %v960_v39 = vld [vmem:[#allocation9 + $0x280] sm:$0xff] }
 0x116   :  { %1015 = vmatpush.msrb.mxu2 %v960_v39  ;;  %1285 = vmatpush.msra.mxu1 %v915_v61  ;;  %v470_v39 = vadd.f32 %v469_v5, %v4680_v47  ;;  %v537_v61 = vpop.f32.mrf.mxu3  ;;  %v473_v5 = vadd.f32 %v472_v26, %v4686_v49 }
 0x117   :  { %1235 = vmatpush.msra.mxu0 %v877_v14  ;;  %1076 = vmatpush.msrb.mxu3 %v976_v31  ;;  %v538_v34 = vadd.f32 %v537_v61, %v4700_v54 }
 0x118   :  { %1286 = vmatpush.msra.mxu1 %v913_v7  ;;  %v478_v58 = vpop.f32.mrf.mxu2 }
 0x119   :  { %v479_v31 = vadd.f32 %v478_v58, %v4698_v53 }
 0x11a   :  { %v4728_v15 = vpop.f32.mrf.mxu0  ;;  %v4730_v16 = vpop.f32.mrf.mxu1  ;;  %1287 = vmatpush.msra.mxu1 %v911_v11 }
 0x11c   :  { %1288 = vmatpush.msra.mxu1 %v909_v17 }
 0x11d   :  { %663 = vmatmul.f32.gmra.mxu0 %v4652_v44  ;;  %722 = vmatmul.f32.gmra.mxu1 %v4652_v44 }
 0x11e   :  { %v540_v13 = vpop.f32.mrf.mxu3 }
 0x11f   :  { %v541_v58 = vadd.f32 %v540_v13, %v4706_v56  ;;  %v1007_v13 = vld [vmem:[#allocation9 + $0x3f8] sm:$0xff] }
 0x120   :  { %1167 = vmatpush.msra.mxu3 %v1007_v13  ;;  %v1509_v13 = vld [vmem:[#allocation9 + $0x5a0] sm:$0xff] }
 0x122   :  { %v4734_v27 = vpop.f32.mrf.mxu0  ;;  %v4736_v28 = vpop.f32.mrf.mxu1 }
 0x125   :  { %666 = vmatmul.f32.gmra.mxu0 %v4661_v45  ;;  %725 = vmatmul.f32.gmra.mxu1 %v4661_v45  ;;  %v958_v45 = vld [vmem:[#allocation9 + $0x270] sm:$0xff] }
 0x126   :  { %1016 = vmatpush.msrb.mxu2 %v958_v45  ;;  %v543_v51 = vpop.f32.mrf.mxu3 }
 0x128   :  { %1017 = vmatpush.msrb.mxu2 %v956_v62 }
 0x12a   :  { %v4740_v43 = vpop.f32.mrf.mxu0  ;;  %v4742_v44 = vpop.f32.mrf.mxu1  ;;  %1018 = vmatpush.msrb.mxu2 %v954_v8 }
 0x12c   :  { %1019 = vmatpush.msrb.mxu2 %v952_v12  ;;  %v481_v12 = vpop.f32.mrf.mxu2 }
 0x12d   :  { %669 = vmatmul.f32.gmra.mxu0 %v4670_v46  ;;  %728 = vmatmul.f32.gmra.mxu1 %v4670_v46  ;;  %v482_v54 = vadd.f32 %v481_v12, %v4704_v55  ;;  %v975_v12 = vld [vmem:[#allocation9 + $0x2f8] sm:$0xff] }
 0x12e   :  { %1020 = vmatpush.msrb.mxu2 %v950_v20  ;;  %v535_v20 = vadd.f32 %v534_v35, %v4694_v52 }
 0x130   :  { %1021 = vmatpush.msrb.mxu2 %v948_v22 }
 0x132   :  { %v4746_v18 = vpop.f32.mrf.mxu0  ;;  %v4748_v46 = vpop.f32.mrf.mxu1  ;;  %1022 = vmatpush.msrb.mxu2 %v946_v24 }
 0x134   :  { %1023 = vmatpush.msrb.mxu2 %v944_v30  ;;  %v484_v29 = vpop.f32.mrf.mxu2 }
 0x135   :  { %672 = vmatmul.f32.gmra.mxu0 %v583_v19  ;;  %731 = vmatmul.f32.gmra.mxu1 %v583_v19 }
 0x136   :  { %1114 = vmatpush.msra.mxu2 %v975_v12 }
 0x13a   :  { %v4753_v32 = vpop.f32.mrf.mxu0  ;;  %v4755_v33 = vpop.f32.mrf.mxu1 }
 0x13c   :  { %v487_v61 = vpop.f32.mrf.mxu2 }
 0x142   :  { %v4757_v36 = vpop.f32.mrf.mxu0  ;;  %v4759_v37 = vpop.f32.mrf.mxu1 }
 0x14a   :  { %v634_v45 = vpop.f32.mrf.mxu0  ;;  %v693_v57 = vpop.f32.mrf.mxu1 }
 0x14b   :  { %v735_v62 = vadd.f32 %v634_v45, %v470_v39  ;;  %v736_v1 = vadd.f32 %v693_v57, %v529_v40 }
 0x14d   :  { %v4768_v2 = vadd.f32 %v4763_v41, %v735_v62  ;;  %v4771_v7 = vadd.f32 %v4765_v42, %v736_v1  ;;  %v546_v1 = vpop.f32.mrf.mxu3 }
 0x14f   :  { %v797_v47 = vmax.f32 %v4768_v2, 0.0  ;;  %v5791_v48 = vmax.f32 %v4771_v7, 0.0 }
 0x151   :  { %1236 = vmatmul.f32.vlgmr.msra.gmra.mxu0 %v797_v47  ;;  %1289 = vmatmul.f32.vlgmr.msra.gmra.mxu1 %v5791_v48 }
 0x152   :  { %v637_v8 = vpop.f32.mrf.mxu0  ;;  %v696_v9 = vpop.f32.mrf.mxu1 }
 0x153   :  { %v737_v10 = vadd.f32 %v637_v8, %v473_v5  ;;  %v738_v11 = vadd.f32 %v696_v9, %v532_v6 }
 0x155   :  { %v771_v14 = vadd.f32 %v4763_v41, %v737_v10  ;;  %v772_v17 = vadd.f32 %v4765_v42, %v738_v11 }
 0x157   :  { %v4783_v19 = vmax.f32 %v771_v14, 0.0  ;;  %v4785_v49 = vmax.f32 %v772_v17, 0.0  ;;  %v485_v14 = vadd.f32 %v484_v29, %v4710_v59  ;;  %v544_v17 = vadd.f32 %v543_v51, %v4712_v60  ;;  %v1485_v59 = vld [vmem:[#allocation9 + $0x4e0] sm:$0xff] }
 0x158   :  { %v1517_v60 = vld [vmem:[#allocation9 + $0x5e0] sm:$0xff] }
 0x159   :  { %1024 = vmatmul.f32.vlgmr.msrb.gmra.mxu2 %v4783_v19  ;;  %1077 = vmatmul.f32.vlgmr.msrb.gmra.mxu3 %v4785_v49 }
 0x15a   :  { %1239 = vmatmul.f32.gmra.mxu0 %v4783_v19  ;;  %1292 = vmatmul.f32.gmra.mxu1 %v4785_v49  ;;  %v640_v21 = vpop.f32.mrf.mxu0  ;;  %v699_v22 = vpop.f32.mrf.mxu1 }
 0x15b   :  { %v739_v23 = vadd.f32 %v640_v21, %v476_v50  ;;  %v740_v24 = vadd.f32 %v699_v22, %v535_v20  ;;  %v1487_v21 = vld [vmem:[#allocation9 + $0x4f0] sm:$0xff] }
 0x15c   :  { %v1519_v22 = vld [vmem:[#allocation9 + $0x5f0] sm:$0xff]  ;;  %1521 = vmatpush.msrb.mxu0 %v1487_v21 }
 0x15d   :  { %v773_v25 = vadd.f32 %v4763_v41, %v739_v23  ;;  %v774_v26 = vadd.f32 %v4765_v42, %v740_v24  ;;  %v490_v23 = vpop.f32.mrf.mxu2  ;;  %v549_v24 = vpop.f32.mrf.mxu3  ;;  %1574 = vmatpush.msrb.mxu1 %v1519_v22  ;;  %v1475_v21 = vld [vmem:[#allocation9 + $0x490] sm:$0xff] }
 0x15e   :  { %1522 = vmatpush.msrb.mxu0 %v1485_v59  ;;  %v1507_v22 = vld [vmem:[#allocation9 + $0x590] sm:$0xff]  ;;  %v969_v59 = vld [vmem:[#allocation9 + $0x2c8] sm:$0xff] }
 0x15f   :  { %v4795_v30 = vmax.f32 %v773_v25, 0.0  ;;  %v4797_v52 = vmax.f32 %v774_v26, 0.0  ;;  %1575 = vmatpush.msrb.mxu1 %v1517_v60  ;;  %v1001_v60 = vld [vmem:[#allocation9 + $0x3c8] sm:$0xff] }
 0x161   :  { %1027 = vmatmul.f32.gmra.mxu2 %v4795_v30  ;;  %1080 = vmatmul.f32.gmra.mxu3 %v4797_v52 }
 0x162   :  { %1242 = vmatmul.f32.gmra.mxu0 %v4795_v30  ;;  %1295 = vmatmul.f32.gmra.mxu1 %v4797_v52  ;;  %v643_v35 = vpop.f32.mrf.mxu0  ;;  %v702_v38 = vpop.f32.mrf.mxu1 }
 0x163   :  { %v741_v39 = vadd.f32 %v643_v35, %v479_v31  ;;  %v742_v40 = vadd.f32 %v702_v38, %v538_v34  ;;  %v1483_v31 = vld [vmem:[#allocation9 + $0x4d0] sm:$0xff] }
 0x164   :  { %v1515_v34 = vld [vmem:[#allocation9 + $0x5d0] sm:$0xff]  ;;  %1523 = vmatpush.msrb.mxu0 %v1483_v31  ;;  %v1473_v31 = vld [vmem:[#allocation9 + $0x480] sm:$0xff] }
 0x165   :  { %v775_v45 = vadd.f32 %v4763_v41, %v741_v39  ;;  %v776_v57 = vadd.f32 %v4765_v42, %v742_v40  ;;  %v973_v39 = vld [vmem:[#allocation9 + $0x2e8] sm:$0xff]  ;;  %1576 = vmatpush.msrb.mxu1 %v1515_v34  ;;  %v493_v12 = vpop.f32.mrf.mxu2  ;;  %v1505_v34 = vld [vmem:[#allocation9 + $0x580] sm:$0xff] }
 0x166   :  { %v1005_v40 = vld [vmem:[#allocation9 + $0x3e8] sm:$0xff]  ;;  %1115 = vmatpush.msra.mxu2 %v973_v39 }
 0x167   :  { %v4807_v62 = vmax.f32 %v775_v45, 0.0  ;;  %v4809_v53 = vmax.f32 %v776_v57, 0.0  ;;  %1168 = vmatpush.msra.mxu3 %v1005_v40  ;;  %v1481_v45 = vld [vmem:[#allocation9 + $0x4c0] sm:$0xff] }
 0x168   :  { %v1513_v57 = vld [vmem:[#allocation9 + $0x5c0] sm:$0xff]  ;;  %1524 = vmatpush.msrb.mxu0 %v1481_v45 }
 0x169   :  { %1030 = vmatmul.f32.gmra.mxu2 %v4807_v62  ;;  %1083 = vmatmul.f32.gmra.mxu3 %v4809_v53 }
 0x16a   :  { %1245 = vmatmul.f32.gmra.mxu0 %v4807_v62  ;;  %1298 = vmatmul.f32.gmra.mxu1 %v4809_v53  ;;  %v646_v5 = vpop.f32.mrf.mxu0  ;;  %v705_v6 = vpop.f32.mrf.mxu1 }
 0x16b   :  { %v743_v8 = vadd.f32 %v646_v5, %v482_v54  ;;  %v744_v9 = vadd.f32 %v705_v6, %v541_v58  ;;  %v488_v54 = vadd.f32 %v487_v61, %v4716_v63  ;;  %v547_v58 = vadd.f32 %v546_v1, %v4718_v0  ;;  %1577 = vmatpush.msrb.mxu1 %v1513_v57  ;;  %v552_v63 = vpop.f32.mrf.mxu3  ;;  %v1477_v1 = vld [vmem:[#allocation9 + $0x4a0] sm:$0xff] }
 0x16d   :  { %v777_v10 = vadd.f32 %v4763_v41, %v743_v8  ;;  %v778_v55 = vadd.f32 %v4765_v42, %v744_v9  ;;  %v1479_v8 = vld [vmem:[#allocation9 + $0x4b0] sm:$0xff] }
 0x16e   :  { %v1511_v9 = vld [vmem:[#allocation9 + $0x5b0] sm:$0xff]  ;;  %1525 = vmatpush.msrb.mxu0 %v1479_v8 }
 0x16f   :  { %v4819_v11 = vmax.f32 %v777_v10, 0.0  ;;  %v4821_v56 = vmax.f32 %v778_v55, 0.0  ;;  %1578 = vmatpush.msrb.mxu1 %v1511_v9 }
 0x170   :  { %1526 = vmatpush.msrb.mxu0 %v1477_v1  ;;  %v963_v1 = vld [vmem:[#allocation9 + $0x298] sm:$0xff] }
 0x171   :  { %1033 = vmatmul.f32.gmra.mxu2 %v4819_v11  ;;  %1086 = vmatmul.f32.gmra.mxu3 %v4821_v56 }
 0x172   :  { %1248 = vmatmul.f32.gmra.mxu0 %v4819_v11  ;;  %1301 = vmatmul.f32.gmra.mxu1 %v4821_v56  ;;  %v649_v50 = vpop.f32.mrf.mxu0  ;;  %v708_v20 = vpop.f32.mrf.mxu1 }
 0x173   :  { %v745_v25 = vadd.f32 %v649_v50, %v485_v14  ;;  %v746_v26 = vadd.f32 %v708_v20, %v544_v17  ;;  %v971_v14 = vld [vmem:[#allocation9 + $0x2d8] sm:$0xff]  ;;  %1579 = vmatpush.msrb.mxu1 %v1509_v13  ;;  %1527 = vmatpush.msrb.mxu0 %v1475_v21  ;;  %v1467_v21 = vld [vmem:[#allocation9 + $0x450] sm:$0xff] }
 0x174   :  { %v1003_v17 = vld [vmem:[#allocation9 + $0x3d8] sm:$0xff]  ;;  %1116 = vmatpush.msra.mxu2 %v971_v14 }
 0x175   :  { %v779_v29 = vadd.f32 %v4763_v41, %v745_v25  ;;  %v780_v51 = vadd.f32 %v4765_v42, %v746_v26  ;;  %1169 = vmatpush.msra.mxu3 %v1003_v17  ;;  %v491_v25 = vadd.f32 %v490_v23, %v4722_v3  ;;  %v550_v26 = vadd.f32 %v549_v24, %v4724_v4  ;;  %v967_v3 = vld [vmem:[#allocation9 + $0x2b8] sm:$0xff]  ;;  %v1471_v23 = vld [vmem:[#allocation9 + $0x470] sm:$0xff] }
 0x176   :  { %1580 = vmatpush.msrb.mxu1 %v1507_v22  ;;  %v999_v4 = vld [vmem:[#allocation9 + $0x3b8] sm:$0xff]  ;;  %1117 = vmatpush.msra.mxu2 %v969_v59  ;;  %v1503_v24 = vld [vmem:[#allocation9 + $0x570] sm:$0xff] }
 0x177   :  { %v4831_v35 = vmax.f32 %v779_v29, 0.0  ;;  %v4833_v38 = vmax.f32 %v780_v51, 0.0  ;;  %1170 = vmatpush.msra.mxu3 %v1001_v60  ;;  %1528 = vmatpush.msrb.mxu0 %v1473_v31  ;;  %v995_v13 = vld [vmem:[#allocation9 + $0x398] sm:$0xff]  ;;  %v1499_v22 = vld [vmem:[#allocation9 + $0x550] sm:$0xff] }
 0x178   :  { %1581 = vmatpush.msrb.mxu1 %v1505_v34  ;;  %1118 = vmatpush.msra.mxu2 %v967_v3 }
 0x179   :  { %1036 = vmatmul.f32.gmra.mxu2 %v4831_v35  ;;  %1089 = vmatmul.f32.gmra.mxu3 %v4833_v38 }
 0x17a   :  { %1251 = vmatmul.f32.gmra.mxu0 %v4831_v35  ;;  %1304 = vmatmul.f32.gmra.mxu1 %v4833_v38  ;;  %v652_v5 = vpop.f32.mrf.mxu0  ;;  %v711_v6 = vpop.f32.mrf.mxu1 }
 0x17b   :  { %v747_v10 = vadd.f32 %v652_v5, %v488_v54  ;;  %v748_v55 = vadd.f32 %v711_v6, %v547_v58  ;;  %v965_v54 = vld [vmem:[#allocation9 + $0x2a8] sm:$0xff]  ;;  %1171 = vmatpush.msra.mxu3 %v999_v4  ;;  %v496_v5 = vpop.f32.mrf.mxu2  ;;  %v555_v6 = vpop.f32.mrf.mxu3  ;;  %1529 = vmatpush.msrb.mxu0 %v1471_v23 }
 0x17c   :  { %v997_v58 = vld [vmem:[#allocation9 + $0x3a8] sm:$0xff]  ;;  %1582 = vmatpush.msrb.mxu1 %v1503_v24  ;;  %1119 = vmatpush.msra.mxu2 %v965_v54  ;;  %v497_v3 = vadd.f32 %v496_v5, %v4734_v27  ;;  %v556_v4 = vadd.f32 %v555_v6, %v4736_v28  ;;  %v955_v28 = vld [vmem:[#allocation9 + $0x258] sm:$0xff]  ;;  %v1459_v6 = vld [vmem:[#allocation9 + $0x410] sm:$0xff] }
 0x17d   :  { %v781_v0 = vadd.f32 %v4763_v41, %v747_v10  ;;  %v782_v61 = vadd.f32 %v4765_v42, %v748_v55  ;;  %1172 = vmatpush.msra.mxu3 %v997_v58  ;;  %v1469_v10 = vld [vmem:[#allocation9 + $0x460] sm:$0xff]  ;;  %v987_v5 = vld [vmem:[#allocation9 + $0x358] sm:$0xff] }
 0x17e   :  { %v1501_v55 = vld [vmem:[#allocation9 + $0x560] sm:$0xff]  ;;  %1530 = vmatpush.msrb.mxu0 %v1469_v10  ;;  %1120 = vmatpush.msra.mxu2 %v963_v1 }
 0x17f   :  { %v4843_v50 = vmax.f32 %v781_v0, 0.0  ;;  %v4845_v20 = vmax.f32 %v782_v61, 0.0  ;;  %v494_v0 = vadd.f32 %v493_v12, %v4728_v15  ;;  %v553_v61 = vadd.f32 %v552_v63, %v4730_v16  ;;  %1583 = vmatpush.msrb.mxu1 %v1501_v55  ;;  %v961_v15 = vld [vmem:[#allocation9 + $0x288] sm:$0xff]  ;;  %1173 = vmatpush.msra.mxu3 %v995_v13  ;;  %v1465_v12 = vld [vmem:[#allocation9 + $0x440] sm:$0xff] }
 0x180   :  { %v993_v16 = vld [vmem:[#allocation9 + $0x388] sm:$0xff]  ;;  %v1497_v63 = vld [vmem:[#allocation9 + $0x540] sm:$0xff]  ;;  %1531 = vmatpush.msrb.mxu0 %v1467_v21  ;;  %1121 = vmatpush.msra.mxu2 %v961_v15 }
 0x181   :  { %1039 = vmatmul.f32.gmra.mxu2 %v4843_v50  ;;  %1092 = vmatmul.f32.gmra.mxu3 %v4845_v20  ;;  %v1461_v10 = vld [vmem:[#allocation9 + $0x420] sm:$0xff] }
 0x182   :  { %1254 = vmatmul.f32.gmra.mxu0 %v4843_v50  ;;  %1307 = vmatmul.f32.gmra.mxu1 %v4845_v20  ;;  %v655_v29 = vpop.f32.mrf.mxu0  ;;  %v714_v51 = vpop.f32.mrf.mxu1  ;;  %v1493_v55 = vld [vmem:[#allocation9 + $0x520] sm:$0xff] }
 0x183   :  { %v749_v39 = vadd.f32 %v655_v29, %v491_v25  ;;  %v750_v40 = vadd.f32 %v714_v51, %v550_v26  ;;  %1584 = vmatpush.msrb.mxu1 %v1499_v22  ;;  %v959_v29 = vld [vmem:[#allocation9 + $0x278] sm:$0xff]  ;;  %1174 = vmatpush.msra.mxu3 %v993_v16  ;;  %v499_v23 = vpop.f32.mrf.mxu2  ;;  %v558_v24 = vpop.f32.mrf.mxu3 }
 0x184   :  { %v991_v51 = vld [vmem:[#allocation9 + $0x378] sm:$0xff]  ;;  %1532 = vmatpush.msrb.mxu0 %v1465_v12  ;;  %1122 = vmatpush.msra.mxu2 %v959_v29  ;;  %v500_v15 = vadd.f32 %v499_v23, %v4740_v43  ;;  %v559_v16 = vadd.f32 %v558_v24, %v4742_v44  ;;  %v981_v43 = vld [vmem:[#allocation9 + $0x328] sm:$0xff] }
 0x185   :  { %v783_v45 = vadd.f32 %v4763_v41, %v749_v39  ;;  %v784_v57 = vadd.f32 %v4765_v42, %v750_v40  ;;  %1585 = vmatpush.msrb.mxu1 %v1497_v63  ;;  %1175 = vmatpush.msra.mxu3 %v991_v51  ;;  %v1463_v39 = vld [vmem:[#allocation9 + $0x430] sm:$0xff]  ;;  %v951_v12 = vld [vmem:[#allocation9 + $0x238] sm:$0xff] }
 0x186   :  { %v1495_v40 = vld [vmem:[#allocation9 + $0x530] sm:$0xff]  ;;  %1533 = vmatpush.msrb.mxu0 %v1463_v39  ;;  %v983_v63 = vld [vmem:[#allocation9 + $0x338] sm:$0xff]  ;;  %v949_v39 = vld [vmem:[#allocation9 + $0x228] sm:$0xff] }
 0x187   :  { %v4855_v8 = vmax.f32 %v783_v45, 0.0  ;;  %v4857_v9 = vmax.f32 %v784_v57, 0.0  ;;  %v957_v45 = vld [vmem:[#allocation9 + $0x268] sm:$0xff]  ;;  %1586 = vmatpush.msrb.mxu1 %v1495_v40  ;;  %v947_v23 = vld [vmem:[#allocation9 + $0x218] sm:$0xff] }
 0x188   :  { %v989_v57 = vld [vmem:[#allocation9 + $0x368] sm:$0xff]  ;;  %1123 = vmatpush.msra.mxu2 %v957_v45  ;;  %1534 = vmatpush.msrb.mxu0 %v1461_v10  ;;  %v979_v24 = vld [vmem:[#allocation9 + $0x318] sm:$0xff] }
 0x189   :  { %1042 = vmatmul.f32.gmra.mxu2 %v4855_v8  ;;  %1095 = vmatmul.f32.gmra.mxu3 %v4857_v9 }
 0x18a   :  { %1257 = vmatmul.f32.gmra.mxu0 %v4855_v8  ;;  %1310 = vmatmul.f32.gmra.mxu1 %v4857_v9  ;;  %v658_v14 = vpop.f32.mrf.mxu0  ;;  %v717_v17 = vpop.f32.mrf.mxu1 }
 0x18b   :  { %v751_v25 = vadd.f32 %v658_v14, %v494_v0  ;;  %v752_v26 = vadd.f32 %v717_v17, %v553_v61  ;;  %1176 = vmatpush.msra.mxu3 %v989_v57  ;;  %v1491_v61 = vld [vmem:[#allocation9 + $0x510] sm:$0xff]  ;;  %1587 = vmatpush.msrb.mxu1 %v1493_v55  ;;  %v953_v14 = vld [vmem:[#allocation9 + $0x248] sm:$0xff]  ;;  %v502_v40 = vpop.f32.mrf.mxu2  ;;  %v561_v44 = vpop.f32.mrf.mxu3 }
 0x18c   :  { %v985_v17 = vld [vmem:[#allocation9 + $0x348] sm:$0xff]  ;;  %1124 = vmatpush.msra.mxu2 %v955_v28  ;;  %1535 = vmatpush.msrb.mxu0 %v1459_v6  ;;  %v503_v10 = vadd.f32 %v502_v40, %v4746_v18  ;;  %v562_v55 = vadd.f32 %v561_v44, %v4748_v46 }
 0x18d   :  { %v785_v59 = vadd.f32 %v4763_v41, %v751_v25  ;;  %v786_v60 = vadd.f32 %v4765_v42, %v752_v26  ;;  %1177 = vmatpush.msra.mxu3 %v987_v5  ;;  %1588 = vmatpush.msrb.mxu1 %v1491_v61  ;;  %v1457_v25 = vld [vmem:[#allocation9 + $0x400] sm:$0xff] }
 0x18e   :  { %1125 = vmatpush.msra.mxu2 %v953_v14  ;;  %v1489_v26 = vld [vmem:[#allocation9 + $0x500] sm:$0xff]  ;;  %1536 = vmatpush.msrb.mxu0 %v1457_v25 }
 0x18f   :  { %v4867_v31 = vmax.f32 %v785_v59, 0.0  ;;  %v4869_v34 = vmax.f32 %v786_v60, 0.0  ;;  %1178 = vmatpush.msra.mxu3 %v985_v17  ;;  %1589 = vmatpush.msrb.mxu1 %v1489_v26 }
 0x190   :  { %1126 = vmatpush.msra.mxu2 %v951_v12 }
 0x191   :  { %1045 = vmatmul.f32.gmra.mxu2 %v4867_v31  ;;  %1098 = vmatmul.f32.gmra.mxu3 %v4869_v34 }
 0x192   :  { %1260 = vmatmul.f32.gmra.mxu0 %v4867_v31  ;;  %1313 = vmatmul.f32.gmra.mxu1 %v4869_v34  ;;  %v661_v54 = vpop.f32.mrf.mxu0  ;;  %v720_v58 = vpop.f32.mrf.mxu1 }
 0x193   :  { %v753_v0 = vadd.f32 %v661_v54, %v497_v3  ;;  %v754_v27 = vadd.f32 %v720_v58, %v556_v4  ;;  %1179 = vmatpush.msra.mxu3 %v983_v63  ;;  %1127 = vmatpush.msra.mxu2 %v949_v39  ;;  %v945_v54 = vld [vmem:[#allocation9 + $0x208] sm:$0xff]  ;;  %v505_v61 = vpop.f32.mrf.mxu2  ;;  %v564_v46 = vpop.f32.mrf.mxu3  ;;  %v908_v39 = vld [vmem:[#allocation9 + $0xf8] sm:$0xff] }
 0x194   :  { %v977_v58 = vld [vmem:[#allocation9 + $0x308] sm:$0xff]  ;;  %v506_v14 = vadd.f32 %v505_v61, %v4753_v32  ;;  %v565_v17 = vadd.f32 %v564_v46, %v4755_v33  ;;  %v932_v61 = vld [vmem:[#allocation9 + $0x1b8] sm:$0xff] }
 0x195   :  { %v787_v1 = vadd.f32 %v4763_v41, %v753_v0  ;;  %v788_v13 = vadd.f32 %v4765_v42, %v754_v27  ;;  %1180 = vmatpush.msra.mxu3 %v981_v43  ;;  %1128 = vmatpush.msra.mxu2 %v947_v23  ;;  %v940_v43 = vld [vmem:[#allocation9 + $0x1f8] sm:$0xff]  ;;  %v906_v23 = vld [vmem:[#allocation9 + $0xe8] sm:$0xff] }
 0x197   :  { %v4879_v21 = vmax.f32 %v787_v1, 0.0  ;;  %v4881_v22 = vmax.f32 %v788_v13, 0.0  ;;  %1181 = vmatpush.msra.mxu3 %v979_v24  ;;  %1129 = vmatpush.msra.mxu2 %v945_v54  ;;  %v938_v24 = vld [vmem:[#allocation9 + $0x1e8] sm:$0xff]  ;;  %v904_v54 = vld [vmem:[#allocation9 + $0xd8] sm:$0xff] }
 0x199   :  { %1048 = vmatmul.f32.gmra.mxu2 %v4879_v21  ;;  %1101 = vmatmul.f32.gmra.mxu3 %v4881_v22 }
 0x19a   :  { %1263 = vmatmul.f32.gmra.mxu0 %v4879_v21  ;;  %1316 = vmatmul.f32.gmra.mxu1 %v4881_v22  ;;  %v664_v59 = vpop.f32.mrf.mxu0  ;;  %v723_v60 = vpop.f32.mrf.mxu1 }
 0x19b   :  { %v755_v29 = vadd.f32 %v664_v59, %v500_v15  ;;  %v756_v51 = vadd.f32 %v723_v60, %v559_v16  ;;  %1182 = vmatpush.msra.mxu3 %v977_v58  ;;  %1326 = vmatpush.msrb.mxu2 %v908_v39  ;;  %v4947_v40 = vpop.f32.mrf.mxu2  ;;  %v4949_v44 = vpop.f32.mrf.mxu3  ;;  %v936_v58 = vld [vmem:[#allocation9 + $0x1d8] sm:$0xff]  ;;  %v894_v39 = vld [vmem:[#allocation9 + $0x88] sm:$0xff] }
 0x19d   :  { %v789_v3 = vadd.f32 %v4763_v41, %v755_v29  ;;  %v790_v4 = vadd.f32 %v4765_v42, %v756_v51  ;;  %1379 = vmatpush.msrb.mxu3 %v940_v43  ;;  %1327 = vmatpush.msrb.mxu2 %v906_v23  ;;  %v926_v43 = vld [vmem:[#allocation9 + $0x188] sm:$0xff]  ;;  %v892_v23 = vld [vmem:[#allocation9 + $0x78] sm:$0xff] }
 0x19f   :  { %v4891_v45 = vmax.f32 %v789_v3, 0.0  ;;  %v4893_v57 = vmax.f32 %v790_v4, 0.0  ;;  %1380 = vmatpush.msrb.mxu3 %v938_v24  ;;  %1328 = vmatpush.msrb.mxu2 %v904_v54  ;;  %v924_v24 = vld [vmem:[#allocation9 + $0x178] sm:$0xff] }
 0x1a1   :  { %1051 = vmatmul.f32.gmra.mxu2 %v4891_v45  ;;  %1104 = vmatmul.f32.gmra.mxu3 %v4893_v57 }
 0x1a2   :  { %1266 = vmatmul.f32.gmra.mxu0 %v4891_v45  ;;  %1319 = vmatmul.f32.gmra.mxu1 %v4893_v57  ;;  %v667_v0 = vpop.f32.mrf.mxu0  ;;  %v726_v27 = vpop.f32.mrf.mxu1 }
 0x1a3   :  { %v757_v28 = vadd.f32 %v667_v0, %v503_v10  ;;  %v758_v5 = vadd.f32 %v726_v27, %v562_v55  ;;  %1381 = vmatpush.msrb.mxu3 %v936_v58 }
 0x1a5   :  { %v791_v6 = vadd.f32 %v4763_v41, %v757_v28  ;;  %v792_v18 = vadd.f32 %v4765_v42, %v758_v5  ;;  %v902_v5 = vld [vmem:[#allocation9 + $0xc8] sm:$0xff] }
 0x1a6   :  { %1329 = vmatpush.msrb.mxu2 %v902_v5 }
 0x1a7   :  { %v4903_v1 = vmax.f32 %v791_v6, 0.0  ;;  %v4905_v13 = vmax.f32 %v792_v18, 0.0  ;;  %v934_v6 = vld [vmem:[#allocation9 + $0x1c8] sm:$0xff]  ;;  %v900_v18 = vld [vmem:[#allocation9 + $0xb8] sm:$0xff] }
 0x1a8   :  { %1382 = vmatpush.msrb.mxu3 %v934_v6  ;;  %1330 = vmatpush.msrb.mxu2 %v900_v18 }
 0x1a9   :  { %1054 = vmatmul.f32.gmra.mxu2 %v4903_v1  ;;  %1107 = vmatmul.f32.gmra.mxu3 %v4905_v13 }
 0x1aa   :  { %1269 = vmatmul.f32.gmra.mxu0 %v4903_v1  ;;  %1322 = vmatmul.f32.gmra.mxu1 %v4905_v13  ;;  %v670_v25 = vpop.f32.mrf.mxu0  ;;  %v729_v26 = vpop.f32.mrf.mxu1 }
 0x1ab   :  { %v759_v15 = vadd.f32 %v670_v25, %v506_v14  ;;  %v760_v16 = vadd.f32 %v729_v26, %v565_v17  ;;  %1383 = vmatpush.msrb.mxu3 %v932_v61  ;;  %v898_v17 = vld [vmem:[#allocation9 + $0xa8] sm:$0xff]  ;;  %v888_v61 = vld [vmem:[#allocation9 + $0x58] sm:$0xff] }
 0x1ac   :  { %v930_v25 = vld [vmem:[#allocation9 + $0x1a8] sm:$0xff]  ;;  %1331 = vmatpush.msrb.mxu2 %v898_v17 }
 0x1ad   :  { %v793_v12 = vadd.f32 %v4763_v41, %v759_v15  ;;  %v794_v63 = vadd.f32 %v4765_v42, %v760_v16  ;;  %1384 = vmatpush.msrb.mxu3 %v930_v25  ;;  %v896_v15 = vld [vmem:[#allocation9 + $0x98] sm:$0xff]  ;;  %v918_v17 = vld [vmem:[#allocation9 + $0x148] sm:$0xff] }
 0x1ae   :  { %v928_v16 = vld [vmem:[#allocation9 + $0x198] sm:$0xff]  ;;  %1332 = vmatpush.msrb.mxu2 %v896_v15 }
 0x1af   :  { %v4915_v59 = vmax.f32 %v793_v12, 0.0  ;;  %v4917_v32 = vmax.f32 %v794_v63, 0.0  ;;  %1385 = vmatpush.msrb.mxu3 %v928_v16  ;;  %v884_v16 = vld [vmem:[#allocation9 + $0x38] sm:$0xff] }
 0x1b0   :  { %1333 = vmatpush.msrb.mxu2 %v894_v39  ;;  %v916_v39 = vld [vmem:[#allocation9 + $0x138] sm:$0xff] }
 0x1b1   :  { %5798 = vst [vmem:[#allocation35_spill] sm:$0xff] %v4915_v59  ;;  %1057 = vmatmul.f32.gmra.mxu2 %v4915_v59  ;;  %1110 = vmatmul.f32.gmra.mxu3 %v4917_v32 }
 0x1b2   :  { %5799 = vst [vmem:[#allocation36_spill] sm:$0xff] %v4917_v32  ;;  %1537 = vmatmul.f32.vlgmr.msrb.gmra.mxu0 %v4795_v30  ;;  %1590 = vmatmul.f32.vlgmr.msrb.gmra.mxu1 %v4797_v52  ;;  %v4931_v33 = vpop.f32.mrf.mxu0  ;;  %v4933_v60 = vpop.f32.mrf.mxu1 }
 0x1b3   :  { %1386 = vmatpush.msrb.mxu3 %v926_v43  ;;  %1334 = vmatpush.msrb.mxu2 %v892_v23 }
 0x1b5   :  { %1387 = vmatpush.msrb.mxu3 %v924_v24 }
 0x1b9   :  { %1130 = vmatmul.f32.vlgmr.msra.gmra.mxu2 %v4783_v19  ;;  %1183 = vmatmul.f32.vlgmr.msra.gmra.mxu3 %v4785_v49 }
 0x1ba   :  { %1540 = vmatmul.f32.gmra.mxu0 %v4807_v62  ;;  %1593 = vmatmul.f32.gmra.mxu1 %v4809_v53 }
 0x1c1   :  { %1133 = vmatmul.f32.gmra.mxu2 %v4795_v30  ;;  %1186 = vmatmul.f32.gmra.mxu3 %v4797_v52 }
 0x1c2   :  { %1543 = vmatmul.f32.gmra.mxu0 %v4819_v11  ;;  %1596 = vmatmul.f32.gmra.mxu1 %v4821_v56 }
 0x1c9   :  { %1136 = vmatmul.f32.gmra.mxu2 %v4807_v62  ;;  %1189 = vmatmul.f32.gmra.mxu3 %v4809_v53 }
 0x1ca   :  { %1546 = vmatmul.f32.gmra.mxu0 %v4831_v35  ;;  %1599 = vmatmul.f32.gmra.mxu1 %v4833_v38 }
 0x1ce   :  { %v4939_v29 = vpop.f32.mrf.mxu0  ;;  %v4941_v51 = vpop.f32.mrf.mxu1 }
 0x1cf   :  { %5800 = vst [vmem:[#allocation37_spill] sm:$0xff] %v4939_v29 }
 0x1d0   :  { %5801 = vst [vmem:[#allocation38_spill] sm:$0xff] %v4941_v51 }
 0x1d1   :  { %1139 = vmatmul.f32.gmra.mxu2 %v4819_v11  ;;  %1192 = vmatmul.f32.gmra.mxu3 %v4821_v56 }
 0x1d2   :  { %1549 = vmatmul.f32.gmra.mxu0 %v4843_v50  ;;  %1602 = vmatmul.f32.gmra.mxu1 %v4845_v20 }
 0x1d7   :  { %v4951_v3 = vpop.f32.mrf.mxu0  ;;  %v4953_v4 = vpop.f32.mrf.mxu1 }
 0x1d9   :  { %1142 = vmatmul.f32.gmra.mxu2 %v4831_v35  ;;  %1195 = vmatmul.f32.gmra.mxu3 %v4833_v38 }
 0x1da   :  { %1552 = vmatmul.f32.gmra.mxu0 %v4855_v8  ;;  %1605 = vmatmul.f32.gmra.mxu1 %v4857_v9 }
 0x1dc   :  { %v1025_v10 = vpop.f32.mrf.mxu2  ;;  %v1078_v55 = vpop.f32.mrf.mxu3 }
 0x1dd   :  { %v4959_v0 = vadd.f32 %v1078_v55, %v1025_v10  ;;  %v890_v10 = vld [vmem:[#allocation9 + $0x68] sm:$0xff] }
 0x1de   :  { %v922_v55 = vld [vmem:[#allocation9 + $0x168] sm:$0xff]  ;;  %1335 = vmatpush.msrb.mxu2 %v890_v10  ;;  %v880_v10 = vld [vmem:[#allocation9 + $0x18] sm:$0xff] }
 0x1df   :  { %5802 = vst [vmem:[#allocation39_spill] sm:$0xff] %v4959_v0  ;;  %v4961_v27 = vpop.f32.mrf.mxu0  ;;  %v4963_v28 = vpop.f32.mrf.mxu1  ;;  %1388 = vmatpush.msrb.mxu3 %v922_v55  ;;  %v912_v55 = vld [vmem:[#allocation9 + $0x118] sm:$0xff] }
 0x1e0   :  { %1336 = vmatpush.msrb.mxu2 %v888_v61 }
 0x1e1   :  { %1145 = vmatmul.f32.gmra.mxu2 %v4843_v50  ;;  %1198 = vmatmul.f32.gmra.mxu3 %v4845_v20 }
 0x1e2   :  { %1555 = vmatmul.f32.gmra.mxu0 %v4867_v31  ;;  %1608 = vmatmul.f32.gmra.mxu1 %v4869_v34 }
 0x1e4   :  { %v1028_v46 = vpop.f32.mrf.mxu2  ;;  %v1081_v14 = vpop.f32.mrf.mxu3 }
 0x1e5   :  { %v4969_v26 = vadd.f32 %v1081_v14, %v1028_v46  ;;  %v920_v46 = vld [vmem:[#allocation9 + $0x158] sm:$0xff]  ;;  %v886_v14 = vld [vmem:[#allocation9 + $0x48] sm:$0xff] }
 0x1e6   :  { %1389 = vmatpush.msrb.mxu3 %v920_v46  ;;  %1337 = vmatpush.msrb.mxu2 %v886_v14  ;;  %v878_v14 = vld [vmem:[#allocation9 + $0x8] sm:$0xff] }
 0x1e7   :  { %v4971_v12 = vpop.f32.mrf.mxu0  ;;  %v4973_v63 = vpop.f32.mrf.mxu1 }
 0x1e8   :  { %1390 = vmatpush.msrb.mxu3 %v918_v17  ;;  %1338 = vmatpush.msrb.mxu2 %v884_v16  ;;  %v910_v17 = vld [vmem:[#allocation9 + $0x108] sm:$0xff]  ;;  %v568_v16 = vadd.f32 %v4949_v44, %v4759_v37 }
 0x1e9   :  { %1148 = vmatmul.f32.gmra.mxu2 %v4855_v8  ;;  %1201 = vmatmul.f32.gmra.mxu3 %v4857_v9 }
 0x1ea   :  { %1558 = vmatmul.f32.gmra.mxu0 %v4879_v21  ;;  %1611 = vmatmul.f32.gmra.mxu1 %v4881_v22 }
 0x1eb   :  { %1391 = vmatpush.msrb.mxu3 %v916_v39 }
 0x1ec   :  { %v1031_v54 = vpop.f32.mrf.mxu2  ;;  %v1084_v58 = vpop.f32.mrf.mxu3 }
 0x1ed   :  { %v4979_v5 = vadd.f32 %v1084_v58, %v1031_v54  ;;  %v882_v54 = vld [vmem:[#allocation9 + $0x28] sm:$0xff] }
 0x1ee   :  { %v914_v58 = vld [vmem:[#allocation9 + $0x128] sm:$0xff]  ;;  %1339 = vmatpush.msrb.mxu2 %v882_v54  ;;  %v1952_v54 = vld [vmem:[#allocation12 + $0x2f0] sm:$0xff] }
 0x1ef   :  { %v4981_v6 = vpop.f32.mrf.mxu0  ;;  %v4983_v18 = vpop.f32.mrf.mxu1  ;;  %1392 = vmatpush.msrb.mxu3 %v914_v58  ;;  %1986 = vmatpush.msra.mxu0 %v1952_v54 }
 0x1f0   :  { %1340 = vmatpush.msrb.mxu2 %v880_v10 }
 0x1f1   :  { %1151 = vmatmul.f32.gmra.mxu2 %v4867_v31  ;;  %1204 = vmatmul.f32.gmra.mxu3 %v4869_v34 }
 0x1f2   :  { %1561 = vmatmul.f32.gmra.mxu0 %v4891_v45  ;;  %1614 = vmatmul.f32.gmra.mxu1 %v4893_v57 }
 0x1f3   :  { %1393 = vmatpush.msrb.mxu3 %v912_v55  ;;  %1341 = vmatpush.msrb.mxu2 %v878_v14  ;;  %v1946_v55 = vld [vmem:[#allocation12 + $0x2c0] sm:$0xff] }
 0x1f4   :  { %v1034_v25 = vpop.f32.mrf.mxu2  ;;  %v1087_v15 = vpop.f32.mrf.mxu3 }
 0x1f5   :  { %v4989_v43 = vadd.f32 %v1087_v15, %v1034_v25  ;;  %v509_v15 = vadd.f32 %v4947_v40, %v4757_v36  ;;  %1394 = vmatpush.msrb.mxu3 %v910_v17  ;;  %v1950_v36 = vld [vmem:[#allocation12 + $0x2e0] sm:$0xff] }
 0x1f6   :  { %1987 = vmatpush.msra.mxu0 %v1950_v36 }
 0x1f7   :  { %v4991_v23 = vpop.f32.mrf.mxu0  ;;  %v4993_v24 = vpop.f32.mrf.mxu1  ;;  %v761_v58 = vadd.f32 %v4931_v33, %v509_v15  ;;  %v1944_v15 = vld [vmem:[#allocation12 + $0x2b0] sm:$0xff] }
 0x1f9   :  { %1154 = vmatmul.f32.gmra.mxu2 %v4879_v21  ;;  %1207 = vmatmul.f32.gmra.mxu3 %v4881_v22  ;;  %v5016_v37 = vadd.f32 %v4763_v41, %v761_v58  ;;  %v1940_v58 = vld [vmem:[#allocation12 + $0x290] sm:$0xff] }
 0x1fa   :  { %1564 = vmatmul.f32.gmra.mxu0 %v4903_v1  ;;  %1617 = vmatmul.f32.gmra.mxu1 %v4905_v13 }
 0x1fb   :  { %5803 = vst [vmem:[#allocation40_spill] sm:$0xff] %v5016_v37  ;;  %v5793_v17 = vmax.f32 %v5016_v37, 0.0  ;;  %v1926_v37 = vld [vmem:[#allocation12 + $0x220] sm:$0xff] }
 0x1fc   :  { %v1037_v61 = vpop.f32.mrf.mxu2  ;;  %v1090_v46 = vpop.f32.mrf.mxu3 }
 0x1fd   :  { %v4999_v25 = vadd.f32 %v1090_v46, %v1037_v61  ;;  %v762_v61 = vadd.f32 %v4933_v60, %v568_v16  ;;  %v1948_v60 = vld [vmem:[#allocation12 + $0x2d0] sm:$0xff] }
 0x1fe   :  { %1988 = vmatpush.msra.mxu0 %v1948_v60  ;;  %v1936_v60 = vld [vmem:[#allocation12 + $0x270] sm:$0xff] }
 0x1ff   :  { %v5005_v39 = vpop.f32.mrf.mxu0  ;;  %v5007_v48 = vpop.f32.mrf.mxu1  ;;  %v5019_v40 = vadd.f32 %v4765_v42, %v762_v61  ;;  %v1942_v42 = vld [vmem:[#allocation12 + $0x2a0] sm:$0xff] }
 0x200   :  { %1989 = vmatpush.msra.mxu0 %v1946_v55  ;;  %v1934_v55 = vld [vmem:[#allocation12 + $0x260] sm:$0xff] }
 0x201   :  { %1157 = vmatmul.f32.gmra.mxu2 %v4891_v45  ;;  %1210 = vmatmul.f32.gmra.mxu3 %v4893_v57  ;;  %5804 = vst [vmem:[#allocation41_spill] sm:$0xff] %v5019_v40  ;;  %v5792_v41 = vmax.f32 %v5019_v40, 0.0  ;;  %v5805_v40 = vmax.f32 %v4771_v7, 0.0 }
 0x202   :  { %1567 = vmatmul.f32.gmra.mxu0 %v4915_v59  ;;  %1620 = vmatmul.f32.gmra.mxu1 %v4917_v32 }
 0x203   :  { %1990 = vmatpush.msra.mxu0 %v1944_v15 }
 0x204   :  { %v1040_v33 = vpop.f32.mrf.mxu2  ;;  %v1093_v44 = vpop.f32.mrf.mxu3 }
 0x205   :  { %v5021_v10 = vadd.f32 %v1093_v44, %v1040_v33  ;;  %1991 = vmatpush.msra.mxu0 %v1942_v42  ;;  %v1938_v44 = vld [vmem:[#allocation12 + $0x280] sm:$0xff] }
 0x207   :  { %v5023_v46 = vpop.f32.mrf.mxu0  ;;  %v5025_v14 = vpop.f32.mrf.mxu1  ;;  %1992 = vmatpush.msra.mxu0 %v1940_v58  ;;  %v1930_v58 = vld [vmem:[#allocation12 + $0x240] sm:$0xff] }
 0x209   :  { %1160 = vmatmul.f32.gmra.mxu2 %v4903_v1  ;;  %1213 = vmatmul.f32.gmra.mxu3 %v4905_v13 }
 0x20a   :  { %1570 = vmatmul.f32.gmra.mxu0 %v5793_v17  ;;  %1623 = vmatmul.f32.gmra.mxu1 %v5792_v41 }
 0x20b   :  { %1993 = vmatpush.msra.mxu0 %v1938_v44  ;;  %v1928_v44 = vld [vmem:[#allocation12 + $0x230] sm:$0xff] }
 0x20c   :  { %v1043_v16 = vpop.f32.mrf.mxu2  ;;  %v1096_v54 = vpop.f32.mrf.mxu3 }
 0x20d   :  { %v5035_v61 = vadd.f32 %v1096_v54, %v1043_v16  ;;  %1994 = vmatpush.msra.mxu0 %v1936_v60  ;;  %v1932_v16 = vld [vmem:[#allocation12 + $0x250] sm:$0xff] }
 0x20f   :  { %v5037_v36 = vpop.f32.mrf.mxu0  ;;  %v5039_v33 = vpop.f32.mrf.mxu1  ;;  %1995 = vmatpush.msra.mxu0 %v1934_v55  ;;  %v1924_v55 = vld [vmem:[#allocation12 + $0x210] sm:$0xff] }
 0x211   :  { %1163 = vmatmul.f32.gmra.mxu2 %v4915_v59  ;;  %1216 = vmatmul.f32.gmra.mxu3 %v4917_v32 }
 0x212   :  { %1996 = vmatpush.msra.mxu0 %v1932_v16  ;;  %v1922_v16 = vld [vmem:[#allocation12 + $0x200] sm:$0xff] }
 0x214   :  { %v1046_v15 = vpop.f32.mrf.mxu2  ;;  %v1099_v41 = vpop.f32.mrf.mxu3  ;;  %1997 = vmatpush.msra.mxu0 %v1930_v58 }
 0x215   :  { %v5043_v17 = vadd.f32 %v1099_v41, %v1046_v15 }
 0x216   :  { %1998 = vmatpush.msra.mxu0 %v1928_v44 }
 0x217   :  { %v5045_v42 = vpop.f32.mrf.mxu0  ;;  %v5047_v54 = vpop.f32.mrf.mxu1 }
 0x218   :  { %1999 = vmatpush.msra.mxu0 %v1926_v37 }
 0x219   :  { %1342 = vmatmul.f32.vlgmr.msrb.gmra.mxu2 %v797_v47  ;;  %1395 = vmatmul.f32.vlgmr.msrb.gmra.mxu3 %v5805_v40 }
 0x21a   :  { %2000 = vmatpush.msra.mxu0 %v1924_v55 }
 0x21c   :  { %v1049_v60 = vpop.f32.mrf.mxu2  ;;  %v1102_v41 = vpop.f32.mrf.mxu3  ;;  %2001 = vmatpush.msra.mxu0 %v1922_v16 }
 0x21d   :  { %v5053_v15 = vadd.f32 %v1102_v41, %v1049_v60  ;;  %v1241_v41 = vadd.f32 %v4951_v3, %v4969_v26 }
 0x21f   :  { %v5055_v51 = vpop.f32.mrf.mxu0  ;;  %v5057_v32 = vpop.f32.mrf.mxu1  ;;  %v1294_v59 = vadd.f32 %v4953_v4, %v1241_v41  ;;  %v1484_v41 = vld [vmem:[#allocation9 + $0x4d8] sm:$0xff] }
 0x221   :  { %1345 = vmatmul.f32.gmra.mxu2 %v4783_v19  ;;  %1398 = vmatmul.f32.gmra.mxu3 %v4785_v49 }
 0x224   :  { %v1052_v2 = vpop.f32.mrf.mxu2  ;;  %v1105_v7 = vpop.f32.mrf.mxu3 }
 0x225   :  { %v5061_v47 = vadd.f32 %v1105_v7, %v1052_v2  ;;  %v1488_v7 = vld [vmem:[#allocation9 + $0x4f8] sm:$0xff] }
 0x226   :  { %1627 = vmatpush.msra.mxu2 %v1488_v7 }
 0x227   :  { %v5063_v40 = vpop.f32.mrf.mxu0  ;;  %v5065_v58 = vpop.f32.mrf.mxu1 }
 0x228   :  { %5806 = vst [vmem:[#allocation42_spill] sm:$0xff] %v5063_v40  ;;  %v5081_v40 = vld [vmem:[#allocation10] sm:$0x3] }
 0x229   :  { %5807 = vst [vmem:[#allocation43_spill] sm:$0xff] %v5065_v58  ;;  %1348 = vmatmul.f32.gmra.mxu2 %v4795_v30  ;;  %1401 = vmatmul.f32.gmra.mxu3 %v4797_v52  ;;  %v1520_v58 = vld [vmem:[#allocation9 + $0x5f8] sm:$0xff]  ;;  %v5087_v3 = vperm.slane %v5081_v40, 0 }
 0x22a   :  { %1680 = vmatpush.msra.mxu3 %v1520_v58 }
 0x22c   :  { %v1055_v37 = vpop.f32.mrf.mxu2  ;;  %v1108_v44 = vpop.f32.mrf.mxu3 }
 0x22d   :  { %v5069_v60 = vadd.f32 %v1108_v44, %v1055_v37 }
 0x22f   :  { %v5071_v19 = vpop.f32.mrf.mxu0  ;;  %v5073_v49 = vpop.f32.mrf.mxu1 }
 0x230   :  { %5808 = vst [vmem:[#allocation44_spill] sm:$0xff] %v5071_v19  ;;  %v1518_v19 = vld [vmem:[#allocation9 + $0x5e8] sm:$0xff] }
 0x231   :  { %5809 = vst [vmem:[#allocation45_spill] sm:$0xff] %v5073_v49  ;;  %1351 = vmatmul.f32.gmra.mxu2 %v4807_v62  ;;  %1404 = vmatmul.f32.gmra.mxu3 %v4809_v53  ;;  %v1486_v49 = vld [vmem:[#allocation9 + $0x4e8] sm:$0xff] }
 0x232   :  { %1628 = vmatpush.msra.mxu2 %v1486_v49  ;;  %1681 = vmatpush.msra.mxu3 %v1518_v19  ;;  %v1480_v49 = vld [vmem:[#allocation9 + $0x4b8] sm:$0xff] }
 0x234   :  { %v1058_v55 = vpop.f32.mrf.mxu2  ;;  %v1111_v16 = vpop.f32.mrf.mxu3  ;;  %1629 = vmatpush.msra.mxu2 %v1484_v41 }
 0x235   :  { %v5079_v2 = vadd.f32 %v1111_v16, %v1058_v55  ;;  %v1244_v55 = vadd.f32 %v4961_v27, %v4979_v5  ;;  %v1482_v27 = vld [vmem:[#allocation9 + $0x4c8] sm:$0xff] }
 0x236   :  { %v1514_v5 = vld [vmem:[#allocation9 + $0x5c8] sm:$0xff]  ;;  %1630 = vmatpush.msra.mxu2 %v1482_v27  ;;  %v1508_v27 = vld [vmem:[#allocation9 + $0x598] sm:$0xff] }
 0x237   :  { %5810 = vst [vmem:[#allocation46_spill] sm:$0xff] %v5079_v2  ;;  %v1541_v37 = vpop.f32.mrf.mxu0  ;;  %v1594_v44 = vpop.f32.mrf.mxu1 }
 0x238   :  { %v1595_v29 = vadd.f32 %v1594_v44, %v1541_v37  ;;  %v1516_v37 = vld [vmem:[#allocation9 + $0x5d8] sm:$0xff]  ;;  %1631 = vmatpush.msra.mxu2 %v1480_v49 }
 0x239   :  { %1354 = vmatmul.f32.gmra.mxu2 %v4819_v11  ;;  %1407 = vmatmul.f32.gmra.mxu3 %v4821_v56 }
 0x23a   :  { %v1735_v26 = vadd.f32 %v1595_v29, %v1294_v59  ;;  %1682 = vmatpush.msra.mxu3 %v1516_v37  ;;  %v1297_v59 = vadd.f32 %v4963_v28, %v1244_v55  ;;  %v1478_v55 = vld [vmem:[#allocation9 + $0x4a8] sm:$0xff] }
 0x23b   :  { %1632 = vmatpush.msra.mxu2 %v1478_v55  ;;  %v1470_v55 = vld [vmem:[#allocation9 + $0x468] sm:$0xff] }
 0x23c   :  { %v1765_v58 = vadd.f32 %v5087_v3, %v1735_v26  ;;  %v1131_v16 = vpop.f32.mrf.mxu2  ;;  %v1184_v7 = vpop.f32.mrf.mxu3  ;;  %1683 = vmatpush.msra.mxu3 %v1514_v5  ;;  %v1512_v26 = vld [vmem:[#allocation9 + $0x5b8] sm:$0xff]  ;;  %v1474_v5 = vld [vmem:[#allocation9 + $0x488] sm:$0xff] }
 0x23d   :  { %v5092_v2 = vadd.f32 %v1184_v7, %v1131_v16  ;;  %v1510_v7 = vld [vmem:[#allocation9 + $0x5a8] sm:$0xff] }
 0x23e   :  { %v5094_v4 = vmax.f32 %v1765_v58, 0.0  ;;  %v1247_v58 = vadd.f32 %v4971_v12, %v4989_v43  ;;  %1684 = vmatpush.msra.mxu3 %v1512_v26  ;;  %v1472_v26 = vld [vmem:[#allocation9 + $0x478] sm:$0xff] }
 0x23f   :  { %v1544_v44 = vpop.f32.mrf.mxu0  ;;  %v1597_v0 = vpop.f32.mrf.mxu1 }
 0x240   :  { %v1598_v29 = vadd.f32 %v1597_v0, %v1544_v44  ;;  %2002 = vmatmul.f32.vlgmr.msra.gmra.mxu0 %v5094_v4  ;;  %1685 = vmatpush.msra.mxu3 %v1510_v7  ;;  %v1476_v44 = vld [vmem:[#allocation9 + $0x498] sm:$0xff]  ;;  %v1300_v12 = vadd.f32 %v4973_v63, %v1247_v58 }
 0x241   :  { %1357 = vmatmul.f32.gmra.mxu2 %v4831_v35  ;;  %1410 = vmatmul.f32.gmra.mxu3 %v4833_v38 }
 0x242   :  { %v1737_v19 = vadd.f32 %v1598_v29, %v1297_v59  ;;  %1633 = vmatpush.msra.mxu2 %v1476_v44  ;;  %1686 = vmatpush.msra.mxu3 %v1508_v27  ;;  %v1502_v44 = vld [vmem:[#allocation9 + $0x568] sm:$0xff] }
 0x244   :  { %v1767_v16 = vadd.f32 %v5087_v3, %v1737_v19  ;;  %v1134_v28 = vpop.f32.mrf.mxu2  ;;  %v1187_v0 = vpop.f32.mrf.mxu3  ;;  %v1506_v19 = vld [vmem:[#allocation9 + $0x588] sm:$0xff]  ;;  %1634 = vmatpush.msra.mxu2 %v1474_v5  ;;  %v1953_v5 = vld [vmem:[#allocation12 + $0x2f8] sm:$0xff] }
 0x245   :  { %v5103_v41 = vadd.f32 %v1187_v0, %v1134_v28  ;;  %v1250_v28 = vadd.f32 %v4981_v6, %v4999_v25  ;;  %1687 = vmatpush.msra.mxu3 %v1506_v19  ;;  %v1466_v19 = vld [vmem:[#allocation9 + $0x448] sm:$0xff]  ;;  %2080 = vmatpush.msrb.mxu0 %v1953_v5 }
 0x246   :  { %v5105_v37 = vmax.f32 %v1767_v16, 0.0  ;;  %v1504_v16 = vld [vmem:[#allocation9 + $0x578] sm:$0xff]  ;;  %1635 = vmatpush.msra.mxu2 %v1472_v26 }
 0x247   :  { %v1547_v59 = vpop.f32.mrf.mxu0  ;;  %v1600_v29 = vpop.f32.mrf.mxu1  ;;  %1688 = vmatpush.msra.mxu3 %v1504_v16  ;;  %v1303_v6 = vadd.f32 %v4983_v18, %v1250_v28  ;;  %v1951_v16 = vld [vmem:[#allocation12 + $0x2e8] sm:$0xff]  ;;  %v1253_v18 = vadd.f32 %v4991_v23, %v5021_v10  ;;  %v1460_v23 = vld [vmem:[#allocation9 + $0x418] sm:$0xff] }
 0x248   :  { %v1601_v43 = vadd.f32 %v1600_v29, %v1547_v59  ;;  %2005 = vmatmul.f32.gmra.mxu0 %v5105_v37  ;;  %1636 = vmatpush.msra.mxu2 %v1470_v55 }
 0x249   :  { %1360 = vmatmul.f32.gmra.mxu2 %v4843_v50  ;;  %1413 = vmatmul.f32.gmra.mxu3 %v4845_v20  ;;  %v1306_v10 = vadd.f32 %v4993_v24, %v1253_v18  ;;  %v1256_v24 = vadd.f32 %v5005_v39, %v5035_v61  ;;  %v1939_v61 = vld [vmem:[#allocation12 + $0x288] sm:$0xff] }
 0x24a   :  { %v1739_v49 = vadd.f32 %v1601_v43, %v1300_v12  ;;  %v1468_v12 = vld [vmem:[#allocation9 + $0x458] sm:$0xff]  ;;  %1689 = vmatpush.msra.mxu3 %v1502_v44  ;;  %2081 = vmatpush.msrb.mxu0 %v1951_v16 }
 0x24b   :  { %v1500_v43 = vld [vmem:[#allocation9 + $0x558] sm:$0xff]  ;;  %1637 = vmatpush.msra.mxu2 %v1468_v12 }
 0x24c   :  { %v1769_v63 = vadd.f32 %v5087_v3, %v1739_v49  ;;  %v1137_v58 = vpop.f32.mrf.mxu2  ;;  %v1190_v0 = vpop.f32.mrf.mxu3  ;;  %v1498_v49 = vld [vmem:[#allocation9 + $0x548] sm:$0xff]  ;;  %1690 = vmatpush.msra.mxu3 %v1500_v43  ;;  %v1949_v44 = vld [vmem:[#allocation12 + $0x2d8] sm:$0xff] }
 0x24d   :  { %v5114_v7 = vadd.f32 %v1190_v0, %v1137_v58  ;;  %v1496_v58 = vld [vmem:[#allocation9 + $0x538] sm:$0xff]  ;;  %1638 = vmatpush.msra.mxu2 %v1466_v19  ;;  %2082 = vmatpush.msrb.mxu0 %v1949_v44  ;;  %v1947_v19 = vld [vmem:[#allocation12 + $0x2c8] sm:$0xff] }
 0x24e   :  { %v5116_v59 = vmax.f32 %v1769_v63, 0.0  ;;  %v1464_v63 = vld [vmem:[#allocation9 + $0x438] sm:$0xff]  ;;  %1691 = vmatpush.msra.mxu3 %v1498_v49 }
 0x24f   :  { %v1550_v29 = vpop.f32.mrf.mxu0  ;;  %v1603_v27 = vpop.f32.mrf.mxu1  ;;  %1639 = vmatpush.msra.mxu2 %v1464_v63  ;;  %v1492_v49 = vld [vmem:[#allocation9 + $0x518] sm:$0xff]  ;;  %2083 = vmatpush.msrb.mxu0 %v1947_v19  ;;  %v1259_v19 = vadd.f32 %v5023_v46, %v5043_v17 }
 0x250   :  { %v1604_v25 = vadd.f32 %v1603_v27, %v1550_v29  ;;  %2008 = vmatmul.f32.gmra.mxu0 %v5116_v59  ;;  %v1462_v27 = vld [vmem:[#allocation9 + $0x428] sm:$0xff]  ;;  %1692 = vmatpush.msra.mxu3 %v1496_v58  ;;  %v1945_v63 = vld [vmem:[#allocation12 + $0x2b8] sm:$0xff] }
 0x251   :  { %1363 = vmatmul.f32.gmra.mxu2 %v4855_v8  ;;  %1416 = vmatmul.f32.gmra.mxu3 %v4857_v9  ;;  %v1490_v58 = vld [vmem:[#allocation9 + $0x508] sm:$0xff]  ;;  %v1933_v46 = vld [vmem:[#allocation12 + $0x258] sm:$0xff] }
 0x252   :  { %v1741_v26 = vadd.f32 %v1604_v25, %v1303_v6  ;;  %v1494_v25 = vld [vmem:[#allocation9 + $0x528] sm:$0xff]  ;;  %1640 = vmatpush.msra.mxu2 %v1462_v27  ;;  %2084 = vmatpush.msrb.mxu0 %v1945_v63 }
 0x253   :  { %1693 = vmatpush.msra.mxu3 %v1494_v25  ;;  %v1941_v25 = vld [vmem:[#allocation12 + $0x298] sm:$0xff] }
 0x254   :  { %v1771_v28 = vadd.f32 %v5087_v3, %v1741_v26  ;;  %v1140_v0 = vpop.f32.mrf.mxu2  ;;  %v1193_v55 = vpop.f32.mrf.mxu3  ;;  %v1458_v26 = vld [vmem:[#allocation9 + $0x408] sm:$0xff]  ;;  %1641 = vmatpush.msra.mxu2 %v1460_v23  ;;  %v1309_v23 = vadd.f32 %v5007_v48, %v1256_v24 }
 0x255   :  { %v5125_v29 = vadd.f32 %v1193_v55, %v1140_v0  ;;  %1694 = vmatpush.msra.mxu3 %v1492_v49  ;;  %v1943_v55 = vld [vmem:[#allocation12 + $0x2a8] sm:$0xff] }
 0x256   :  { %v5127_v12 = vmax.f32 %v1771_v28, 0.0  ;;  %1642 = vmatpush.msra.mxu2 %v1458_v26  ;;  %2085 = vmatpush.msrb.mxu0 %v1943_v55  ;;  %v1931_v55 = vld [vmem:[#allocation12 + $0x248] sm:$0xff] }
 0x257   :  { %v1553_v43 = vpop.f32.mrf.mxu0  ;;  %v1606_v6 = vpop.f32.mrf.mxu1  ;;  %1695 = vmatpush.msra.mxu3 %v1490_v58 }
 0x258   :  { %v1607_v5 = vadd.f32 %v1606_v6, %v1553_v43  ;;  %2011 = vmatmul.f32.gmra.mxu0 %v5127_v12 }
 0x259   :  { %1366 = vmatmul.f32.gmra.mxu2 %v4867_v31  ;;  %1419 = vmatmul.f32.gmra.mxu3 %v4869_v34 }
 0x25a   :  { %v1743_v16 = vadd.f32 %v1607_v5, %v1306_v10  ;;  %2086 = vmatpush.msrb.mxu0 %v1941_v25  ;;  %v1937_v5 = vld [vmem:[#allocation12 + $0x278] sm:$0xff] }
 0x25c   :  { %v1773_v18 = vadd.f32 %v5087_v3, %v1743_v16  ;;  %v1143_v28 = vpop.f32.mrf.mxu2  ;;  %v1196_v0 = vpop.f32.mrf.mxu3  ;;  %2087 = vmatpush.msrb.mxu0 %v1939_v61 }
 0x25d   :  { %v5136_v44 = vadd.f32 %v1196_v0, %v1143_v28  ;;  %v1312_v28 = vadd.f32 %v5025_v14, %v1259_v19 }
 0x25e   :  { %v5138_v27 = vmax.f32 %v1773_v18, 0.0  ;;  %2088 = vmatpush.msrb.mxu0 %v1937_v5  ;;  %v1935_v18 = vld [vmem:[#allocation12 + $0x268] sm:$0xff]  ;;  %v1929_v5 = vld [vmem:[#allocation12 + $0x238] sm:$0xff] }
 0x25f   :  { %v1556_v43 = vpop.f32.mrf.mxu0  ;;  %v1609_v6 = vpop.f32.mrf.mxu1 }
 0x260   :  { %v1610_v39 = vadd.f32 %v1609_v6, %v1556_v43  ;;  %2014 = vmatmul.f32.gmra.mxu0 %v5138_v27  ;;  %v1262_v43 = vadd.f32 %v5037_v36, %v5053_v15  ;;  %v1927_v36 = vld [vmem:[#allocation12 + $0x228] sm:$0xff] }
 0x261   :  { %1369 = vmatmul.f32.gmra.mxu2 %v4879_v21  ;;  %1422 = vmatmul.f32.gmra.mxu3 %v4881_v22 }
 0x262   :  { %v1745_v10 = vadd.f32 %v1610_v39, %v1309_v23  ;;  %2089 = vmatpush.msrb.mxu0 %v1935_v18  ;;  %v1315_v19 = vadd.f32 %v5039_v33, %v1262_v43 }
 0x264   :  { %v1775_v49 = vadd.f32 %v5087_v3, %v1745_v10  ;;  %v1146_v26 = vpop.f32.mrf.mxu2  ;;  %v1199_v16 = vpop.f32.mrf.mxu3  ;;  %2090 = vmatpush.msrb.mxu0 %v1933_v46 }
 0x265   :  { %v5147_v48 = vadd.f32 %v1199_v16, %v1146_v26  ;;  %v1925_v26 = vld [vmem:[#allocation12 + $0x218] sm:$0xff]  ;;  %v1265_v16 = vadd.f32 %v5045_v42, %v5061_v47  ;;  %v1268_v47 = vadd.f32 %v5055_v51, %v5069_v60 }
 0x266   :  { %v5149_v63 = vmax.f32 %v1775_v49, 0.0  ;;  %2091 = vmatpush.msrb.mxu0 %v1931_v55 }
 0x267   :  { %v1559_v58 = vpop.f32.mrf.mxu0  ;;  %v1612_v24 = vpop.f32.mrf.mxu1  ;;  %v1318_v55 = vadd.f32 %v5047_v54, %v1265_v16 }
 0x268   :  { %v1613_v0 = vadd.f32 %v1612_v24, %v1559_v58  ;;  %2017 = vmatmul.f32.gmra.mxu0 %v5149_v63 }
 0x269   :  { %1372 = vmatmul.f32.gmra.mxu2 %v4891_v45  ;;  %1425 = vmatmul.f32.gmra.mxu3 %v4893_v57 }
 0x26a   :  { %v1747_v17 = vadd.f32 %v1613_v0, %v1312_v28  ;;  %2092 = vmatpush.msrb.mxu0 %v1929_v5 }
 0x26c   :  { %v1777_v6 = vadd.f32 %v5087_v3, %v1747_v17  ;;  %v1149_v25 = vpop.f32.mrf.mxu2  ;;  %v1202_v23 = vpop.f32.mrf.mxu3  ;;  %2093 = vmatpush.msrb.mxu0 %v1927_v36  ;;  %v1923_v17 = vld [vmem:[#allocation12 + $0x208] sm:$0xff] }
 0x26d   :  { %v5158_v14 = vadd.f32 %v1202_v23, %v1149_v25 }
 0x26e   :  { %v5160_v39 = vmax.f32 %v1777_v6, 0.0  ;;  %2094 = vmatpush.msrb.mxu0 %v1925_v26 }
 0x26f   :  { %v1562_v61 = vpop.f32.mrf.mxu0  ;;  %v1615_v10 = vpop.f32.mrf.mxu1 }
 0x270   :  { %v1616_v49 = vadd.f32 %v1615_v10, %v1562_v61  ;;  %2020 = vmatmul.f32.gmra.mxu0 %v5160_v39 }
 0x271   :  { %1375 = vmatmul.f32.gmra.mxu2 %v4903_v1  ;;  %1428 = vmatmul.f32.gmra.mxu3 %v4905_v13 }
 0x272   :  { %v1749_v15 = vadd.f32 %v1616_v49, %v1315_v19  ;;  %2095 = vmatpush.msrb.mxu0 %v1923_v17  ;;  %v1321_v19 = vadd.f32 %v5057_v32, %v1268_v47  ;;  %v1873_v47 = vld [vmem:[#allocation12 + $0x90] sm:$0xff] }
 0x274   :  { %v1779_v58 = vadd.f32 %v5087_v3, %v1749_v15  ;;  %v1152_v24 = vpop.f32.mrf.mxu2  ;;  %v1205_v18 = vpop.f32.mrf.mxu3 }
 0x275   :  { %v5169_v33 = vadd.f32 %v1205_v18, %v1152_v24  ;;  %v1883_v18 = vld [vmem:[#allocation12 + $0xe0] sm:$0xff] }
 0x276   :  { %v5171_v28 = vmax.f32 %v1779_v58, 0.0 }
 0x277   :  { %v1565_v0 = vpop.f32.mrf.mxu0  ;;  %v1618_v46 = vpop.f32.mrf.mxu1 }
 0x278   :  { %v1619_v43 = vadd.f32 %v1618_v46, %v1565_v0  ;;  %2023 = vmatmul.f32.gmra.mxu0 %v5171_v28  ;;  %v1879_v0 = vld [vmem:[#allocation12 + $0xc0] sm:$0xff]  ;;  %v1886_v46 = vld [vmem:[#allocation12 + $0xf8] sm:$0xff] }
 0x279   :  { %1643 = vmatmul.f32.vlgmr.msra.gmra.mxu2 %v4795_v30  ;;  %1696 = vmatmul.f32.vlgmr.msra.gmra.mxu3 %v4797_v52 }
 0x27a   :  { %v1751_v42 = vadd.f32 %v1619_v43, %v1318_v55  ;;  %2268 = vmatpush.msra.mxu0 %v1886_v46  ;;  %v1882_v43 = vld [vmem:[#allocation12 + $0xd8] sm:$0xff] }
 0x27c   :  { %v1781_v6 = vadd.f32 %v5087_v3, %v1751_v42  ;;  %v1155_v25 = vpop.f32.mrf.mxu2  ;;  %v1208_v23 = vpop.f32.mrf.mxu3 }
 0x27d   :  { %v5180_v61 = vadd.f32 %v1208_v23, %v1155_v25  ;;  %v1869_v25 = vld [vmem:[#allocation12 + $0x70] sm:$0xff]  ;;  %v1876_v23 = vld [vmem:[#allocation12 + $0xa8] sm:$0xff] }
 0x27e   :  { %v5182_v10 = vmax.f32 %v1781_v6, 0.0  ;;  %v1878_v6 = vld [vmem:[#allocation12 + $0xb8] sm:$0xff] }
 0x27f   :  { %v1568_v54 = vpop.f32.mrf.mxu0  ;;  %v1621_v5 = vpop.f32.mrf.mxu1 }
 0x280   :  { %v1622_v30 = vadd.f32 %v1621_v5, %v1568_v54  ;;  %2026 = vmatmul.f32.gmra.mxu0 %v5182_v10  ;;  %v1867_v5 = vld [vmem:[#allocation12 + $0x60] sm:$0xff] }
 0x281   :  { %1646 = vmatmul.f32.gmra.mxu2 %v4807_v62  ;;  %1699 = vmatmul.f32.gmra.mxu3 %v4809_v53 }
 0x282   :  { %v1753_v52 = vadd.f32 %v1622_v30, %v1321_v19  ;;  %v1865_v30 = vld [vmem:[#allocation12 + $0x50] sm:$0xff] }
 0x284   :  { %v1783_v51 = vadd.f32 %v5087_v3, %v1753_v52  ;;  %v1158_v60 = vpop.f32.mrf.mxu2  ;;  %v1211_v49 = vpop.f32.mrf.mxu3  ;;  %v1872_v52 = vld [vmem:[#allocation12 + $0x88] sm:$0xff] }
 0x285   :  { %v5189_v36 = vadd.f32 %v1211_v49, %v1158_v60  ;;  %v1870_v60 = vld [vmem:[#allocation12 + $0x78] sm:$0xff] }
 0x286   :  { %v5191_v15 = vmax.f32 %v1783_v51, 0.0  ;;  %v1861_v51 = vld [vmem:[#allocation12 + $0x30] sm:$0xff] }
 0x288   :  { %2029 = vmatmul.f32.gmra.mxu0 %v5191_v15 }
 0x289   :  { %1649 = vmatmul.f32.gmra.mxu2 %v4819_v11  ;;  %1702 = vmatmul.f32.gmra.mxu3 %v4821_v56  ;;  %v1885_v11 = vld [vmem:[#allocation12 + $0xf0] sm:$0xff] }
 0x28a   :  { %2174 = vmatpush.msrb.mxu2 %v1885_v11  ;;  %v1864_v11 = vld [vmem:[#allocation12 + $0x48] sm:$0xff] }
 0x28c   :  { %v1161_v32 = vpop.f32.mrf.mxu2  ;;  %v1214_v26 = vpop.f32.mrf.mxu3  ;;  %2175 = vmatpush.msrb.mxu2 %v1883_v18 }
 0x28d   :  { %v5196_v62 = vadd.f32 %v1214_v26, %v1161_v32  ;;  %v1859_v32 = vld [vmem:[#allocation12 + $0x20] sm:$0xff] }
 0x290   :  { %2096 = vmatmul.f32.vlgmr.msrb.gmra.mxu0 %v5094_v4 }
 0x291   :  { %1652 = vmatmul.f32.gmra.mxu2 %v4831_v35  ;;  %1705 = vmatmul.f32.gmra.mxu3 %v4833_v38  ;;  %v1881_v38 = vld [vmem:[#allocation12 + $0xd0] sm:$0xff] }
 0x292   :  { %2176 = vmatpush.msrb.mxu2 %v1881_v38  ;;  %v1862_v38 = vld [vmem:[#allocation12 + $0x38] sm:$0xff] }
 0x294   :  { %v1164_v53 = vpop.f32.mrf.mxu2  ;;  %v1217_v16 = vpop.f32.mrf.mxu3  ;;  %2177 = vmatpush.msrb.mxu2 %v1879_v0  ;;  %v1858_v0 = vld [vmem:[#allocation12 + $0x18] sm:$0xff] }
 0x295   :  { %v5201_v58 = vadd.f32 %v1217_v16, %v1164_v53  ;;  %v1857_v53 = vld [vmem:[#allocation12 + $0x10] sm:$0xff]  ;;  %v1866_v16 = vld [vmem:[#allocation12 + $0x58] sm:$0xff] }
 0x298   :  { %2099 = vmatmul.f32.gmra.mxu0 %v5105_v37 }
 0x299   :  { %1655 = vmatmul.f32.gmra.mxu2 %v4843_v50  ;;  %1708 = vmatmul.f32.gmra.mxu3 %v4845_v20  ;;  %v1877_v50 = vld [vmem:[#allocation12 + $0xb0] sm:$0xff]  ;;  %v1884_v20 = vld [vmem:[#allocation12 + $0xe8] sm:$0xff] }
 0x29a   :  { %2178 = vmatpush.msrb.mxu2 %v1877_v50  ;;  %2269 = vmatpush.msra.mxu0 %v1884_v20  ;;  %v1917_v20 = vld [vmem:[#allocation12 + $0x1f0] sm:$0xff] }
 0x29b   :  { %2221 = vmatpush.msrb.mxu3 %v1917_v20 }
 0x29c   :  { %v1343_v56 = vpop.f32.mrf.mxu2  ;;  %v5206_v24 = vpop.f32.mrf.mxu3  ;;  %2270 = vmatpush.msra.mxu0 %v1882_v43  ;;  %v5812_v43 = vld [vmem:[#allocation37_spill] sm:$0xff] }
 0x29d   :  { %v5209_v35 = vadd.f32 %v1343_v56, %v5092_v2  ;;  %v1875_v2 = vld [vmem:[#allocation12 + $0xa0] sm:$0xff] }
 0x29e   :  { %2179 = vmatpush.msrb.mxu2 %v1875_v2  ;;  %v5811_v2 = vld [vmem:[#allocation39_spill] sm:$0xff] }
 0x2a0   :  { %2102 = vmatmul.f32.gmra.mxu0 %v5116_v59  ;;  %2180 = vmatpush.msrb.mxu2 %v1873_v47  ;;  %v1238_v47 = vadd.f32 %v5812_v43, %v5811_v2  ;;  %v1899_v2 = vld [vmem:[#allocation12 + $0x160] sm:$0xff]  ;;  %v1972_v43 = vld [vmem:[#allocation12 + $0x390] sm:$0xff] }
 0x2a1   :  { %1658 = vmatmul.f32.gmra.mxu2 %v4855_v8  ;;  %1711 = vmatmul.f32.gmra.mxu3 %v4857_v9  ;;  %v1880_v8 = vld [vmem:[#allocation12 + $0xc8] sm:$0xff]  ;;  %v1871_v9 = vld [vmem:[#allocation12 + $0x80] sm:$0xff] }
 0x2a2   :  { %2271 = vmatpush.msra.mxu0 %v1880_v8  ;;  %2181 = vmatpush.msrb.mxu2 %v1871_v9  ;;  %v5813_v8 = vld [vmem:[#allocation35_spill] sm:$0xff]  ;;  %v5814_v9 = vld [vmem:[#allocation36_spill] sm:$0xff] }
 0x2a4   :  { %v1346_v17 = vpop.f32.mrf.mxu2  ;;  %v5214_v55 = vpop.f32.mrf.mxu3  ;;  %2272 = vmatpush.msra.mxu0 %v1878_v6  ;;  %2182 = vmatpush.msrb.mxu2 %v1869_v25  ;;  %v1913_v6 = vld [vmem:[#allocation12 + $0x1d0] sm:$0xff]  ;;  %v5816_v25 = vld [vmem:[#allocation45_spill] sm:$0xff] }
 0x2a5   :  { %v5217_v42 = vadd.f32 %v1346_v17, %v5103_v41  ;;  %v1856_v17 = vld [vmem:[#allocation12 + $0x8] sm:$0xff] }
 0x2a6   :  { %2273 = vmatpush.msra.mxu0 %v1876_v23  ;;  %2183 = vmatpush.msrb.mxu2 %v1867_v5 }
 0x2a8   :  { %2105 = vmatmul.f32.gmra.mxu0 %v5127_v12  ;;  %2184 = vmatpush.msrb.mxu2 %v1865_v30  ;;  %v1911_v30 = vld [vmem:[#allocation12 + $0x1c0] sm:$0xff] }
 0x2a9   :  { %1661 = vmatmul.f32.gmra.mxu2 %v4867_v31  ;;  %1714 = vmatmul.f32.gmra.mxu3 %v4869_v34  ;;  %v1874_v31 = vld [vmem:[#allocation12 + $0x98] sm:$0xff]  ;;  %v1863_v34 = vld [vmem:[#allocation12 + $0x40] sm:$0xff] }
 0x2aa   :  { %2274 = vmatpush.msra.mxu0 %v1874_v31  ;;  %2185 = vmatpush.msrb.mxu2 %v1863_v34  ;;  %v5817_v31 = vld [vmem:[#allocation38_spill] sm:$0xff] }
 0x2ab   :  { %v1291_v34 = vadd.f32 %v5817_v31, %v1238_v47  ;;  %v1891_v31 = vld [vmem:[#allocation12 + $0x120] sm:$0xff] }
 0x2ac   :  { %v1349_v54 = vpop.f32.mrf.mxu2  ;;  %v5222_v41 = vpop.f32.mrf.mxu3  ;;  %2275 = vmatpush.msra.mxu0 %v1872_v52  ;;  %2186 = vmatpush.msrb.mxu2 %v1861_v51 }
 0x2ad   :  { %v5225_v19 = vadd.f32 %v1349_v54, %v5114_v7 }
 0x2ae   :  { %2276 = vmatpush.msra.mxu0 %v1870_v60  ;;  %2187 = vmatpush.msrb.mxu2 %v1859_v32  ;;  %v1980_v60 = vld [vmem:[#allocation12 + $0x3d0] sm:$0xff] }
 0x2af   :  { %v5818_v32 = vld [vmem:[#allocation40_spill] sm:$0xff] }
 0x2b0   :  { %2108 = vmatmul.f32.gmra.mxu0 %v5138_v27  ;;  %2188 = vmatpush.msrb.mxu2 %v1857_v53  ;;  %v5819_v53 = vmax.f32 %v5818_v32, 0.0 }
 0x2b1   :  { %1664 = vmatmul.f32.gmra.mxu2 %v4879_v21  ;;  %1717 = vmatmul.f32.gmra.mxu3 %v4881_v22  ;;  %v1868_v21 = vld [vmem:[#allocation12 + $0x68] sm:$0xff]  ;;  %v1855_v22 = vld [vmem:[#allocation12] sm:$0xff] }
 0x2b2   :  { %2277 = vmatpush.msra.mxu0 %v1868_v21  ;;  %2189 = vmatpush.msrb.mxu2 %v1855_v22  ;;  %v5820_v21 = vld [vmem:[#allocation41_spill] sm:$0xff] }
 0x2b3   :  { %v5821_v22 = vmax.f32 %v5820_v21, 0.0  ;;  %v1960_v21 = vld [vmem:[#allocation12 + $0x330] sm:$0xff] }
 0x2b4   :  { %v1352_v49 = vpop.f32.mrf.mxu2  ;;  %v5230_v7 = vpop.f32.mrf.mxu3  ;;  %2278 = vmatpush.msra.mxu0 %v1866_v16  ;;  %v1907_v16 = vld [vmem:[#allocation12 + $0x1a0] sm:$0xff] }
 0x2b5   :  { %v5233_v26 = vadd.f32 %v1352_v49, %v5125_v29  ;;  %v1909_v49 = vld [vmem:[#allocation12 + $0x1b0] sm:$0xff] }
 0x2b6   :  { %2279 = vmatpush.msra.mxu0 %v1864_v11 }
 0x2b8   :  { %2111 = vmatmul.f32.gmra.mxu0 %v5149_v63 }
 0x2b9   :  { %1667 = vmatmul.f32.gmra.mxu2 %v4891_v45  ;;  %1720 = vmatmul.f32.gmra.mxu3 %v4893_v57  ;;  %v1860_v45 = vld [vmem:[#allocation12 + $0x28] sm:$0xff]  ;;  %v1984_v57 = vld [vmem:[#allocation12 + $0x3f0] sm:$0xff] }
 0x2ba   :  { %2280 = vmatpush.msra.mxu0 %v1862_v38  ;;  %2033 = vmatpush.msra.mxu1 %v1984_v57 }
 0x2bc   :  { %v1355_v56 = vpop.f32.mrf.mxu2  ;;  %v5238_v18 = vpop.f32.mrf.mxu3  ;;  %2281 = vmatpush.msra.mxu0 %v1860_v45  ;;  %v1978_v45 = vld [vmem:[#allocation12 + $0x3c0] sm:$0xff] }
 0x2bd   :  { %v5241_v29 = vadd.f32 %v1355_v56, %v5136_v44 }
 0x2be   :  { %2282 = vmatpush.msra.mxu0 %v1858_v0  ;;  %v1903_v0 = vld [vmem:[#allocation12 + $0x180] sm:$0xff] }
 0x2c0   :  { %2114 = vmatmul.f32.gmra.mxu0 %v5160_v39 }
 0x2c1   :  { %1670 = vmatmul.f32.gmra.mxu2 %v4903_v1  ;;  %1723 = vmatmul.f32.gmra.mxu3 %v4905_v13  ;;  %v1982_v1 = vld [vmem:[#allocation12 + $0x3e0] sm:$0xff] }
 0x2c2   :  { %v1915_v13 = vld [vmem:[#allocation12 + $0x1e0] sm:$0xff]  ;;  %2283 = vmatpush.msra.mxu0 %v1856_v17  ;;  %2034 = vmatpush.msra.mxu1 %v1982_v1  ;;  %v1901_v17 = vld [vmem:[#allocation12 + $0x170] sm:$0xff] }
 0x2c3   :  { %2222 = vmatpush.msrb.mxu3 %v1915_v13  ;;  %v1974_v1 = vld [vmem:[#allocation12 + $0x3a0] sm:$0xff]  ;;  %v5276_v13 = vpop.f32.mrf.mxu0 }
 0x2c4   :  { %v1358_v46 = vpop.f32.mrf.mxu2  ;;  %v5246_v50 = vpop.f32.mrf.mxu3  ;;  %2035 = vmatpush.msra.mxu1 %v1980_v60 }
 0x2c5   :  { %v5249_v44 = vadd.f32 %v1358_v46, %v5147_v48  ;;  %v5815_v48 = vld [vmem:[#allocation44_spill] sm:$0xff]  ;;  %2223 = vmatpush.msrb.mxu3 %v1913_v6 }
 0x2c6   :  { %v1592_v23 = vadd.f32 %v5816_v25, %v5815_v48  ;;  %2036 = vmatpush.msra.mxu1 %v1978_v45  ;;  %v1976_v46 = vld [vmem:[#allocation12 + $0x3b0] sm:$0xff]  ;;  %v1895_v48 = vld [vmem:[#allocation12 + $0x140] sm:$0xff] }
 0x2c7   :  { %2224 = vmatpush.msrb.mxu3 %v1911_v30  ;;  %v1968_v25 = vld [vmem:[#allocation12 + $0x370] sm:$0xff]  ;;  %v1954_v45 = vld [vmem:[#allocation12 + $0x300] sm:$0xff] }
 0x2c8   :  { %2117 = vmatmul.f32.gmra.mxu0 %v5171_v28  ;;  %v1733_v51 = vadd.f32 %v1592_v23, %v1291_v34  ;;  %2037 = vmatpush.msra.mxu1 %v1976_v46  ;;  %v1893_v23 = vld [vmem:[#allocation12 + $0x130] sm:$0xff] }
 0x2c9   :  { %1673 = vmatmul.f32.gmra.mxu2 %v5813_v8  ;;  %1726 = vmatmul.f32.gmra.mxu3 %v5814_v9  ;;  %v1970_v9 = vld [vmem:[#allocation12 + $0x380] sm:$0xff]  ;;  %v1964_v34 = vld [vmem:[#allocation12 + $0x350] sm:$0xff] }
 0x2ca   :  { %2225 = vmatpush.msrb.mxu3 %v1909_v49  ;;  %v1763_v11 = vadd.f32 %v5087_v3, %v1733_v51  ;;  %2038 = vmatpush.msra.mxu1 %v1974_v1  ;;  %v1962_v49 = vld [vmem:[#allocation12 + $0x340] sm:$0xff]  ;;  %v2405_v1 = vld [vmem:[#allocation12 + $0x4b0] sm:$0xff] }
 0x2cb   :  { %v5283_v30 = vpop.f32.mrf.mxu0 }
 0x2cc   :  { %v1361_v54 = vpop.f32.mrf.mxu2  ;;  %v5258_v5 = vpop.f32.mrf.mxu3  ;;  %2226 = vmatpush.msrb.mxu3 %v1907_v16  ;;  %v1787_v20 = vmax.f32 %v1763_v11, 0.0  ;;  %2039 = vmatpush.msra.mxu1 %v1972_v43  ;;  %v1956_v16 = vld [vmem:[#allocation12 + $0x310] sm:$0xff] }
 0x2cd   :  { %v5262_v52 = vadd.f32 %v1361_v54, %v5158_v14  ;;  %v1905_v14 = vld [vmem:[#allocation12 + $0x190] sm:$0xff]  ;;  %v1966_v54 = vld [vmem:[#allocation12 + $0x360] sm:$0xff] }
 0x2ce   :  { %2227 = vmatpush.msrb.mxu3 %v1905_v14  ;;  %2040 = vmatpush.msra.mxu1 %v1970_v9  ;;  %v2413_v11 = vld [vmem:[#allocation12 + $0x4f0] sm:$0xff] }
 0x2cf   :  { %2447 = vmatpush.msra.mxu2 %v2413_v11  ;;  %v2393_v11 = vld [vmem:[#allocation12 + $0x450] sm:$0xff] }
 0x2d0   :  { %2120 = vmatmul.f32.gmra.mxu0 %v5182_v10  ;;  %2228 = vmatpush.msrb.mxu3 %v1903_v0  ;;  %v2411_v0 = vld [vmem:[#allocation12 + $0x4e0] sm:$0xff] }
 0x2d1   :  { %1676 = vmatmul.f32.gmra.mxu2 %v5819_v53  ;;  %1729 = vmatmul.f32.gmra.mxu3 %v5821_v22  ;;  %v1887_v53 = vld [vmem:[#allocation12 + $0x100] sm:$0xff] }
 0x2d2   :  { %2229 = vmatpush.msrb.mxu3 %v1901_v17  ;;  %2041 = vmatpush.msra.mxu1 %v1968_v25  ;;  %v1958_v22 = vld [vmem:[#allocation12 + $0x320] sm:$0xff]  ;;  %v2414_v17 = vld [vmem:[#allocation12 + $0x4f8] sm:$0xff]  ;;  %v2401_v25 = vld [vmem:[#allocation12 + $0x490] sm:$0xff] }
 0x2d3   :  { %v5293_v14 = vpop.f32.mrf.mxu0  ;;  %2448 = vmatpush.msra.mxu2 %v2411_v0  ;;  %2541 = vmatpush.msrb.mxu0 %v2414_v17 }
 0x2d4   :  { %v1364_v56 = vpop.f32.mrf.mxu2  ;;  %v5270_v38 = vpop.f32.mrf.mxu3  ;;  %2230 = vmatpush.msrb.mxu3 %v1899_v2  ;;  %2042 = vmatpush.msra.mxu1 %v1966_v54  ;;  %v2412_v2 = vld [vmem:[#allocation12 + $0x4e8] sm:$0xff]  ;;  %v2399_v54 = vld [vmem:[#allocation12 + $0x480] sm:$0xff] }
 0x2d5   :  { %v5273_v57 = vadd.f32 %v1364_v56, %v5169_v33  ;;  %v1897_v33 = vld [vmem:[#allocation12 + $0x150] sm:$0xff]  ;;  %2542 = vmatpush.msrb.mxu0 %v2412_v2 }
 0x2d6   :  { %2231 = vmatpush.msrb.mxu3 %v1897_v33  ;;  %2043 = vmatpush.msra.mxu1 %v1964_v34  ;;  %v2397_v34 = vld [vmem:[#allocation12 + $0x470] sm:$0xff] }
 0x2d8   :  { %2123 = vmatmul.f32.gmra.mxu0 %v5191_v15  ;;  %2232 = vmatpush.msrb.mxu3 %v1895_v48 }
 0x2d9   :  { %2190 = vmatmul.f32.vlgmr.msrb.gmra.mxu2 %v1787_v20  ;;  %2044 = vmatpush.msra.mxu1 %v1962_v49  ;;  %v2395_v49 = vld [vmem:[#allocation12 + $0x460] sm:$0xff] }
 0x2da   :  { %2233 = vmatpush.msrb.mxu3 %v1893_v23  ;;  %v2408_v23 = vld [vmem:[#allocation12 + $0x4c8] sm:$0xff] }
 0x2db   :  { %2045 = vmatpush.msra.mxu1 %v1960_v21  ;;  %v5304_v9 = vpop.f32.mrf.mxu0  ;;  %v1397_v21 = vadd.f32 %v5206_v24, %v5209_v35  ;;  %v2396_v24 = vld [vmem:[#allocation12 + $0x468] sm:$0xff] }
 0x2dc   :  { %v1367_v47 = vpop.f32.mrf.mxu2  ;;  %v5278_v8 = vpop.f32.mrf.mxu3  ;;  %2234 = vmatpush.msrb.mxu3 %v1891_v31  ;;  %v2406_v31 = vld [vmem:[#allocation12 + $0x4b8] sm:$0xff] }
 0x2dd   :  { %v5281_v6 = vadd.f32 %v1367_v47, %v5180_v61  ;;  %v1889_v61 = vld [vmem:[#allocation12 + $0x110] sm:$0xff]  ;;  %2046 = vmatpush.msra.mxu1 %v1958_v22  ;;  %v2410_v47 = vld [vmem:[#allocation12 + $0x4d8] sm:$0xff] }
 0x2de   :  { %2235 = vmatpush.msrb.mxu3 %v1889_v61  ;;  %2543 = vmatpush.msrb.mxu0 %v2410_v47  ;;  %v2404_v61 = vld [vmem:[#allocation12 + $0x4a8] sm:$0xff]  ;;  %v1400_v47 = vadd.f32 %v5214_v55, %v5217_v42 }
 0x2df   :  { %2047 = vmatpush.msra.mxu1 %v1956_v16  ;;  %v5314_v16 = vperm.slane %v5081_v40, 1  ;;  %v2389_v40 = vld [vmem:[#allocation12 + $0x430] sm:$0xff]  ;;  %v2388_v55 = vld [vmem:[#allocation12 + $0x428] sm:$0xff] }
 0x2e0   :  { %2284 = vmatmul.f32.vlgmr.msra.gmra.mxu0 %v1787_v20  ;;  %2236 = vmatpush.msrb.mxu3 %v1887_v53  ;;  %v2407_v20 = vld [vmem:[#allocation12 + $0x4c0] sm:$0xff]  ;;  %v2402_v53 = vld [vmem:[#allocation12 + $0x498] sm:$0xff] }
 0x2e1   :  { %2193 = vmatmul.f32.gmra.mxu2 %v5094_v4  ;;  %2048 = vmatpush.msra.mxu1 %v1954_v45 }
 0x2e2   :  { %2544 = vmatpush.msrb.mxu0 %v2408_v23  ;;  %v2385_v23 = vld [vmem:[#allocation12 + $0x410] sm:$0xff] }
 0x2e3   :  { %v5316_v45 = vpop.f32.mrf.mxu0 }
 0x2e4   :  { %v1370_v51 = vpop.f32.mrf.mxu2  ;;  %v5286_v60 = vpop.f32.mrf.mxu3  ;;  %2545 = vmatpush.msrb.mxu0 %v2406_v31 }
 0x2e5   :  { %v5289_v32 = vadd.f32 %v1370_v51, %v5189_v36 }
 0x2e6   :  { %2546 = vmatpush.msrb.mxu0 %v2404_v61  ;;  %v2390_v61 = vld [vmem:[#allocation12 + $0x438] sm:$0xff] }
 0x2e8   :  { %2287 = vmatmul.f32.gmra.mxu0 %v5094_v4  ;;  %v2409_v4 = vld [vmem:[#allocation12 + $0x4d0] sm:$0xff] }
 0x2e9   :  { %2196 = vmatmul.f32.gmra.mxu2 %v5105_v37  ;;  %2547 = vmatpush.msrb.mxu0 %v2402_v53 }
 0x2ea   :  { %2449 = vmatpush.msra.mxu2 %v2409_v4  ;;  %v2391_v4 = vld [vmem:[#allocation12 + $0x440] sm:$0xff] }
 0x2ec   :  { %v1373_v36 = vpop.f32.mrf.mxu2  ;;  %v5295_v56 = vpop.f32.mrf.mxu3  ;;  %2450 = vmatpush.msra.mxu2 %v2407_v20  ;;  %v2398_v20 = vld [vmem:[#allocation12 + $0x478] sm:$0xff] }
 0x2ed   :  { %v5298_v46 = vadd.f32 %v1373_v36, %v5196_v62  ;;  %v2403_v62 = vld [vmem:[#allocation12 + $0x4a0] sm:$0xff]  ;;  %v2400_v36 = vld [vmem:[#allocation12 + $0x488] sm:$0xff] }
 0x2ee   :  { %2451 = vmatpush.msra.mxu2 %v2405_v1  ;;  %2548 = vmatpush.msrb.mxu0 %v2400_v36  ;;  %v2384_v36 = vld [vmem:[#allocation12 + $0x408] sm:$0xff] }
 0x2f0   :  { %2290 = vmatmul.f32.gmra.mxu0 %v5105_v37  ;;  %2452 = vmatpush.msra.mxu2 %v2403_v62  ;;  %v2394_v62 = vld [vmem:[#allocation12 + $0x458] sm:$0xff] }
 0x2f1   :  { %2199 = vmatmul.f32.gmra.mxu2 %v5116_v59  ;;  %2549 = vmatpush.msrb.mxu0 %v2398_v20 }
 0x2f2   :  { %2453 = vmatpush.msra.mxu2 %v2401_v25 }
 0x2f3   :  { %2550 = vmatpush.msrb.mxu0 %v2396_v24  ;;  %v1406_v24 = vadd.f32 %v5230_v7, %v5233_v26 }
 0x2f4   :  { %v1376_v43 = vpop.f32.mrf.mxu2  ;;  %v5302_v33 = vpop.f32.mrf.mxu3  ;;  %2454 = vmatpush.msra.mxu2 %v2399_v54  ;;  %v2392_v54 = vld [vmem:[#allocation12 + $0x448] sm:$0xff] }
 0x2f5   :  { %v5307_v48 = vadd.f32 %v1376_v43, %v5201_v58  ;;  %v2387_v43 = vld [vmem:[#allocation12 + $0x420] sm:$0xff]  ;;  %2551 = vmatpush.msrb.mxu0 %v2394_v62 }
 0x2f6   :  { %2455 = vmatpush.msra.mxu2 %v2397_v34  ;;  %v2383_v34 = vld [vmem:[#allocation12 + $0x400] sm:$0xff] }
 0x2f7   :  { %2552 = vmatpush.msrb.mxu0 %v2392_v54  ;;  %v2443_v62 = vld [vmem:[#allocation12 + $0x5e0] sm:$0xff] }
 0x2f8   :  { %2293 = vmatmul.f32.gmra.mxu0 %v5116_v59  ;;  %2456 = vmatpush.msra.mxu2 %v2395_v49  ;;  %v2439_v54 = vld [vmem:[#allocation12 + $0x5c0] sm:$0xff] }
 0x2f9   :  { %2202 = vmatmul.f32.gmra.mxu2 %v5127_v12  ;;  %2553 = vmatpush.msrb.mxu0 %v2390_v61 }
 0x2fa   :  { %2457 = vmatpush.msra.mxu2 %v2393_v11 }
 0x2fb   :  { %2554 = vmatpush.msrb.mxu0 %v2388_v55  ;;  %v2437_v55 = vld [vmem:[#allocation12 + $0x5b0] sm:$0xff] }
 0x2fc   :  { %v1644_v51 = vpop.f32.mrf.mxu2  ;;  %v1697_v58 = vpop.f32.mrf.mxu3  ;;  %2458 = vmatpush.msra.mxu2 %v2391_v4 }
 0x2fd   :  { %v1698_v22 = vadd.f32 %v1697_v58, %v1644_v51  ;;  %v5329_v51 = vpop.f32.mrf.mxu0 }
 0x2fe   :  { %2459 = vmatpush.msra.mxu2 %v2389_v40 }
 0x2ff   :  { %v1734_v0 = vadd.f32 %v1698_v22, %v1397_v21  ;;  %v2386_v21 = vld [vmem:[#allocation12 + $0x418] sm:$0xff]  ;;  %v1403_v22 = vadd.f32 %v5222_v41, %v5225_v19 }
 0x300   :  { %2296 = vmatmul.f32.gmra.mxu0 %v5127_v12  ;;  %2460 = vmatpush.msra.mxu2 %v2387_v43 }
 0x301   :  { %v5320_v17 = vadd.f32 %v5314_v16, %v1734_v0  ;;  %2205 = vmatmul.f32.gmra.mxu2 %v5138_v27  ;;  %2555 = vmatpush.msrb.mxu0 %v2386_v21  ;;  %v2435_v21 = vld [vmem:[#allocation12 + $0x5a0] sm:$0xff] }
 0x302   :  { %2461 = vmatpush.msra.mxu2 %v2385_v23 }
 0x303   :  { %v1788_v35 = vmax.f32 %v5320_v17, 0.0  ;;  %2556 = vmatpush.msrb.mxu0 %v2384_v36  ;;  %v2733_v17 = vld [vmem:[#allocation15 + $0x50] sm:$0xff] }
 0x304   :  { %v1647_v1 = vpop.f32.mrf.mxu2  ;;  %v1700_v2 = vpop.f32.mrf.mxu3  ;;  %2462 = vmatpush.msra.mxu2 %v2383_v34 }
 0x305   :  { %v1701_v25 = vadd.f32 %v1700_v2, %v1647_v1  ;;  %2237 = vmatmul.f32.vlgmr.msrb.gmra.mxu3 %v1788_v35  ;;  %v5342_v20 = vpop.f32.mrf.mxu0  ;;  %v2445_v2 = vld [vmem:[#allocation12 + $0x5f0] sm:$0xff] }
 0x306   :  { %2494 = vmatpush.msra.mxu3 %v2445_v2  ;;  %v2429_v2 = vld [vmem:[#allocation12 + $0x570] sm:$0xff] }
 0x307   :  { %v1736_v31 = vadd.f32 %v1701_v25, %v1400_v47  ;;  %v2441_v25 = vld [vmem:[#allocation12 + $0x5d0] sm:$0xff] }
 0x308   :  { %2299 = vmatmul.f32.gmra.mxu0 %v5138_v27  ;;  %2495 = vmatpush.msra.mxu3 %v2443_v62 }
 0x309   :  { %v1766_v58 = vadd.f32 %v5314_v16, %v1736_v31  ;;  %2208 = vmatmul.f32.gmra.mxu2 %v5149_v63  ;;  %v1409_v31 = vadd.f32 %v5238_v18, %v5241_v29  ;;  %v1981_v18 = vld [vmem:[#allocation12 + $0x3d8] sm:$0xff]  ;;  %v2433_v29 = vld [vmem:[#allocation12 + $0x590] sm:$0xff] }
 0x30a   :  { %2496 = vmatpush.msra.mxu3 %v2441_v25  ;;  %v2427_v25 = vld [vmem:[#allocation12 + $0x560] sm:$0xff] }
 0x30b   :  { %v5333_v42 = vmax.f32 %v1766_v58, 0.0  ;;  %v1985_v58 = vld [vmem:[#allocation12 + $0x3f8] sm:$0xff] }
 0x30c   :  { %v1650_v49 = vpop.f32.mrf.mxu2  ;;  %v1703_v53 = vpop.f32.mrf.mxu3  ;;  %2497 = vmatpush.msra.mxu3 %v2439_v54  ;;  %2127 = vmatpush.msrb.mxu1 %v1985_v58  ;;  %v1415_v58 = vadd.f32 %v5258_v5, %v5262_v52  ;;  %v2419_v5 = vld [vmem:[#allocation12 + $0x520] sm:$0xff] }
 0x30d   :  { %v1704_v11 = vadd.f32 %v1703_v53, %v1650_v49  ;;  %2049 = vmatmul.f32.vlgmr.msra.gmra.mxu1 %v5333_v42  ;;  %2240 = vmatmul.f32.gmra.mxu3 %v5333_v42  ;;  %v5357_v34 = vpop.f32.mrf.mxu0  ;;  %v1983_v53 = vld [vmem:[#allocation12 + $0x3e8] sm:$0xff] }
 0x30e   :  { %2498 = vmatpush.msra.mxu3 %v2437_v55  ;;  %2128 = vmatpush.msrb.mxu1 %v1983_v53  ;;  %v1969_v53 = vld [vmem:[#allocation12 + $0x378] sm:$0xff] }
 0x30f   :  { %v1738_v0 = vadd.f32 %v1704_v11, %v1403_v22 }
 0x310   :  { %2302 = vmatmul.f32.gmra.mxu0 %v5149_v63  ;;  %2499 = vmatpush.msra.mxu3 %v2435_v21 }
 0x311   :  { %v1768_v4 = vadd.f32 %v5314_v16, %v1738_v0  ;;  %2211 = vmatmul.f32.gmra.mxu2 %v5160_v39  ;;  %2129 = vmatpush.msrb.mxu1 %v1981_v18  ;;  %v1967_v18 = vld [vmem:[#allocation12 + $0x368] sm:$0xff] }
 0x312   :  { %2500 = vmatpush.msra.mxu3 %v2433_v29 }
 0x313   :  { %v5344_v40 = vmax.f32 %v1768_v4, 0.0  ;;  %v1979_v4 = vld [vmem:[#allocation12 + $0x3c8] sm:$0xff] }
 0x314   :  { %v1653_v41 = vpop.f32.mrf.mxu2  ;;  %v1706_v19 = vpop.f32.mrf.mxu3  ;;  %2130 = vmatpush.msrb.mxu1 %v1979_v4  ;;  %v2417_v4 = vld [vmem:[#allocation12 + $0x510] sm:$0xff] }
 0x315   :  { %v1707_v1 = vadd.f32 %v1706_v19, %v1653_v41  ;;  %2052 = vmatmul.f32.gmra.mxu1 %v5344_v40  ;;  %2243 = vmatmul.f32.gmra.mxu3 %v5344_v40  ;;  %v2431_v41 = vld [vmem:[#allocation12 + $0x580] sm:$0xff]  ;;  %v1412_v19 = vadd.f32 %v5246_v50, %v5249_v44  ;;  %v1973_v50 = vld [vmem:[#allocation12 + $0x398] sm:$0xff] }
 0x316   :  { %2501 = vmatpush.msra.mxu3 %v2431_v41 }
 0x317   :  { %v1740_v43 = vadd.f32 %v1707_v1, %v1406_v24  ;;  %v1977_v1 = vld [vmem:[#allocation12 + $0x3b8] sm:$0xff] }
 0x318   :  { %2305 = vmatmul.f32.gmra.mxu0 %v5160_v39  ;;  %2131 = vmatpush.msrb.mxu1 %v1977_v1  ;;  %v1963_v1 = vld [vmem:[#allocation12 + $0x348] sm:$0xff] }
 0x319   :  { %v1770_v47 = vadd.f32 %v5314_v16, %v1740_v43  ;;  %2214 = vmatmul.f32.gmra.mxu2 %v5171_v28  ;;  %v5370_v43 = vpop.f32.mrf.mxu0  ;;  %2502 = vmatpush.msra.mxu3 %v2429_v2  ;;  %v2415_v2 = vld [vmem:[#allocation12 + $0x500] sm:$0xff] }
 0x31b   :  { %v5353_v23 = vmax.f32 %v1770_v47, 0.0  ;;  %v1975_v47 = vld [vmem:[#allocation12 + $0x3a8] sm:$0xff]  ;;  %2503 = vmatpush.msra.mxu3 %v2427_v25 }
 0x31c   :  { %v1656_v7 = vpop.f32.mrf.mxu2  ;;  %v1709_v26 = vpop.f32.mrf.mxu3  ;;  %2132 = vmatpush.msrb.mxu1 %v1975_v47  ;;  %v1961_v47 = vld [vmem:[#allocation12 + $0x338] sm:$0xff] }
 0x31d   :  { %v1710_v61 = vadd.f32 %v1709_v26, %v1656_v7  ;;  %2055 = vmatmul.f32.gmra.mxu1 %v5353_v23  ;;  %2246 = vmatmul.f32.gmra.mxu3 %v5353_v23  ;;  %v2425_v26 = vld [vmem:[#allocation12 + $0x550] sm:$0xff] }
 0x31e   :  { %2133 = vmatpush.msrb.mxu1 %v1973_v50  ;;  %2504 = vmatpush.msra.mxu3 %v2425_v26  ;;  %v1957_v50 = vld [vmem:[#allocation12 + $0x318] sm:$0xff] }
 0x31f   :  { %v1742_v49 = vadd.f32 %v1710_v61, %v1409_v31  ;;  %v1971_v61 = vld [vmem:[#allocation12 + $0x388] sm:$0xff] }
 0x320   :  { %2308 = vmatmul.f32.gmra.mxu0 %v5171_v28  ;;  %2134 = vmatpush.msrb.mxu1 %v1971_v61  ;;  %v1955_v61 = vld [vmem:[#allocation12 + $0x308] sm:$0xff] }
 0x321   :  { %v1772_v22 = vadd.f32 %v5314_v16, %v1742_v49  ;;  %2217 = vmatmul.f32.gmra.mxu2 %v5182_v10  ;;  %v2423_v49 = vld [vmem:[#allocation12 + $0x540] sm:$0xff]  ;;  %v5382_v29 = vpop.f32.mrf.mxu0 }
 0x322   :  { %2505 = vmatpush.msra.mxu3 %v2423_v49  ;;  %2135 = vmatpush.msrb.mxu1 %v1969_v53 }
 0x323   :  { %v5364_v11 = vmax.f32 %v1772_v22, 0.0  ;;  %v2421_v22 = vld [vmem:[#allocation12 + $0x530] sm:$0xff] }
 0x324   :  { %v1659_v36 = vpop.f32.mrf.mxu2  ;;  %v1712_v0 = vpop.f32.mrf.mxu3  ;;  %2506 = vmatpush.msra.mxu3 %v2421_v22  ;;  %2136 = vmatpush.msrb.mxu1 %v1967_v18 }
 0x325   :  { %v1713_v24 = vadd.f32 %v1712_v0, %v1659_v36  ;;  %2058 = vmatmul.f32.gmra.mxu1 %v5364_v11  ;;  %2249 = vmatmul.f32.gmra.mxu3 %v5364_v11  ;;  %v1965_v0 = vld [vmem:[#allocation12 + $0x358] sm:$0xff] }
 0x326   :  { %2507 = vmatpush.msra.mxu3 %v2419_v5  ;;  %2137 = vmatpush.msrb.mxu1 %v1965_v0 }
 0x327   :  { %v1744_v62 = vadd.f32 %v1713_v24, %v1412_v19 }
 0x328   :  { %2311 = vmatmul.f32.gmra.mxu0 %v5182_v10  ;;  %2508 = vmatpush.msra.mxu3 %v2417_v4 }
 0x329   :  { %v1774_v7 = vadd.f32 %v5314_v16, %v1744_v62  ;;  %2463 = vmatmul.f32.vlgmr.msra.gmra.mxu2 %v5105_v37  ;;  %2138 = vmatpush.msrb.mxu1 %v1963_v1 }
 0x32a   :  { %2509 = vmatpush.msra.mxu3 %v2415_v2 }
 0x32b   :  { %v5375_v44 = vmax.f32 %v1774_v7, 0.0  ;;  %2139 = vmatpush.msrb.mxu1 %v1961_v47 }
 0x32c   :  { %v1662_v54 = vpop.f32.mrf.mxu2  ;;  %v1715_v31 = vpop.f32.mrf.mxu3 }
 0x32d   :  { %v1716_v55 = vadd.f32 %v1715_v31, %v1662_v54  ;;  %2061 = vmatmul.f32.gmra.mxu1 %v5375_v44  ;;  %2252 = vmatmul.f32.gmra.mxu3 %v5375_v44  ;;  %v1421_v31 = vadd.f32 %v5278_v8, %v5281_v6  ;;  %v1424_v8 = vadd.f32 %v5286_v60, %v5289_v32 }
 0x32e   :  { %v1427_v60 = vadd.f32 %v5295_v56, %v5298_v46 }
 0x32f   :  { %v1746_v21 = vadd.f32 %v1716_v55, %v1415_v58 }
 0x330   :  { %2557 = vmatmul.f32.vlgmr.msrb.gmra.mxu0 %v5105_v37  ;;  %v1418_v37 = vadd.f32 %v5270_v38, %v5273_v57  ;;  %v1959_v38 = vld [vmem:[#allocation12 + $0x328] sm:$0xff]  ;;  %v5395_v57 = vpop.f32.mrf.mxu0 }
 0x331   :  { %v1776_v36 = vadd.f32 %v5314_v16, %v1746_v21  ;;  %2466 = vmatmul.f32.gmra.mxu2 %v5116_v59  ;;  %2140 = vmatpush.msrb.mxu1 %v1959_v38 }
 0x333   :  { %v5386_v52 = vmax.f32 %v1776_v36, 0.0  ;;  %2141 = vmatpush.msrb.mxu1 %v1957_v50 }
 0x334   :  { %v1665_v41 = vpop.f32.mrf.mxu2  ;;  %v1718_v19 = vpop.f32.mrf.mxu3 }
 0x335   :  { %v1719_v24 = vadd.f32 %v1718_v19, %v1665_v41  ;;  %2064 = vmatmul.f32.gmra.mxu1 %v5386_v52  ;;  %2255 = vmatmul.f32.gmra.mxu3 %v5386_v52 }
 0x336   :  { %2142 = vmatpush.msrb.mxu1 %v1955_v61 }
 0x337   :  { %v1748_v62 = vadd.f32 %v1719_v24, %v1418_v37  ;;  %v5822_v37 = vld [vmem:[#allocation46_spill] sm:$0xff] }
 0x338   :  { %2560 = vmatmul.f32.gmra.mxu0 %v5116_v59  ;;  %v5412_v22 = vpop.f32.mrf.mxu0  ;;  %v5823_v24 = vld [vmem:[#allocation42_spill] sm:$0xff] }
 0x339   :  { %v1778_v25 = vadd.f32 %v5314_v16, %v1748_v62  ;;  %2469 = vmatmul.f32.gmra.mxu2 %v5127_v12  ;;  %v1271_v1 = vadd.f32 %v5823_v24, %v5822_v37  ;;  %v5824_v62 = vld [vmem:[#allocation43_spill] sm:$0xff] }
 0x33a   :  { %v1888_v37 = vld [vmem:[#allocation12 + $0x108] sm:$0xff]  ;;  %v2772_v24 = vld [vmem:[#allocation15 + $0x170] sm:$0xff] }
 0x33b   :  { %v5397_v7 = vmax.f32 %v1778_v25, 0.0  ;;  %v1324_v47 = vadd.f32 %v5824_v62, %v1271_v1  ;;  %v2771_v1 = vld [vmem:[#allocation15 + $0x168] sm:$0xff] }
 0x33c   :  { %v1668_v26 = vpop.f32.mrf.mxu2  ;;  %v1721_v54 = vpop.f32.mrf.mxu3 }
 0x33d   :  { %v1722_v59 = vadd.f32 %v1721_v54, %v1668_v26  ;;  %2067 = vmatmul.f32.gmra.mxu1 %v5397_v7  ;;  %2258 = vmatmul.f32.gmra.mxu3 %v5397_v7 }
 0x33f   :  { %v1750_v58 = vadd.f32 %v1722_v59, %v1421_v31  ;;  %v1916_v31 = vld [vmem:[#allocation12 + $0x1e8] sm:$0xff] }
 0x340   :  { %2563 = vmatmul.f32.gmra.mxu0 %v5127_v12  ;;  %v5423_v41 = vpop.f32.mrf.mxu0  ;;  %v1912_v59 = vld [vmem:[#allocation12 + $0x1c8] sm:$0xff] }
 0x341   :  { %v1780_v55 = vadd.f32 %v5314_v16, %v1750_v58  ;;  %2472 = vmatmul.f32.gmra.mxu2 %v5138_v27  ;;  %v1908_v58 = vld [vmem:[#allocation12 + $0x1a8] sm:$0xff] }
 0x343   :  { %v5406_v49 = vmax.f32 %v1780_v55, 0.0 }
 0x344   :  { %v1671_v53 = vpop.f32.mrf.mxu2  ;;  %v1724_v21 = vpop.f32.mrf.mxu3 }
 0x345   :  { %v1725_v6 = vadd.f32 %v1724_v21, %v1671_v53  ;;  %2070 = vmatmul.f32.gmra.mxu1 %v5406_v49  ;;  %2261 = vmatmul.f32.gmra.mxu3 %v5406_v49  ;;  %v1904_v53 = vld [vmem:[#allocation12 + $0x188] sm:$0xff]  ;;  %v1902_v21 = vld [vmem:[#allocation12 + $0x178] sm:$0xff] }
 0x347   :  { %v1752_v12 = vadd.f32 %v1725_v6, %v1424_v8  ;;  %v1900_v6 = vld [vmem:[#allocation12 + $0x168] sm:$0xff] }
 0x348   :  { %2566 = vmatmul.f32.gmra.mxu0 %v5138_v27  ;;  %v5434_v56 = vpop.f32.mrf.mxu0 }
 0x349   :  { %v1782_v18 = vadd.f32 %v5314_v16, %v1752_v12  ;;  %2475 = vmatmul.f32.gmra.mxu2 %v5149_v63  ;;  %v1898_v12 = vld [vmem:[#allocation12 + $0x158] sm:$0xff] }
 0x34b   :  { %v5417_v36 = vmax.f32 %v1782_v18, 0.0 }
 0x34c   :  { %v1674_v5 = vpop.f32.mrf.mxu2  ;;  %v1727_v0 = vpop.f32.mrf.mxu3 }
 0x34d   :  { %v1728_v32 = vadd.f32 %v1727_v0, %v1674_v5  ;;  %2073 = vmatmul.f32.gmra.mxu1 %v5417_v36  ;;  %2264 = vmatmul.f32.gmra.mxu3 %v5417_v36  ;;  %v1896_v5 = vld [vmem:[#allocation12 + $0x148] sm:$0xff]  ;;  %v1894_v0 = vld [vmem:[#allocation12 + $0x138] sm:$0xff] }
 0x34f   :  { %v1754_v4 = vadd.f32 %v1728_v32, %v1427_v60  ;;  %v1892_v32 = vld [vmem:[#allocation12 + $0x128] sm:$0xff] }
 0x350   :  { %2569 = vmatmul.f32.gmra.mxu0 %v5149_v63  ;;  %v1624_v63 = vpop.f32.mrf.mxu1  ;;  %v5445_v2 = vpop.f32.mrf.mxu0 }
 0x351   :  { %v1784_v27 = vadd.f32 %v5314_v16, %v1754_v4  ;;  %2478 = vmatmul.f32.gmra.mxu2 %v5160_v39 }
 0x353   :  { %v5428_v19 = vmax.f32 %v1784_v27, 0.0  ;;  %v1890_v27 = vld [vmem:[#allocation12 + $0x118] sm:$0xff] }
 0x354   :  { %v5436_v46 = vpop.f32.mrf.mxu2  ;;  %v1730_v8 = vpop.f32.mrf.mxu3 }
 0x355   :  { %2076 = vmatmul.f32.gmra.mxu1 %v5428_v19  ;;  %2510 = vmatmul.f32.vlgmr.msra.gmra.mxu3 %v5344_v40  ;;  %v1731_v62 = vadd.f32 %v1730_v8, %v5436_v46  ;;  %v2963_v8 = vld [vmem:[#allocation15 + $0x370] sm:$0xff] }
 0x358   :  { %2572 = vmatmul.f32.gmra.mxu0 %v5160_v39  ;;  %v1625_v39 = vadd.f32 %v1624_v63, %v5276_v13  ;;  %v1918_v13 = vld [vmem:[#allocation12 + $0x1f8] sm:$0xff]  ;;  %v5457_v50 = vpop.f32.mrf.mxu0 }
 0x359   :  { %2481 = vmatmul.f32.gmra.mxu2 %v5171_v28  ;;  %2315 = vmatpush.msra.mxu1 %v1918_v13  ;;  %v2773_v63 = vld [vmem:[#allocation15 + $0x178] sm:$0xff] }
 0x35a   :  { %v1755_v38 = vadd.f32 %v1625_v39, %v1324_v47  ;;  %2790 = vmatpush.msrb.mxu2 %v2773_v63 }
 0x35b   :  { %2316 = vmatpush.msra.mxu1 %v1916_v31  ;;  %v2769_v31 = vld [vmem:[#allocation15 + $0x158] sm:$0xff] }
 0x35c   :  { %v5450_v25 = vpop.f32.mrf.mxu2  ;;  %2791 = vmatpush.msrb.mxu2 %v2772_v24  ;;  %v2960_v24 = vld [vmem:[#allocation15 + $0x358] sm:$0xff] }
 0x35d   :  { %2143 = vmatmul.f32.vlgmr.msrb.gmra.mxu1 %v5333_v42  ;;  %2513 = vmatmul.f32.gmra.mxu3 %v5353_v23 }
 0x35e   :  { %2792 = vmatpush.msrb.mxu2 %v2771_v1  ;;  %v2760_v1 = vld [vmem:[#allocation15 + $0x110] sm:$0xff] }
 0x360   :  { %2575 = vmatmul.f32.gmra.mxu0 %v5171_v28  ;;  %v1785_v28 = vadd.f32 %v5087_v3, %v1755_v38  ;;  %v1910_v3 = vld [vmem:[#allocation12 + $0x1b8] sm:$0xff]  ;;  %v5464_v61 = vpop.f32.mrf.mxu0  ;;  %v2770_v38 = vld [vmem:[#allocation15 + $0x160] sm:$0xff] }
 0x361   :  { %2484 = vmatmul.f32.gmra.mxu2 %v5182_v10 }
 0x362   :  { %v1809_v26 = vmax.f32 %v1785_v28, 0.0  ;;  %v1430_v28 = vadd.f32 %v5302_v33, %v5307_v48  ;;  %2793 = vmatpush.msrb.mxu2 %v2770_v38  ;;  %v2766_v33 = vld [vmem:[#allocation15 + $0x140] sm:$0xff]  ;;  %v2759_v38 = vld [vmem:[#allocation15 + $0x108] sm:$0xff] }
 0x364   :  { %v5459_v54 = vpop.f32.mrf.mxu2  ;;  %2794 = vmatpush.msrb.mxu2 %v2769_v31  ;;  %v2758_v31 = vld [vmem:[#allocation15 + $0x100] sm:$0xff] }
 0x365   :  { %2146 = vmatmul.f32.gmra.mxu1 %v5344_v40  ;;  %2516 = vmatmul.f32.gmra.mxu3 %v5364_v11 }
 0x368   :  { %2578 = vmatmul.f32.gmra.mxu0 %v5182_v10  ;;  %v1914_v10 = vld [vmem:[#allocation12 + $0x1d8] sm:$0xff] }
 0x369   :  { %2487 = vmatmul.f32.gmra.mxu2 %v5191_v15  ;;  %2317 = vmatpush.msra.mxu1 %v1914_v10  ;;  %v2768_v10 = vld [vmem:[#allocation15 + $0x150] sm:$0xff] }
 0x36a   :  { %2795 = vmatpush.msrb.mxu2 %v2768_v10  ;;  %v2957_v10 = vld [vmem:[#allocation15 + $0x340] sm:$0xff] }
 0x36b   :  { %2318 = vmatpush.msra.mxu1 %v1912_v59  ;;  %v2767_v59 = vld [vmem:[#allocation15 + $0x148] sm:$0xff] }
 0x36c   :  { %v5466_v55 = vpop.f32.mrf.mxu2  ;;  %2796 = vmatpush.msrb.mxu2 %v2767_v59 }
 0x36d   :  { %2149 = vmatmul.f32.gmra.mxu1 %v5353_v23  ;;  %2519 = vmatmul.f32.gmra.mxu3 %v5375_v44 }
 0x36e   :  { %2319 = vmatpush.msra.mxu1 %v1910_v3  ;;  %2797 = vmatpush.msrb.mxu2 %v2766_v33  ;;  %v2738_v33 = vld [vmem:[#allocation15 + $0x78] sm:$0xff] }
 0x370   :  { %2581 = vmatmul.f32.gmra.mxu0 %v5191_v15  ;;  %2320 = vmatpush.msra.mxu1 %v1908_v58  ;;  %v1906_v15 = vld [vmem:[#allocation12 + $0x198] sm:$0xff] }
 0x371   :  { %2490 = vmatmul.f32.gmra.mxu2 %v1809_v26 }
 0x372   :  { %2321 = vmatpush.msra.mxu1 %v1906_v15 }
 0x374   :  { %2322 = vmatpush.msra.mxu1 %v1904_v53  ;;  %v5470_v18 = vpop.f32.mrf.mxu2  ;;  %v2765_v53 = vld [vmem:[#allocation15 + $0x138] sm:$0xff] }
 0x375   :  { %2152 = vmatmul.f32.gmra.mxu1 %v5364_v11  ;;  %2522 = vmatmul.f32.gmra.mxu3 %v5386_v52 }
 0x376   :  { %2323 = vmatpush.msra.mxu1 %v1902_v21  ;;  %v2964_v21 = vld [vmem:[#allocation15 + $0x378] sm:$0xff]  ;;  %2798 = vmatpush.msrb.mxu2 %v2765_v53 }
 0x377   :  { %2981 = vmatpush.msra.mxu0 %v2964_v21  ;;  %v2956_v53 = vld [vmem:[#allocation15 + $0x338] sm:$0xff] }
 0x378   :  { %2584 = vmatmul.f32.gmra.mxu0 %v1809_v26  ;;  %2324 = vmatpush.msra.mxu1 %v1900_v6  ;;  %v1756_v26 = vadd.f32 %v1731_v62, %v1430_v28  ;;  %v2763_v6 = vld [vmem:[#allocation15 + $0x128] sm:$0xff]  ;;  %v2959_v62 = vld [vmem:[#allocation15 + $0x350] sm:$0xff] }
 0x379   :  { %2982 = vmatpush.msra.mxu0 %v2963_v8  ;;  %v2958_v28 = vld [vmem:[#allocation15 + $0x348] sm:$0xff]  ;;  %v2955_v8 = vld [vmem:[#allocation15 + $0x330] sm:$0xff] }
 0x37a   :  { %2325 = vmatpush.msra.mxu1 %v1898_v12  ;;  %v5492_v46 = vadd.f32 %v5314_v16, %v1756_v26  ;;  %v2764_v16 = vld [vmem:[#allocation15 + $0x130] sm:$0xff]  ;;  %v2962_v12 = vld [vmem:[#allocation15 + $0x368] sm:$0xff] }
 0x37b   :  { %2799 = vmatpush.msrb.mxu2 %v2764_v16  ;;  %2983 = vmatpush.msra.mxu0 %v2962_v12  ;;  %v2737_v16 = vld [vmem:[#allocation15 + $0x70] sm:$0xff]  ;;  %v2954_v12 = vld [vmem:[#allocation15 + $0x328] sm:$0xff] }
 0x37c   :  { %2326 = vmatpush.msra.mxu1 %v1896_v5  ;;  %v5480_v39 = vpop.f32.mrf.mxu2  ;;  %v1810_v15 = vmax.f32 %v5492_v46, 0.0 }
 0x37d   :  { %2155 = vmatmul.f32.gmra.mxu1 %v5375_v44  ;;  %2525 = vmatmul.f32.gmra.mxu3 %v5397_v7 }
 0x37e   :  { %2327 = vmatpush.msra.mxu1 %v1894_v0  ;;  %2800 = vmatpush.msrb.mxu2 %v2763_v6  ;;  %v2762_v0 = vld [vmem:[#allocation15 + $0x120] sm:$0xff]  ;;  %v2736_v6 = vld [vmem:[#allocation15 + $0x68] sm:$0xff] }
 0x380   :  { %2328 = vmatpush.msra.mxu1 %v1892_v32  ;;  %v2961_v32 = vld [vmem:[#allocation15 + $0x360] sm:$0xff]  ;;  %2801 = vmatpush.msrb.mxu2 %v2762_v0 }
 0x381   :  { %2984 = vmatpush.msra.mxu0 %v2961_v32  ;;  %v2735_v32 = vld [vmem:[#allocation15 + $0x60] sm:$0xff] }
 0x382   :  { %2329 = vmatpush.msra.mxu1 %v1890_v27 }
 0x383   :  { %2985 = vmatpush.msra.mxu0 %v2960_v24 }
 0x384   :  { %2330 = vmatpush.msra.mxu1 %v1888_v37  ;;  %v5494_v3 = vpop.f32.mrf.mxu2  ;;  %v2761_v37 = vld [vmem:[#allocation15 + $0x118] sm:$0xff] }
 0x385   :  { %2158 = vmatmul.f32.gmra.mxu1 %v5386_v52  ;;  %2528 = vmatmul.f32.gmra.mxu3 %v5406_v49 }
 0x386   :  { %2802 = vmatpush.msrb.mxu2 %v2761_v37  ;;  %2986 = vmatpush.msra.mxu0 %v2959_v62  ;;  %v2953_v37 = vld [vmem:[#allocation15 + $0x320] sm:$0xff]  ;;  %v2952_v62 = vld [vmem:[#allocation15 + $0x318] sm:$0xff] }
 0x388   :  { %v5474_v60 = vpop.f32.mrf.mxu3  ;;  %2803 = vmatpush.msrb.mxu2 %v2760_v1  ;;  %2987 = vmatpush.msra.mxu0 %v2958_v28  ;;  %v2734_v1 = vld [vmem:[#allocation15 + $0x58] sm:$0xff]  ;;  %v2950_v28 = vld [vmem:[#allocation15 + $0x308] sm:$0xff] }
 0x38a   :  { %v5476_v4 = vpop.f32.mrf.mxu1  ;;  %2804 = vmatpush.msrb.mxu2 %v2759_v38  ;;  %2988 = vmatpush.msra.mxu0 %v2957_v10  ;;  %v2732_v38 = vld [vmem:[#allocation15 + $0x48] sm:$0xff] }
 0x38c   :  { %v5506_v27 = vpop.f32.mrf.mxu2  ;;  %2805 = vmatpush.msrb.mxu2 %v2758_v31  ;;  %2989 = vmatpush.msra.mxu0 %v2956_v53  ;;  %v2949_v53 = vld [vmem:[#allocation15 + $0x300] sm:$0xff] }
 0x38d   :  { %2161 = vmatmul.f32.gmra.mxu1 %v5397_v7  ;;  %2531 = vmatmul.f32.gmra.mxu3 %v5417_v36 }
 0x38e   :  { %2830 = vmatpush.msra.mxu2 %v2738_v33  ;;  %2990 = vmatpush.msra.mxu0 %v2955_v8  ;;  %v2731_v33 = vld [vmem:[#allocation15 + $0x40] sm:$0xff]  ;;  %v2730_v8 = vld [vmem:[#allocation15 + $0x38] sm:$0xff] }
 0x390   :  { %v5483_v47 = vpop.f32.mrf.mxu3  ;;  %2831 = vmatpush.msra.mxu2 %v2737_v16  ;;  %2991 = vmatpush.msra.mxu0 %v2954_v12 }
 0x392   :  { %v5487_v13 = vpop.f32.mrf.mxu1  ;;  %2832 = vmatpush.msra.mxu2 %v2736_v6  ;;  %2992 = vmatpush.msra.mxu0 %v2953_v37  ;;  %v3116_v6 = vld [vmem:[#allocation15 + $0x578] sm:$0xff] }
 0x394   :  { %v5515_v21 = vpop.f32.mrf.mxu2  ;;  %2833 = vmatpush.msra.mxu2 %v2735_v32  ;;  %2993 = vmatpush.msra.mxu0 %v2952_v62  ;;  %v3115_v32 = vld [vmem:[#allocation15 + $0x570] sm:$0xff]  ;;  %v2728_v62 = vld [vmem:[#allocation15 + $0x28] sm:$0xff] }
 0x395   :  { %2164 = vmatmul.f32.gmra.mxu1 %v5406_v49  ;;  %2534 = vmatmul.f32.gmra.mxu3 %v5428_v19 }
 0x396   :  { %2834 = vmatpush.msra.mxu2 %v2734_v1  ;;  %v2446_v1 = vld [vmem:[#allocation12 + $0x5f8] sm:$0xff] }
 0x397   :  { %2588 = vmatpush.msrb.mxu1 %v2446_v1  ;;  %v2438_v1 = vld [vmem:[#allocation12 + $0x5b8] sm:$0xff] }
 0x398   :  { %v5496_v58 = vpop.f32.mrf.mxu3  ;;  %2835 = vmatpush.msra.mxu2 %v2733_v17  ;;  %v3114_v17 = vld [vmem:[#allocation15 + $0x568] sm:$0xff] }
 0x39a   :  { %v5498_v48 = vpop.f32.mrf.mxu1  ;;  %2836 = vmatpush.msra.mxu2 %v2732_v38 }
 0x39c   :  { %v5524_v31 = vpop.f32.mrf.mxu2  ;;  %2837 = vmatpush.msra.mxu2 %v2731_v33  ;;  %v2727_v33 = vld [vmem:[#allocation15 + $0x20] sm:$0xff] }
 0x39d   :  { %2167 = vmatmul.f32.gmra.mxu1 %v5417_v36  ;;  %2537 = vmatmul.f32.gmra.mxu3 %v1810_v15 }
 0x39e   :  { %2838 = vmatpush.msra.mxu2 %v2730_v8  ;;  %v2726_v8 = vld [vmem:[#allocation15 + $0x18] sm:$0xff] }
 0x3a0   :  { %v5504_v5 = vpop.f32.mrf.mxu3 }
 0x3a2   :  { %v5508_v63 = vpop.f32.mrf.mxu1 }
 0x3a4   :  { %v5531_v38 = vpop.f32.mrf.mxu2 }
 0x3a5   :  { %2170 = vmatmul.f32.gmra.mxu1 %v5428_v19 }
 0x3a8   :  { %v5511_v26 = vpop.f32.mrf.mxu3 }
 0x3aa   :  { %v5513_v59 = vpop.f32.mrf.mxu1 }
 0x3ad   :  { %2331 = vmatmul.f32.vlgmr.msra.gmra.mxu1 %v1788_v35  ;;  %v2951_v35 = vld [vmem:[#allocation15 + $0x310] sm:$0xff] }
 0x3ae   :  { %2994 = vmatpush.msra.mxu0 %v2951_v35 }
 0x3b0   :  { %v5519_v0 = vpop.f32.mrf.mxu3  ;;  %2995 = vmatpush.msra.mxu0 %v2950_v28  ;;  %v2444_v28 = vld [vmem:[#allocation12 + $0x5e8] sm:$0xff] }
 0x3b1   :  { %2589 = vmatpush.msrb.mxu1 %v2444_v28 }
 0x3b2   :  { %v5521_v24 = vpop.f32.mrf.mxu1  ;;  %2996 = vmatpush.msra.mxu0 %v2949_v53  ;;  %v3113_v53 = vld [vmem:[#allocation15 + $0x560] sm:$0xff] }
 0x3b4   :  { %3133 = vmatpush.msrb.mxu0 %v3116_v6  ;;  %v3112_v6 = vld [vmem:[#allocation15 + $0x558] sm:$0xff] }
 0x3b5   :  { %2334 = vmatmul.f32.gmra.mxu1 %v5333_v42  ;;  %v2729_v42 = vld [vmem:[#allocation15 + $0x30] sm:$0xff] }
 0x3b6   :  { %2839 = vmatpush.msra.mxu2 %v2729_v42  ;;  %3134 = vmatpush.msrb.mxu0 %v3115_v32  ;;  %v2725_v42 = vld [vmem:[#allocation15 + $0x10] sm:$0xff] }
 0x3b7   :  { %v3111_v32 = vld [vmem:[#allocation15 + $0x550] sm:$0xff] }
 0x3b8   :  { %v2256_v10 = vpop.f32.mrf.mxu3  ;;  %2840 = vmatpush.msra.mxu2 %v2728_v62  ;;  %3135 = vmatpush.msrb.mxu0 %v3114_v17  ;;  %v2724_v62 = vld [vmem:[#allocation15 + $0x8] sm:$0xff] }
 0x3b9   :  { %v3110_v17 = vld [vmem:[#allocation15 + $0x548] sm:$0xff] }
 0x3ba   :  { %v2068_v16 = vpop.f32.mrf.mxu1  ;;  %2841 = vmatpush.msra.mxu2 %v2727_v33  ;;  %3136 = vmatpush.msrb.mxu0 %v3113_v53  ;;  %v2436_v33 = vld [vmem:[#allocation12 + $0x5a8] sm:$0xff] }
 0x3bb   :  { %v2069_v12 = vadd.f32 %v2068_v16, %v5357_v34  ;;  %v2442_v16 = vld [vmem:[#allocation12 + $0x5d8] sm:$0xff]  ;;  %v2723_v53 = vld [vmem:[#allocation15] sm:$0xff] }
 0x3bc   :  { %2590 = vmatpush.msrb.mxu1 %v2442_v16  ;;  %2842 = vmatpush.msra.mxu2 %v2726_v8  ;;  %v5538_v16 = vpop.f32.mrf.mxu2  ;;  %v2434_v8 = vld [vmem:[#allocation12 + $0x598] sm:$0xff] }
 0x3bd   :  { %v2210_v37 = vadd.f32 %v5506_v27, %v2069_v12  ;;  %2337 = vmatmul.f32.gmra.mxu1 %v5344_v40  ;;  %3137 = vmatpush.msrb.mxu0 %v3112_v6  ;;  %v3108_v6 = vld [vmem:[#allocation15 + $0x538] sm:$0xff] }
 0x3be   :  { %2843 = vmatpush.msra.mxu2 %v2725_v42 }
 0x3bf   :  { %v5529_v35 = vadd.f32 %v2256_v10, %v2210_v37  ;;  %v2440_v10 = vld [vmem:[#allocation12 + $0x5c8] sm:$0xff]  ;;  %3138 = vmatpush.msrb.mxu0 %v3111_v32  ;;  %v2430_v32 = vld [vmem:[#allocation12 + $0x578] sm:$0xff] }
 0x3c0   :  { %v2259_v34 = vpop.f32.mrf.mxu3  ;;  %2591 = vmatpush.msrb.mxu1 %v2440_v10  ;;  %2844 = vmatpush.msra.mxu2 %v2724_v62  ;;  %v3107_v10 = vld [vmem:[#allocation15 + $0x530] sm:$0xff] }
 0x3c1   :  { %3139 = vmatpush.msrb.mxu0 %v3110_v17  ;;  %v2428_v17 = vld [vmem:[#allocation12 + $0x568] sm:$0xff] }
 0x3c2   :  { %v2071_v27 = vpop.f32.mrf.mxu1  ;;  %2592 = vmatpush.msrb.mxu1 %v2438_v1  ;;  %2845 = vmatpush.msra.mxu2 %v2723_v53  ;;  %v2426_v53 = vld [vmem:[#allocation12 + $0x558] sm:$0xff] }
 0x3c3   :  { %v2072_v12 = vadd.f32 %v2071_v27, %v5370_v43  ;;  %v3109_v27 = vld [vmem:[#allocation15 + $0x540] sm:$0xff] }
 0x3c4   :  { %2593 = vmatpush.msrb.mxu1 %v2436_v33  ;;  %3140 = vmatpush.msrb.mxu0 %v3109_v27  ;;  %v3105_v33 = vld [vmem:[#allocation15 + $0x520] sm:$0xff]  ;;  %v3104_v27 = vld [vmem:[#allocation15 + $0x518] sm:$0xff] }
 0x3c5   :  { %v2213_v37 = vadd.f32 %v5515_v21, %v2072_v12  ;;  %2340 = vmatmul.f32.gmra.mxu1 %v5353_v23 }
 0x3c6   :  { %2594 = vmatpush.msrb.mxu1 %v2434_v8  ;;  %3141 = vmatpush.msrb.mxu0 %v3108_v6  ;;  %v2424_v8 = vld [vmem:[#allocation12 + $0x548] sm:$0xff]  ;;  %v3103_v6 = vld [vmem:[#allocation15 + $0x510] sm:$0xff] }
 0x3c7   :  { %v5536_v28 = vadd.f32 %v2259_v34, %v2213_v37  ;;  %v2432_v34 = vld [vmem:[#allocation12 + $0x588] sm:$0xff] }
 0x3c8   :  { %v2262_v43 = vpop.f32.mrf.mxu3  ;;  %2595 = vmatpush.msrb.mxu1 %v2432_v34  ;;  %3142 = vmatpush.msrb.mxu0 %v3107_v10  ;;  %v3106_v37 = vld [vmem:[#allocation15 + $0x528] sm:$0xff] }
 0x3c9   :  { %v3102_v34 = vld [vmem:[#allocation15 + $0x508] sm:$0xff] }
 0x3ca   :  { %v2074_v21 = vpop.f32.mrf.mxu1  ;;  %2596 = vmatpush.msrb.mxu1 %v2430_v32  ;;  %3143 = vmatpush.msrb.mxu0 %v3106_v37  ;;  %v2420_v32 = vld [vmem:[#allocation12 + $0x528] sm:$0xff]  ;;  %v2054_v37 = vadd.f32 %v5487_v13, %v5293_v14  ;;  %v5562_v14 = vld [vmem:[#allocation13] sm:$0x3] }
 0x3cb   :  { %v2075_v12 = vadd.f32 %v2074_v21, %v5382_v29  ;;  %v2467_v21 = vpop.f32.mrf.mxu2 }
 0x3cc   :  { %2597 = vmatpush.msrb.mxu1 %v2428_v17  ;;  %3144 = vmatpush.msrb.mxu0 %v3105_v33  ;;  %v2416_v33 = vld [vmem:[#allocation12 + $0x508] sm:$0xff] }
 0x3cd   :  { %v2216_v42 = vadd.f32 %v5524_v31, %v2075_v12  ;;  %2343 = vmatmul.f32.gmra.mxu1 %v5364_v11  ;;  %v2422_v12 = vld [vmem:[#allocation12 + $0x538] sm:$0xff] }
 0x3ce   :  { %2598 = vmatpush.msrb.mxu1 %v2426_v53  ;;  %3145 = vmatpush.msrb.mxu0 %v3104_v27  ;;  %v5560_v27 = vpop.f32.mrf.mxu0 }
 0x3cf   :  { %v5543_v1 = vadd.f32 %v2262_v43, %v2216_v42 }
 0x3d0   :  { %v2265_v62 = vpop.f32.mrf.mxu3  ;;  %2599 = vmatpush.msrb.mxu1 %v2424_v8  ;;  %3146 = vmatpush.msrb.mxu0 %v3103_v6 }
 0x3d2   :  { %v2077_v29 = vpop.f32.mrf.mxu1  ;;  %2600 = vmatpush.msrb.mxu1 %v2422_v12  ;;  %3147 = vmatpush.msrb.mxu0 %v3102_v34 }
 0x3d3   :  { %v2078_v31 = vadd.f32 %v2077_v29, %v5395_v57  ;;  %v3101_v57 = vld [vmem:[#allocation15 + $0x500] sm:$0xff]  ;;  %v2051_v29 = vadd.f32 %v5476_v4, %v5283_v30  ;;  %v5558_v53 = vpop.f32.mrf.mxu2 }
 0x3d4   :  { %2601 = vmatpush.msrb.mxu1 %v2420_v32  ;;  %3148 = vmatpush.msrb.mxu0 %v3101_v57 }
 0x3d5   :  { %v2219_v43 = vadd.f32 %v5531_v38, %v2078_v31  ;;  %2346 = vmatmul.f32.gmra.mxu1 %v5375_v44  ;;  %v2418_v38 = vld [vmem:[#allocation12 + $0x518] sm:$0xff]  ;;  %v2192_v31 = vadd.f32 %v5450_v25, %v2051_v29 }
 0x3d6   :  { %2602 = vmatpush.msrb.mxu1 %v2418_v38  ;;  %v2888_v25 = vld [vmem:[#allocation15 + $0x278] sm:$0xff] }
 0x3d7   :  { %v5548_v10 = vadd.f32 %v2265_v62, %v2219_v43  ;;  %v2195_v62 = vadd.f32 %v5459_v54, %v2054_v37  ;;  %v5570_v54 = vperm.slane %v5562_v14, 0  ;;  %v2239_v12 = vadd.f32 %v5474_v60, %v2192_v31  ;;  %v2884_v31 = vld [vmem:[#allocation15 + $0x258] sm:$0xff] }
 0x3d8   :  { %v2511_v42 = vpop.f32.mrf.mxu3  ;;  %2603 = vmatpush.msrb.mxu1 %v2416_v33  ;;  %v2886_v33 = vld [vmem:[#allocation15 + $0x268] sm:$0xff] }
 0x3d9   :  { %v2242_v8 = vadd.f32 %v5483_v47, %v2195_v62  ;;  %v2512_v30 = vadd.f32 %v2511_v42, %v5538_v16  ;;  %v2887_v16 = vld [vmem:[#allocation15 + $0x270] sm:$0xff]  ;;  %v5577_v42 = vpop.f32.mrf.mxu0  ;;  %v2885_v62 = vld [vmem:[#allocation15 + $0x260] sm:$0xff] }
 0x3da   :  { %v5552_v17 = vpop.f32.mrf.mxu1 }
 0x3db   :  { %v2635_v32 = vadd.f32 %v2512_v30, %v2239_v12  ;;  %v2473_v37 = vpop.f32.mrf.mxu2 }
 0x3dd   :  { %2349 = vmatmul.f32.gmra.mxu1 %v5386_v52  ;;  %v2661_v60 = vadd.f32 %v5570_v54, %v2635_v32  ;;  %v2057_v32 = vadd.f32 %v5498_v48, %v5304_v9  ;;  %v3267_v9 = vld [vmem:[#allocation15 + $0x770] sm:$0xff] }
 0x3e0   :  { %v2514_v13 = vpop.f32.mrf.mxu3 }
 0x3e1   :  { %v2515_v6 = vadd.f32 %v2514_v13, %v2467_v21  ;;  %v2060_v21 = vadd.f32 %v5508_v63, %v5316_v45  ;;  %v2681_v13 = vmax.f32 %v2661_v60, 0.0  ;;  %v2198_v60 = vadd.f32 %v5466_v55, %v2057_v32 }
 0x3e2   :  { %v5566_v43 = vpop.f32.mrf.mxu1 }
 0x3e3   :  { %v2637_v4 = vadd.f32 %v2515_v6, %v2242_v8  ;;  %v2201_v29 = vadd.f32 %v5470_v18, %v2060_v21  ;;  %v2883_v6 = vld [vmem:[#allocation15 + $0x250] sm:$0xff]  ;;  %v5585_v30 = vpop.f32.mrf.mxu2  ;;  %v2882_v18 = vld [vmem:[#allocation15 + $0x248] sm:$0xff]  ;;  %v3268_v21 = vld [vmem:[#allocation15 + $0x778] sm:$0xff]  ;;  %v2245_v55 = vadd.f32 %v5496_v58, %v2198_v60 }
 0x3e4   :  { %v2873_v60 = vld [vmem:[#allocation15 + $0x200] sm:$0xff] }
 0x3e5   :  { %v2663_v34 = vadd.f32 %v5570_v54, %v2637_v4  ;;  %2352 = vmatmul.f32.gmra.mxu1 %v5397_v7  ;;  %v2248_v63 = vadd.f32 %v5504_v5, %v2201_v29  ;;  %v2881_v5 = vld [vmem:[#allocation15 + $0x240] sm:$0xff]  ;;  %v2879_v29 = vld [vmem:[#allocation15 + $0x230] sm:$0xff] }
 0x3e7   :  { %v2683_v57 = vmax.f32 %v2663_v34, 0.0  ;;  %v5589_v34 = vpop.f32.mrf.mxu0 }
 0x3e8   :  { %v2517_v47 = vpop.f32.mrf.mxu3 }
 0x3e9   :  { %2806 = vmatmul.f32.vlgmr.msrb.gmra.mxu2 %v2683_v57 }
 0x3ea   :  { %2905 = vmatpush.msrb.mxu2 %v2888_v25  ;;  %v5579_v38 = vpop.f32.mrf.mxu1 }
 0x3ec   :  { %2906 = vmatpush.msrb.mxu2 %v2887_v16 }
 0x3ed   :  { %2355 = vmatmul.f32.gmra.mxu1 %v5406_v49 }
 0x3ee   :  { %2907 = vmatpush.msrb.mxu2 %v2886_v33  ;;  %v2066_v33 = vadd.f32 %v5521_v24, %v5342_v20  ;;  %v2877_v20 = vld [vmem:[#allocation15 + $0x220] sm:$0xff] }
 0x3ef   :  { %v3265_v24 = vld [vmem:[#allocation15 + $0x760] sm:$0xff] }
 0x3f0   :  { %2908 = vmatpush.msrb.mxu2 %v2885_v62  ;;  %v2520_v45 = vpop.f32.mrf.mxu3  ;;  %v2518_v62 = vadd.f32 %v2517_v47, %v5558_v53  ;;  %v3264_v53 = vld [vmem:[#allocation15 + $0x758] sm:$0xff] }
 0x3f1   :  { %v2521_v8 = vadd.f32 %v2520_v45, %v2473_v37  ;;  %2846 = vmatmul.f32.vlgmr.msra.gmra.mxu2 %v2681_v13  ;;  %v2880_v37 = vld [vmem:[#allocation15 + $0x238] sm:$0xff]  ;;  %v2878_v13 = vld [vmem:[#allocation15 + $0x228] sm:$0xff]  ;;  %v2479_v45 = vpop.f32.mrf.mxu2 }
 0x3f2   :  { %2909 = vmatpush.msrb.mxu2 %v2884_v31  ;;  %v5587_v4 = vpop.f32.mrf.mxu1  ;;  %v3266_v31 = vld [vmem:[#allocation15 + $0x768] sm:$0xff] }
 0x3f3   :  { %v2641_v12 = vadd.f32 %v2521_v8, %v2248_v63  ;;  %v2207_v63 = vadd.f32 %v5494_v3, %v2066_v33  ;;  %v5606_v8 = vpop.f32.mrf.mxu0  ;;  %v2875_v3 = vld [vmem:[#allocation15 + $0x210] sm:$0xff] }
 0x3f4   :  { %2910 = vmatpush.msrb.mxu2 %v2883_v6  ;;  %v2639_v6 = vadd.f32 %v2518_v62, %v2245_v55  ;;  %v3040_v62 = vld [vmem:[#allocation15 + $0x478] sm:$0xff] }
 0x3f5   :  { %v2667_v57 = vadd.f32 %v5570_v54, %v2641_v12  ;;  %2358 = vmatmul.f32.gmra.mxu1 %v5417_v36  ;;  %v2876_v12 = vld [vmem:[#allocation15 + $0x218] sm:$0xff] }
 0x3f6   :  { %2911 = vmatpush.msrb.mxu2 %v2882_v18  ;;  %v2254_v18 = vadd.f32 %v5519_v0, %v2207_v63  ;;  %v2665_v58 = vadd.f32 %v5570_v54, %v2639_v6  ;;  %v3261_v0 = vld [vmem:[#allocation15 + $0x740] sm:$0xff]  ;;  %v3039_v63 = vld [vmem:[#allocation15 + $0x470] sm:$0xff] }
 0x3f7   :  { %v2687_v25 = vmax.f32 %v2667_v57, 0.0  ;;  %v3263_v57 = vld [vmem:[#allocation15 + $0x750] sm:$0xff]  ;;  %v3037_v6 = vld [vmem:[#allocation15 + $0x460] sm:$0xff] }
 0x3f8   :  { %2912 = vmatpush.msrb.mxu2 %v2881_v5  ;;  %v5595_v16 = vpop.f32.mrf.mxu3 }
 0x3f9   :  { %2997 = vmatmul.f32.vlgmr.msra.gmra.mxu0 %v2687_v25  ;;  %v2874_v25 = vld [vmem:[#allocation15 + $0x208] sm:$0xff]  ;;  %v5614_v33 = vpop.f32.mrf.mxu2 }
 0x3fa   :  { %2913 = vmatpush.msrb.mxu2 %v2880_v37  ;;  %3285 = vmatpush.msra.mxu0 %v3268_v21  ;;  %v5600_v48 = vpop.f32.mrf.mxu1  ;;  %v3262_v37 = vld [vmem:[#allocation15 + $0x748] sm:$0xff] }
 0x3fc   :  { %2914 = vmatpush.msrb.mxu2 %v2879_v29  ;;  %3286 = vmatpush.msra.mxu0 %v3267_v9  ;;  %v2685_v29 = vmax.f32 %v2665_v58, 0.0  ;;  %v3255_v58 = vld [vmem:[#allocation15 + $0x710] sm:$0xff] }
 0x3fd   :  { %2604 = vmatmul.f32.vlgmr.msrb.gmra.mxu1 %v5344_v40 }
 0x3fe   :  { %2915 = vmatpush.msrb.mxu2 %v2878_v13  ;;  %3287 = vmatpush.msra.mxu0 %v3266_v31  ;;  %v3260_v13 = vld [vmem:[#allocation15 + $0x738] sm:$0xff]  ;;  %v5616_v31 = vpop.f32.mrf.mxu0 }
 0x400   :  { %2916 = vmatpush.msrb.mxu2 %v2877_v20  ;;  %3288 = vmatpush.msra.mxu0 %v3265_v24  ;;  %v2526_v47 = vpop.f32.mrf.mxu3  ;;  %v3038_v20 = vld [vmem:[#allocation15 + $0x468] sm:$0xff] }
 0x401   :  { %v2527_v32 = vadd.f32 %v2526_v47, %v2479_v45  ;;  %v3258_v24 = vld [vmem:[#allocation15 + $0x728] sm:$0xff]  ;;  %v3256_v47 = vld [vmem:[#allocation15 + $0x718] sm:$0xff] }
 0x402   :  { %2917 = vmatpush.msrb.mxu2 %v2876_v12  ;;  %3289 = vmatpush.msra.mxu0 %v3264_v53  ;;  %v5609_v40 = vpop.f32.mrf.mxu1  ;;  %v3257_v12 = vld [vmem:[#allocation15 + $0x720] sm:$0xff]  ;;  %v3036_v53 = vld [vmem:[#allocation15 + $0x458] sm:$0xff] }
 0x403   :  { %v2645_v5 = vadd.f32 %v2527_v32, %v2254_v18  ;;  %v2485_v18 = vpop.f32.mrf.mxu2 }
 0x404   :  { %2918 = vmatpush.msrb.mxu2 %v2875_v3  ;;  %3290 = vmatpush.msra.mxu0 %v3263_v57  ;;  %v3035_v57 = vld [vmem:[#allocation15 + $0x450] sm:$0xff] }
 0x405   :  { %v2671_v21 = vadd.f32 %v5570_v54, %v2645_v5  ;;  %2607 = vmatmul.f32.gmra.mxu1 %v5353_v23  ;;  %v3259_v23 = vld [vmem:[#allocation15 + $0x730] sm:$0xff] }
 0x406   :  { %2919 = vmatpush.msrb.mxu2 %v2874_v25  ;;  %3291 = vmatpush.msra.mxu0 %v3262_v37  ;;  %v5623_v5 = vpop.f32.mrf.mxu0  ;;  %v3034_v37 = vld [vmem:[#allocation15 + $0x448] sm:$0xff] }
 0x407   :  { %v2691_v9 = vmax.f32 %v2671_v21, 0.0  ;;  %v3254_v21 = vld [vmem:[#allocation15 + $0x708] sm:$0xff] }
 0x408   :  { %2920 = vmatpush.msrb.mxu2 %v2873_v60  ;;  %3292 = vmatpush.msra.mxu0 %v3261_v0  ;;  %v5618_v45 = vpop.f32.mrf.mxu3  ;;  %v2063_v60 = vadd.f32 %v5513_v59, %v5329_v51  ;;  %v3418_v59 = vld [vmem:[#allocation15 + $0x968] sm:$0xff] }
 0x409   :  { %2921 = vmatmul.f32.vlgmr.msrb.gmra.mxu2 %v2685_v29  ;;  %3149 = vmatmul.f32.vlgmr.msrb.gmra.mxu0 %v2691_v9  ;;  %v3033_v29 = vld [vmem:[#allocation15 + $0x440] sm:$0xff] }
 0x40a   :  { %3057 = vmatpush.msra.mxu2 %v3040_v62  ;;  %3293 = vmatpush.msra.mxu0 %v3260_v13  ;;  %v5620_v55 = vpop.f32.mrf.mxu1  ;;  %v3253_v9 = vld [vmem:[#allocation15 + $0x700] sm:$0xff]  ;;  %v3420_v62 = vld [vmem:[#allocation15 + $0x978] sm:$0xff] }
 0x40c   :  { %3058 = vmatpush.msra.mxu2 %v3039_v63  ;;  %3294 = vmatpush.msra.mxu0 %v3259_v23  ;;  %v3032_v63 = vld [vmem:[#allocation15 + $0x438] sm:$0xff]  ;;  %v2204_v23 = vadd.f32 %v5480_v39, %v2063_v60  ;;  %v3029_v39 = vld [vmem:[#allocation15 + $0x420] sm:$0xff] }
 0x40d   :  { %2610 = vmatmul.f32.gmra.mxu1 %v5364_v11 }
 0x40e   :  { %3059 = vmatpush.msra.mxu2 %v3038_v20  ;;  %3295 = vmatpush.msra.mxu0 %v3258_v24  ;;  %v3031_v20 = vld [vmem:[#allocation15 + $0x430] sm:$0xff]  ;;  %v3030_v24 = vld [vmem:[#allocation15 + $0x428] sm:$0xff] }
 0x410   :  { %3060 = vmatpush.msra.mxu2 %v3037_v6  ;;  %3296 = vmatpush.msra.mxu0 %v3257_v12  ;;  %v2532_v32 = vpop.f32.mrf.mxu3  ;;  %v5637_v6 = vpop.f32.mrf.mxu0  ;;  %v3417_v12 = vld [vmem:[#allocation15 + $0x960] sm:$0xff] }
 0x411   :  { %v2533_v3 = vadd.f32 %v2532_v32, %v2485_v18  ;;  %v3416_v18 = vld [vmem:[#allocation15 + $0x958] sm:$0xff]  ;;  %v5643_v32 = vpop.f32.mrf.mxu2 }
 0x412   :  { %3061 = vmatpush.msra.mxu2 %v3036_v53  ;;  %3297 = vmatpush.msra.mxu0 %v3256_v47  ;;  %v5625_v25 = vpop.f32.mrf.mxu1  ;;  %v2251_v53 = vadd.f32 %v5511_v26, %v2204_v23  ;;  %v3414_v26 = vld [vmem:[#allocation15 + $0x948] sm:$0xff] }
 0x413   :  { %v2649_v11 = vadd.f32 %v2533_v3, %v5536_v28  ;;  %v3419_v28 = vld [vmem:[#allocation15 + $0x970] sm:$0xff] }
 0x414   :  { %3062 = vmatpush.msra.mxu2 %v3035_v57  ;;  %3298 = vmatpush.msra.mxu0 %v3255_v58  ;;  %v3027_v57 = vld [vmem:[#allocation15 + $0x410] sm:$0xff] }
 0x415   :  { %v2675_v0 = vadd.f32 %v5570_v54, %v2649_v11  ;;  %2613 = vmatmul.f32.gmra.mxu1 %v5375_v44  ;;  %v2524_v44 = vadd.f32 %v5595_v16, %v5585_v30  ;;  %v3028_v30 = vld [vmem:[#allocation15 + $0x418] sm:$0xff]  ;;  %v3415_v16 = vld [vmem:[#allocation15 + $0x950] sm:$0xff] }
 0x416   :  { %3063 = vmatpush.msra.mxu2 %v3034_v37  ;;  %3299 = vmatpush.msra.mxu0 %v3254_v21  ;;  %v3413_v37 = vld [vmem:[#allocation15 + $0x940] sm:$0xff] }
 0x417   :  { %v2695_v13 = vmax.f32 %v2675_v0, 0.0  ;;  %v2643_v3 = vadd.f32 %v2524_v44, %v2251_v53  ;;  %v3025_v21 = vld [vmem:[#allocation15 + $0x400] sm:$0xff]  ;;  %v3412_v0 = vld [vmem:[#allocation15 + $0x938] sm:$0xff] }
 0x418   :  { %3064 = vmatpush.msra.mxu2 %v3033_v29  ;;  %3300 = vmatpush.msra.mxu0 %v3253_v9  ;;  %v5640_v47 = vpop.f32.mrf.mxu3  ;;  %v5649_v60 = vpop.f32.mrf.mxu0  ;;  %v3409_v44 = vld [vmem:[#allocation15 + $0x920] sm:$0xff]  ;;  %v3408_v53 = vld [vmem:[#allocation15 + $0x918] sm:$0xff] }
 0x419   :  { %3301 = vmatmul.f32.vlgmr.msra.gmra.mxu0 %v2695_v13  ;;  %v2669_v11 = vadd.f32 %v5570_v54, %v2643_v3  ;;  %v3411_v13 = vld [vmem:[#allocation15 + $0x930] sm:$0xff] }
 0x41a   :  { %3437 = vmatpush.msrb.mxu0 %v3420_v62  ;;  %3065 = vmatpush.msra.mxu2 %v3032_v63  ;;  %v5633_v51 = vpop.f32.mrf.mxu1  ;;  %v3192_v62 = vld [vmem:[#allocation15 + $0x678] sm:$0xff]  ;;  %v2491_v63 = vpop.f32.mrf.mxu2  ;;  %v3407_v3 = vld [vmem:[#allocation15 + $0x910] sm:$0xff] }
 0x41b   :  { %v2689_v29 = vmax.f32 %v2669_v11, 0.0  ;;  %v2788_v11 = vld [vmem:[#allocation15 + $0x1f0] sm:$0xff] }
 0x41c   :  { %3438 = vmatpush.msrb.mxu0 %v3419_v28  ;;  %3066 = vmatpush.msra.mxu2 %v3031_v20  ;;  %v3191_v28 = vld [vmem:[#allocation15 + $0x670] sm:$0xff] }
 0x41d   :  { %2616 = vmatmul.f32.gmra.mxu1 %v5386_v52  ;;  %v3026_v52 = vld [vmem:[#allocation15 + $0x408] sm:$0xff] }
 0x41e   :  { %3439 = vmatpush.msrb.mxu0 %v3418_v59  ;;  %3067 = vmatpush.msra.mxu2 %v3030_v24  ;;  %v3190_v59 = vld [vmem:[#allocation15 + $0x668] sm:$0xff]  ;;  %v3189_v24 = vld [vmem:[#allocation15 + $0x660] sm:$0xff] }
 0x420   :  { %3440 = vmatpush.msrb.mxu0 %v3417_v12  ;;  %3068 = vmatpush.msra.mxu2 %v3029_v39  ;;  %v2538_v9 = vpop.f32.mrf.mxu3  ;;  %v3188_v39 = vld [vmem:[#allocation15 + $0x658] sm:$0xff] }
 0x421   :  { %v2539_v23 = vadd.f32 %v2538_v9, %v2491_v63  ;;  %v3184_v9 = vld [vmem:[#allocation15 + $0x638] sm:$0xff] }
 0x422   :  { %3441 = vmatpush.msrb.mxu0 %v3416_v18  ;;  %3069 = vmatpush.msra.mxu2 %v3028_v30  ;;  %v5645_v58 = vpop.f32.mrf.mxu1  ;;  %v5655_v18 = vpop.f32.mrf.mxu0  ;;  %v2789_v30 = vld [vmem:[#allocation15 + $0x1f8] sm:$0xff] }
 0x423   :  { %v2653_v12 = vadd.f32 %v2539_v23, %v5548_v10  ;;  %2810 = vmatpush.msrb.mxu3 %v2789_v30  ;;  %v3186_v10 = vld [vmem:[#allocation15 + $0x648] sm:$0xff]  ;;  %v2784_v23 = vld [vmem:[#allocation15 + $0x1d0] sm:$0xff] }
 0x424   :  { %3442 = vmatpush.msrb.mxu0 %v3415_v16  ;;  %3070 = vmatpush.msra.mxu2 %v3027_v57  ;;  %v3187_v16 = vld [vmem:[#allocation15 + $0x650] sm:$0xff] }
 0x425   :  { %2619 = vmatmul.f32.gmra.mxu1 %v5397_v7  ;;  %v3410_v7 = vld [vmem:[#allocation15 + $0x928] sm:$0xff]  ;;  %v2679_v57 = vadd.f32 %v5570_v54, %v2653_v12  ;;  %2811 = vmatpush.msrb.mxu3 %v2788_v11  ;;  %v3179_v30 = vld [vmem:[#allocation15 + $0x610] sm:$0xff] }
 0x426   :  { %3443 = vmatpush.msrb.mxu0 %v3414_v26  ;;  %3071 = vmatpush.msra.mxu2 %v3026_v52  ;;  %v3405_v52 = vld [vmem:[#allocation15 + $0x900] sm:$0xff]  ;;  %v2978_v11 = vld [vmem:[#allocation15 + $0x3e8] sm:$0xff] }
 0x428   :  { %3444 = vmatpush.msrb.mxu0 %v3413_v37  ;;  %3072 = vmatpush.msra.mxu2 %v3025_v21  ;;  %v2787_v37 = vld [vmem:[#allocation15 + $0x1e8] sm:$0xff]  ;;  %v3185_v21 = vld [vmem:[#allocation15 + $0x640] sm:$0xff] }
 0x429   :  { %3073 = vmatmul.f32.vlgmr.msra.gmra.mxu2 %v2689_v29  ;;  %2812 = vmatpush.msrb.mxu3 %v2787_v37  ;;  %v2786_v29 = vld [vmem:[#allocation15 + $0x1e0] sm:$0xff] }
 0x42a   :  { %3445 = vmatpush.msrb.mxu0 %v3412_v0  ;;  %3209 = vmatpush.msrb.mxu2 %v3192_v62  ;;  %v5651_v20 = vpop.f32.mrf.mxu1  ;;  %v2699_v0 = vmax.f32 %v2679_v57, 0.0  ;;  %v2785_v62 = vld [vmem:[#allocation15 + $0x1d8] sm:$0xff]  ;;  %v5661_v63 = vpop.f32.mrf.mxu0  ;;  %v3178_v57 = vld [vmem:[#allocation15 + $0x608] sm:$0xff]  ;;  %v2977_v37 = vld [vmem:[#allocation15 + $0x3e0] sm:$0xff] }
 0x42b   :  { %2813 = vmatpush.msrb.mxu3 %v2786_v29  ;;  %v2777_v29 = vld [vmem:[#allocation15 + $0x198] sm:$0xff] }
 0x42c   :  { %3446 = vmatpush.msrb.mxu0 %v3411_v13  ;;  %3210 = vmatpush.msrb.mxu2 %v3191_v28  ;;  %v3183_v13 = vld [vmem:[#allocation15 + $0x630] sm:$0xff] }
 0x42d   :  { %2622 = vmatmul.f32.gmra.mxu1 %v5406_v49  ;;  %v3406_v49 = vld [vmem:[#allocation15 + $0x908] sm:$0xff]  ;;  %2814 = vmatpush.msrb.mxu3 %v2785_v62  ;;  %v3343_v62 = vld [vmem:[#allocation15 + $0x870] sm:$0xff] }
 0x42e   :  { %3447 = vmatpush.msrb.mxu0 %v3410_v7  ;;  %3211 = vmatpush.msrb.mxu2 %v3190_v59  ;;  %v3182_v7 = vld [vmem:[#allocation15 + $0x628] sm:$0xff] }
 0x42f   :  { %v2783_v59 = vld [vmem:[#allocation15 + $0x1c8] sm:$0xff]  ;;  %2815 = vmatpush.msrb.mxu3 %v2784_v23 }
 0x430   :  { %3448 = vmatpush.msrb.mxu0 %v3409_v44  ;;  %3212 = vmatpush.msrb.mxu2 %v3189_v24  ;;  %v3181_v44 = vld [vmem:[#allocation15 + $0x620] sm:$0xff]  ;;  %v3342_v23 = vld [vmem:[#allocation15 + $0x868] sm:$0xff] }
 0x431   :  { %v2782_v24 = vld [vmem:[#allocation15 + $0x1c0] sm:$0xff]  ;;  %2816 = vmatpush.msrb.mxu3 %v2783_v59 }
 0x432   :  { %3449 = vmatpush.msrb.mxu0 %v3408_v53  ;;  %3213 = vmatpush.msrb.mxu2 %v3188_v39  ;;  %v5658_v26 = vpop.f32.mrf.mxu1  ;;  %v3180_v53 = vld [vmem:[#allocation15 + $0x618] sm:$0xff]  ;;  %v3341_v59 = vld [vmem:[#allocation15 + $0x860] sm:$0xff] }
 0x433   :  { %v2781_v39 = vld [vmem:[#allocation15 + $0x1b8] sm:$0xff]  ;;  %2817 = vmatpush.msrb.mxu3 %v2782_v24 }
 0x434   :  { %3450 = vmatpush.msrb.mxu0 %v3407_v3  ;;  %3214 = vmatpush.msrb.mxu2 %v3187_v16  ;;  %v2980_v3 = vld [vmem:[#allocation15 + $0x3f8] sm:$0xff]  ;;  %v2979_v16 = vld [vmem:[#allocation15 + $0x3f0] sm:$0xff] }
 0x435   :  { %2625 = vmatmul.f32.gmra.mxu1 %v5417_v36  ;;  %v2530_v36 = vadd.f32 %v5618_v45, %v5614_v33  ;;  %v2780_v45 = vld [vmem:[#allocation15 + $0x1b0] sm:$0xff]  ;;  %2818 = vmatpush.msrb.mxu3 %v2781_v39  ;;  %v2754_v39 = vld [vmem:[#allocation15 + $0xf8] sm:$0xff] }
 0x436   :  { %3451 = vmatpush.msrb.mxu0 %v3406_v49  ;;  %3215 = vmatpush.msrb.mxu2 %v3186_v10  ;;  %v5672_v49 = vpop.f32.mrf.mxu0  ;;  %v3177_v10 = vld [vmem:[#allocation15 + $0x600] sm:$0xff] }
 0x437   :  { %v2647_v12 = vadd.f32 %v2530_v36, %v5529_v35  ;;  %3001 = vmatpush.msra.mxu1 %v2980_v3  ;;  %v2779_v35 = vld [vmem:[#allocation15 + $0x1a8] sm:$0xff]  ;;  %2819 = vmatpush.msrb.mxu3 %v2780_v45  ;;  %v2972_v3 = vld [vmem:[#allocation15 + $0x3b8] sm:$0xff]  ;;  %v2753_v45 = vld [vmem:[#allocation15 + $0xf0] sm:$0xff] }
 0x438   :  { %3452 = vmatpush.msrb.mxu0 %v3405_v52  ;;  %3216 = vmatpush.msrb.mxu2 %v3185_v21  ;;  %v2778_v52 = vld [vmem:[#allocation15 + $0x1a0] sm:$0xff]  ;;  %v2974_v36 = vld [vmem:[#allocation15 + $0x3c8] sm:$0xff] }
 0x439   :  { %3453 = vmatmul.f32.vlgmr.msrb.gmra.mxu0 %v2699_v0  ;;  %3002 = vmatpush.msra.mxu1 %v2979_v16  ;;  %v3344_v0 = vld [vmem:[#allocation15 + $0x878] sm:$0xff] }
 0x43a   :  { %3217 = vmatpush.msrb.mxu2 %v3184_v9  ;;  %v5663_v28 = vpop.f32.mrf.mxu1  ;;  %2820 = vmatpush.msrb.mxu3 %v2779_v35  ;;  %v2976_v9 = vld [vmem:[#allocation15 + $0x3d8] sm:$0xff]  ;;  %v2752_v35 = vld [vmem:[#allocation15 + $0xe8] sm:$0xff] }
 0x43b   :  { %3003 = vmatpush.msra.mxu1 %v2978_v11  ;;  %v2970_v11 = vld [vmem:[#allocation15 + $0x3a8] sm:$0xff] }
 0x43c   :  { %3218 = vmatpush.msrb.mxu2 %v3183_v13  ;;  %2821 = vmatpush.msrb.mxu3 %v2778_v52  ;;  %v2975_v13 = vld [vmem:[#allocation15 + $0x3d0] sm:$0xff]  ;;  %v2751_v52 = vld [vmem:[#allocation15 + $0xe0] sm:$0xff] }
 0x43d   :  { %2628 = vmatmul.f32.gmra.mxu1 %v5428_v19  ;;  %v2673_v19 = vadd.f32 %v5570_v54, %v2647_v12  ;;  %v2774_v12 = vld [vmem:[#allocation15 + $0x180] sm:$0xff] }
 0x43e   :  { %3219 = vmatpush.msrb.mxu2 %v3182_v7  ;;  %3004 = vmatpush.msra.mxu1 %v2977_v37  ;;  %v2775_v7 = vld [vmem:[#allocation15 + $0x188] sm:$0xff]  ;;  %v5678_v24 = vpop.f32.mrf.mxu0  ;;  %v2969_v37 = vld [vmem:[#allocation15 + $0x3a0] sm:$0xff] }
 0x43f   :  { %v2693_v21 = vmax.f32 %v2673_v19, 0.0  ;;  %2822 = vmatpush.msrb.mxu3 %v2777_v29  ;;  %v2971_v19 = vld [vmem:[#allocation15 + $0x3b0] sm:$0xff] }
 0x440   :  { %3220 = vmatpush.msrb.mxu2 %v3181_v44  ;;  %3005 = vmatpush.msra.mxu1 %v2976_v9  ;;  %v2973_v44 = vld [vmem:[#allocation15 + $0x3c0] sm:$0xff]  ;;  %v2968_v9 = vld [vmem:[#allocation15 + $0x398] sm:$0xff] }
 0x442   :  { %3221 = vmatpush.msrb.mxu2 %v3180_v53  ;;  %v5669_v33 = vpop.f32.mrf.mxu1  ;;  %3006 = vmatpush.msra.mxu1 %v2975_v13  ;;  %v3340_v53 = vld [vmem:[#allocation15 + $0x858] sm:$0xff]  ;;  %v2749_v13 = vld [vmem:[#allocation15 + $0xd0] sm:$0xff] }
 0x444   :  { %3222 = vmatpush.msrb.mxu2 %v3179_v30  ;;  %3007 = vmatpush.msra.mxu1 %v2974_v36  ;;  %v3339_v30 = vld [vmem:[#allocation15 + $0x850] sm:$0xff]  ;;  %v2536_v36 = vadd.f32 %v5640_v47, %v5643_v32  ;;  %v3132_v47 = vld [vmem:[#allocation15 + $0x5f8] sm:$0xff] }
 0x445   :  { %2631 = vmatmul.f32.gmra.mxu1 %v1810_v15  ;;  %v2776_v15 = vld [vmem:[#allocation15 + $0x190] sm:$0xff] }
 0x446   :  { %3223 = vmatpush.msrb.mxu2 %v3178_v57  ;;  %2823 = vmatpush.msrb.mxu3 %v2776_v15  ;;  %v3338_v57 = vld [vmem:[#allocation15 + $0x848] sm:$0xff]  ;;  %v5682_v29 = vpop.f32.mrf.mxu0  ;;  %v3331_v32 = vld [vmem:[#allocation15 + $0x810] sm:$0xff] }
 0x447   :  { %3008 = vmatpush.msra.mxu1 %v2973_v44  ;;  %v2966_v44 = vld [vmem:[#allocation15 + $0x388] sm:$0xff] }
 0x448   :  { %3224 = vmatpush.msrb.mxu2 %v3177_v10  ;;  %2824 = vmatpush.msrb.mxu3 %v2775_v7  ;;  %v3337_v10 = vld [vmem:[#allocation15 + $0x840] sm:$0xff]  ;;  %v3334_v7 = vld [vmem:[#allocation15 + $0x828] sm:$0xff] }
 0x449   :  { %3225 = vmatmul.f32.vlgmr.msrb.gmra.mxu2 %v2693_v21  ;;  %3009 = vmatpush.msra.mxu1 %v2972_v3  ;;  %v3336_v21 = vld [vmem:[#allocation15 + $0x838] sm:$0xff]  ;;  %v2651_v3 = vadd.f32 %v2536_v36, %v5543_v1  ;;  %v2744_v1 = vld [vmem:[#allocation15 + $0xa8] sm:$0xff] }
 0x44a   :  { %3361 = vmatpush.msra.mxu2 %v3344_v0  ;;  %v5676_v46 = vpop.f32.mrf.mxu1  ;;  %2825 = vmatpush.msrb.mxu3 %v2774_v12  ;;  %v2750_v0 = vld [vmem:[#allocation15 + $0xd8] sm:$0xff]  ;;  %v3333_v12 = vld [vmem:[#allocation15 + $0x820] sm:$0xff] }
 0x44b   :  { %3010 = vmatpush.msra.mxu1 %v2971_v19  ;;  %v2745_v19 = vld [vmem:[#allocation15 + $0xb0] sm:$0xff] }
 0x44c   :  { %3362 = vmatpush.msra.mxu2 %v3343_v62  ;;  %2850 = vmatpush.msra.mxu3 %v2754_v39  ;;  %v3335_v62 = vld [vmem:[#allocation15 + $0x830] sm:$0xff]  ;;  %v2965_v39 = vld [vmem:[#allocation15 + $0x380] sm:$0xff] }
 0x44d   :  { %3011 = vmatpush.msra.mxu1 %v2970_v11  ;;  %v3131_v11 = vld [vmem:[#allocation15 + $0x5f0] sm:$0xff] }
 0x44e   :  { %3363 = vmatpush.msra.mxu2 %v3342_v23  ;;  %2851 = vmatpush.msra.mxu3 %v2753_v45  ;;  %v2967_v23 = vld [vmem:[#allocation15 + $0x390] sm:$0xff]  ;;  %v2746_v45 = vld [vmem:[#allocation15 + $0xb8] sm:$0xff] }
 0x44f   :  { %3012 = vmatpush.msra.mxu1 %v2969_v37  ;;  %v3130_v37 = vld [vmem:[#allocation15 + $0x5e8] sm:$0xff] }
 0x450   :  { %3364 = vmatpush.msra.mxu2 %v3341_v59  ;;  %2852 = vmatpush.msra.mxu3 %v2752_v35  ;;  %v2748_v59 = vld [vmem:[#allocation15 + $0xc8] sm:$0xff] }
 0x451   :  { %3013 = vmatpush.msra.mxu1 %v2968_v9  ;;  %v3129_v9 = vld [vmem:[#allocation15 + $0x5e0] sm:$0xff] }
 0x452   :  { %3365 = vmatpush.msra.mxu2 %v3340_v53  ;;  %v5680_v16 = vpop.f32.mrf.mxu1  ;;  %2853 = vmatpush.msra.mxu3 %v2751_v52  ;;  %v2747_v53 = vld [vmem:[#allocation15 + $0xc0] sm:$0xff]  ;;  %v3330_v52 = vld [vmem:[#allocation15 + $0x808] sm:$0xff] }
 0x453   :  { %3014 = vmatpush.msra.mxu1 %v2967_v23  ;;  %v3128_v23 = vld [vmem:[#allocation15 + $0x5d8] sm:$0xff] }
 0x454   :  { %3366 = vmatpush.msra.mxu2 %v3339_v30  ;;  %2854 = vmatpush.msra.mxu3 %v2750_v0  ;;  %v3332_v30 = vld [vmem:[#allocation15 + $0x818] sm:$0xff]  ;;  %v2743_v0 = vld [vmem:[#allocation15 + $0xa0] sm:$0xff] }
 0x455   :  { %3015 = vmatpush.msra.mxu1 %v2966_v44 }
 0x456   :  { %3367 = vmatpush.msra.mxu2 %v3338_v57  ;;  %2855 = vmatpush.msra.mxu3 %v2749_v13  ;;  %v5689_v57 = vpop.f32.mrf.mxu0  ;;  %v2742_v13 = vld [vmem:[#allocation15 + $0x98] sm:$0xff] }
 0x457   :  { %3016 = vmatpush.msra.mxu1 %v2965_v39  ;;  %v3125_v39 = vld [vmem:[#allocation15 + $0x5c0] sm:$0xff] }
 0x458   :  { %3368 = vmatpush.msra.mxu2 %v3337_v10  ;;  %2856 = vmatpush.msra.mxu3 %v2748_v59  ;;  %v2677_v10 = vadd.f32 %v5570_v54, %v2651_v3  ;;  %v2741_v54 = vld [vmem:[#allocation15 + $0x90] sm:$0xff]  ;;  %v2740_v59 = vld [vmem:[#allocation15 + $0x88] sm:$0xff]  ;;  %v3124_v3 = vld [vmem:[#allocation15 + $0x5b8] sm:$0xff] }
 0x459   :  { %3153 = vmatpush.msrb.mxu1 %v3132_v47  ;;  %v3122_v47 = vld [vmem:[#allocation15 + $0x5a8] sm:$0xff] }
 0x45a   :  { %3369 = vmatpush.msra.mxu2 %v3336_v21  ;;  %v5684_v15 = vpop.f32.mrf.mxu1  ;;  %2857 = vmatpush.msra.mxu3 %v2747_v53  ;;  %v3329_v21 = vld [vmem:[#allocation15 + $0x800] sm:$0xff] }
 0x45b   :  { %3154 = vmatpush.msrb.mxu1 %v3131_v11  ;;  %v2739_v53 = vld [vmem:[#allocation15 + $0x80] sm:$0xff]  ;;  %v3120_v11 = vld [vmem:[#allocation15 + $0x598] sm:$0xff] }
 0x45c   :  { %3370 = vmatpush.msra.mxu2 %v3335_v62  ;;  %2858 = vmatpush.msra.mxu3 %v2746_v45  ;;  %v2697_v62 = vmax.f32 %v2677_v10, 0.0  ;;  %v3123_v45 = vld [vmem:[#allocation15 + $0x5b0] sm:$0xff] }
 0x45d   :  { %3155 = vmatpush.msrb.mxu1 %v3130_v37  ;;  %v2148_v37 = vadd.f32 %v5566_v43, %v5423_v41 }
 0x45e   :  { %3371 = vmatpush.msra.mxu2 %v3334_v7  ;;  %2859 = vmatpush.msra.mxu3 %v2745_v19  ;;  %v3127_v7 = vld [vmem:[#allocation15 + $0x5d0] sm:$0xff]  ;;  %v2558_v44 = vpop.f32.mrf.mxu0  ;;  %v3121_v19 = vld [vmem:[#allocation15 + $0x5a0] sm:$0xff] }
 0x45f   :  { %3156 = vmatpush.msrb.mxu1 %v3129_v9  ;;  %v2145_v9 = vadd.f32 %v5552_v17, %v5412_v22  ;;  %v2904_v17 = vld [vmem:[#allocation15 + $0x2f8] sm:$0xff] }
 0x460   :  { %3372 = vmatpush.msra.mxu2 %v3333_v12  ;;  %2860 = vmatpush.msra.mxu3 %v2744_v1  ;;  %v3126_v12 = vld [vmem:[#allocation15 + $0x5c8] sm:$0xff] }
 0x461   :  { %3157 = vmatpush.msrb.mxu1 %v3128_v23  ;;  %v3118_v1 = vld [vmem:[#allocation15 + $0x588] sm:$0xff] }
 0x462   :  { %3373 = vmatpush.msra.mxu2 %v3332_v30  ;;  %v5691_v35 = vpop.f32.mrf.mxu1  ;;  %2861 = vmatpush.msra.mxu3 %v2743_v0 }
 0x463   :  { %3158 = vmatpush.msrb.mxu1 %v3127_v7  ;;  %v2286_v7 = vadd.f32 %v5616_v31, %v2145_v9  ;;  %v2154_v31 = vadd.f32 %v5587_v4, %v5445_v2  ;;  %v2898_v4 = vld [vmem:[#allocation15 + $0x2c8] sm:$0xff] }
 0x464   :  { %3374 = vmatpush.msra.mxu2 %v3331_v32  ;;  %2862 = vmatpush.msra.mxu3 %v2742_v13 }
 0x465   :  { %3159 = vmatpush.msrb.mxu1 %v3126_v12  ;;  %v5706_v12 = vperm.slane %v5562_v14, 1  ;;  %v2333_v43 = vadd.f32 %v5651_v20, %v2286_v7  ;;  %v2902_v14 = vld [vmem:[#allocation15 + $0x2e8] sm:$0xff]  ;;  %v2295_v20 = vadd.f32 %v5649_v60, %v2154_v31  ;;  %v2151_v60 = vadd.f32 %v5579_v38, %v5434_v56  ;;  %v3280_v31 = vld [vmem:[#allocation15 + $0x7d8] sm:$0xff] }
 0x466   :  { %3375 = vmatpush.msra.mxu2 %v3330_v52  ;;  %2863 = vmatpush.msra.mxu3 %v2741_v54  ;;  %v2561_v32 = vpop.f32.mrf.mxu0  ;;  %v3119_v52 = vld [vmem:[#allocation15 + $0x590] sm:$0xff]  ;;  %v2160_v7 = vadd.f32 %v5609_v40, %v5464_v61 }
 0x467   :  { %3160 = vmatpush.msrb.mxu1 %v3125_v39 }
 0x468   :  { %3376 = vmatpush.msra.mxu2 %v3329_v21  ;;  %2864 = vmatpush.msra.mxu3 %v2740_v59  ;;  %v3117_v21 = vld [vmem:[#allocation15 + $0x580] sm:$0xff] }
 0x469   :  { %3377 = vmatmul.f32.vlgmr.msra.gmra.mxu2 %v2697_v62  ;;  %3161 = vmatpush.msrb.mxu1 %v3124_v3  ;;  %v2289_v62 = vadd.f32 %v5623_v5, %v2148_v37 }
 0x46a   :  { %v5694_v36 = vpop.f32.mrf.mxu1  ;;  %2865 = vmatpush.msra.mxu3 %v2739_v53 }
 0x46b   :  { %3162 = vmatpush.msrb.mxu1 %v3123_v45  ;;  %v2336_v23 = vadd.f32 %v5658_v26, %v2289_v62  ;;  %v2903_v45 = vld [vmem:[#allocation15 + $0x2f0] sm:$0xff]  ;;  %v2896_v62 = vld [vmem:[#allocation15 + $0x2b8] sm:$0xff] }
 0x46d   :  { %3163 = vmatpush.msrb.mxu1 %v3122_v47 }
 0x46e   :  { %v2564_v0 = vpop.f32.mrf.mxu0 }
 0x46f   :  { %3164 = vmatpush.msrb.mxu1 %v3121_v19 }
 0x471   :  { %3165 = vmatpush.msrb.mxu1 %v3120_v11  ;;  %v2342_v11 = vadd.f32 %v5669_v33, %v2295_v20  ;;  %v2889_v20 = vld [vmem:[#allocation15 + $0x280] sm:$0xff] }
 0x472   :  { %v5696_v30 = vpop.f32.mrf.mxu1 }
 0x473   :  { %3166 = vmatpush.msrb.mxu1 %v3119_v52  ;;  %v2899_v52 = vld [vmem:[#allocation15 + $0x2d0] sm:$0xff] }
 0x475   :  { %3167 = vmatpush.msrb.mxu1 %v3118_v1 }
 0x476   :  { %v2567_v5 = vpop.f32.mrf.mxu0 }
 0x477   :  { %3168 = vmatpush.msrb.mxu1 %v3117_v21  ;;  %v2897_v21 = vld [vmem:[#allocation15 + $0x2c0] sm:$0xff] }
 0x47a   :  { %v2605_v10 = vpop.f32.mrf.mxu1 }
 0x47b   :  { %v2606_v59 = vadd.f32 %v2605_v10, %v2558_v44  ;;  %v2901_v44 = vld [vmem:[#allocation15 + $0x2e0] sm:$0xff] }
 0x47d   :  { %v2636_v39 = vadd.f32 %v2606_v59, %v2333_v43  ;;  %v2292_v59 = vadd.f32 %v5637_v6, %v2151_v60  ;;  %v2894_v43 = vld [vmem:[#allocation15 + $0x2a8] sm:$0xff] }
 0x47e   :  { %v5715_v1 = vpop.f32.mrf.mxu0  ;;  %v3274_v60 = vld [vmem:[#allocation15 + $0x7a8] sm:$0xff] }
 0x47f   :  { %v2662_v26 = vadd.f32 %v5706_v12, %v2636_v39  ;;  %v2339_v38 = vadd.f32 %v5663_v28, %v2292_v59  ;;  %v2893_v39 = vld [vmem:[#allocation15 + $0x2a0] sm:$0xff] }
 0x481   :  { %v2682_v47 = vmax.f32 %v2662_v26, 0.0 }
 0x482   :  { %v2608_v13 = vpop.f32.mrf.mxu1 }
 0x483   :  { %v2609_v54 = vadd.f32 %v2608_v13, %v2561_v32  ;;  %v2900_v32 = vld [vmem:[#allocation15 + $0x2d8] sm:$0xff] }
 0x484   :  { %v3284_v13 = vld [vmem:[#allocation15 + $0x7f8] sm:$0xff] }
 0x485   :  { %v2638_v41 = vadd.f32 %v2609_v54, %v2336_v23  ;;  %v2895_v23 = vld [vmem:[#allocation15 + $0x2b0] sm:$0xff] }
 0x486   :  { %v3283_v54 = vld [vmem:[#allocation15 + $0x7f0] sm:$0xff]  ;;  %v2573_v56 = vpop.f32.mrf.mxu0 }
 0x487   :  { %v2664_v53 = vadd.f32 %v5706_v12, %v2638_v41 }
 0x489   :  { %v2684_v22 = vmax.f32 %v2664_v53, 0.0  ;;  %v3282_v53 = vld [vmem:[#allocation15 + $0x7e8] sm:$0xff] }
 0x48a   :  { %v2611_v3 = vpop.f32.mrf.mxu1 }
 0x48b   :  { %2826 = vmatmul.f32.vlgmr.msrb.gmra.mxu3 %v2684_v22  ;;  %v2612_v41 = vadd.f32 %v2611_v3, %v2564_v0  ;;  %v3281_v22 = vld [vmem:[#allocation15 + $0x7e0] sm:$0xff]  ;;  %v2891_v0 = vld [vmem:[#allocation15 + $0x290] sm:$0xff] }
 0x48c   :  { %2925 = vmatpush.msrb.mxu3 %v2904_v17  ;;  %v2301_v17 = vadd.f32 %v5661_v63, %v2160_v7  ;;  %v3279_v3 = vld [vmem:[#allocation15 + $0x7d0] sm:$0xff] }
 0x48e   :  { %2926 = vmatpush.msrb.mxu3 %v2903_v45  ;;  %v2892_v45 = vld [vmem:[#allocation15 + $0x298] sm:$0xff]  ;;  %v2348_v40 = vadd.f32 %v5680_v16, %v2301_v17 }
 0x48f   :  { %v3436_v17 = vld [vmem:[#allocation15 + $0x9f8] sm:$0xff] }
 0x490   :  { %2927 = vmatpush.msrb.mxu3 %v2902_v14  ;;  %v2890_v14 = vld [vmem:[#allocation15 + $0x288] sm:$0xff] }
 0x492   :  { %2928 = vmatpush.msrb.mxu3 %v2901_v44  ;;  %v2614_v19 = vpop.f32.mrf.mxu1  ;;  %v3278_v44 = vld [vmem:[#allocation15 + $0x7c8] sm:$0xff] }
 0x493   :  { %v2615_v10 = vadd.f32 %v2614_v19, %v2567_v5  ;;  %2866 = vmatmul.f32.vlgmr.msra.gmra.mxu3 %v2682_v47  ;;  %v2640_v5 = vadd.f32 %v2612_v41, %v2339_v38  ;;  %v3277_v47 = vld [vmem:[#allocation15 + $0x7c0] sm:$0xff]  ;;  %v3270_v38 = vld [vmem:[#allocation15 + $0x788] sm:$0xff] }
 0x494   :  { %2929 = vmatpush.msrb.mxu3 %v2900_v32  ;;  %v5730_v32 = vpop.f32.mrf.mxu0 }
 0x495   :  { %v2642_v2 = vadd.f32 %v2615_v10, %v2342_v11  ;;  %v2666_v28 = vadd.f32 %v5706_v12, %v2640_v5  ;;  %v3056_v11 = vld [vmem:[#allocation15 + $0x4f8] sm:$0xff] }
 0x496   :  { %2930 = vmatpush.msrb.mxu3 %v2899_v52  ;;  %v3276_v10 = vld [vmem:[#allocation15 + $0x7b8] sm:$0xff] }
 0x497   :  { %v2668_v37 = vadd.f32 %v5706_v12, %v2642_v2  ;;  %v2686_v16 = vmax.f32 %v2666_v28, 0.0  ;;  %v3055_v2 = vld [vmem:[#allocation15 + $0x4f0] sm:$0xff]  ;;  %v3433_v28 = vld [vmem:[#allocation15 + $0x9e0] sm:$0xff] }
 0x498   :  { %2931 = vmatpush.msrb.mxu3 %v2898_v4  ;;  %v3275_v4 = vld [vmem:[#allocation15 + $0x7b0] sm:$0xff] }
 0x499   :  { %v2688_v9 = vmax.f32 %v2668_v37, 0.0  ;;  %v2166_v37 = vadd.f32 %v5625_v25, %v5577_v42  ;;  %v3051_v42 = vld [vmem:[#allocation15 + $0x4d0] sm:$0xff] }
 0x49a   :  { %2932 = vmatpush.msrb.mxu3 %v2897_v21  ;;  %v5720_v33 = vpop.f32.mrf.mxu1  ;;  %v3054_v21 = vld [vmem:[#allocation15 + $0x4e8] sm:$0xff]  ;;  %v3271_v25 = vld [vmem:[#allocation15 + $0x790] sm:$0xff] }
 0x49b   :  { %3017 = vmatmul.f32.vlgmr.msra.gmra.mxu1 %v2688_v9  ;;  %v3053_v9 = vld [vmem:[#allocation15 + $0x4e0] sm:$0xff] }
 0x49c   :  { %2933 = vmatpush.msrb.mxu3 %v2896_v62  ;;  %3305 = vmatpush.msra.mxu1 %v3284_v13  ;;  %v3273_v62 = vld [vmem:[#allocation15 + $0x7a0] sm:$0xff]  ;;  %v2307_v13 = vadd.f32 %v5678_v24, %v2166_v37  ;;  %v2579_v7 = vpop.f32.mrf.mxu0  ;;  %v3208_v37 = vld [vmem:[#allocation15 + $0x6f8] sm:$0xff] }
 0x49e   :  { %2934 = vmatpush.msrb.mxu3 %v2895_v23  ;;  %3306 = vmatpush.msra.mxu1 %v3283_v54  ;;  %v3052_v23 = vld [vmem:[#allocation15 + $0x4d8] sm:$0xff]  ;;  %v2354_v41 = vadd.f32 %v5691_v35, %v2307_v13  ;;  %v2157_v35 = vadd.f32 %v5600_v48, %v5457_v50 }
 0x49f   :  { %v3272_v54 = vld [vmem:[#allocation15 + $0x798] sm:$0xff] }
 0x4a0   :  { %2935 = vmatpush.msrb.mxu3 %v2894_v43  ;;  %3307 = vmatpush.msra.mxu1 %v3282_v53 }
 0x4a2   :  { %2936 = vmatpush.msrb.mxu3 %v2893_v39  ;;  %3308 = vmatpush.msra.mxu1 %v3281_v22  ;;  %v2620_v61 = vpop.f32.mrf.mxu1  ;;  %v3049_v39 = vld [vmem:[#allocation15 + $0x4c0] sm:$0xff] }
 0x4a3   :  { %v2621_v6 = vadd.f32 %v2620_v61, %v2573_v56  ;;  %v3050_v56 = vld [vmem:[#allocation15 + $0x4c8] sm:$0xff]  ;;  %v3269_v22 = vld [vmem:[#allocation15 + $0x780] sm:$0xff]  ;;  %v3047_v61 = vld [vmem:[#allocation15 + $0x4b0] sm:$0xff] }
 0x4a4   :  { %2937 = vmatpush.msrb.mxu3 %v2892_v45  ;;  %3309 = vmatpush.msra.mxu1 %v3280_v31  ;;  %v3048_v45 = vld [vmem:[#allocation15 + $0x4b8] sm:$0xff]  ;;  %v3435_v31 = vld [vmem:[#allocation15 + $0x9f0] sm:$0xff] }
 0x4a5   :  { %v2646_v26 = vadd.f32 %v2621_v6, %v2348_v40  ;;  %v3434_v40 = vld [vmem:[#allocation15 + $0x9e8] sm:$0xff]  ;;  %v2298_v6 = vadd.f32 %v5655_v18, %v2157_v35  ;;  %v3044_v18 = vld [vmem:[#allocation15 + $0x498] sm:$0xff] }
 0x4a6   :  { %2938 = vmatpush.msrb.mxu3 %v2891_v0  ;;  %3310 = vmatpush.msra.mxu1 %v3279_v3  ;;  %v2618_v0 = vadd.f32 %v5720_v33, %v5715_v1  ;;  %v3046_v3 = vld [vmem:[#allocation15 + $0x4a8] sm:$0xff]  ;;  %v3043_v1 = vld [vmem:[#allocation15 + $0x490] sm:$0xff] }
 0x4a7   :  { %v2672_v63 = vadd.f32 %v5706_v12, %v2646_v26  ;;  %v2345_v50 = vadd.f32 %v5676_v46, %v2298_v6  ;;  %v3045_v26 = vld [vmem:[#allocation15 + $0x4a0] sm:$0xff]  ;;  %v3430_v33 = vld [vmem:[#allocation15 + $0x9c8] sm:$0xff]  ;;  %v3196_v6 = vld [vmem:[#allocation15 + $0x698] sm:$0xff] }
 0x4a8   :  { %2939 = vmatpush.msrb.mxu3 %v2890_v14  ;;  %3311 = vmatpush.msra.mxu1 %v3278_v44  ;;  %v3432_v14 = vld [vmem:[#allocation15 + $0x9d8] sm:$0xff]  ;;  %v5747_v44 = vpop.f32.mrf.mxu0  ;;  %v3042_v46 = vld [vmem:[#allocation15 + $0x488] sm:$0xff] }
 0x4a9   :  { %v2692_v19 = vmax.f32 %v2672_v63, 0.0  ;;  %v2644_v63 = vadd.f32 %v2618_v0, %v2345_v50  ;;  %v3194_v0 = vld [vmem:[#allocation15 + $0x688] sm:$0xff]  ;;  %v3356_v50 = vld [vmem:[#allocation15 + $0x8d8] sm:$0xff] }
 0x4aa   :  { %2940 = vmatpush.msrb.mxu3 %v2889_v20  ;;  %3312 = vmatpush.msra.mxu1 %v3277_v47  ;;  %v5732_v52 = vpop.f32.mrf.mxu1  ;;  %v3431_v20 = vld [vmem:[#allocation15 + $0x9d0] sm:$0xff] }
 0x4ab   :  { %2941 = vmatmul.f32.vlgmr.msrb.gmra.mxu3 %v2686_v16  ;;  %3169 = vmatmul.f32.vlgmr.msrb.gmra.mxu1 %v2692_v19  ;;  %v2670_v47 = vadd.f32 %v5706_v12, %v2644_v63  ;;  %v3429_v16 = vld [vmem:[#allocation15 + $0x9c0] sm:$0xff] }
 0x4ac   :  { %3077 = vmatpush.msra.mxu3 %v3056_v11  ;;  %3313 = vmatpush.msra.mxu1 %v3276_v10  ;;  %v3041_v19 = vld [vmem:[#allocation15 + $0x480] sm:$0xff]  ;;  %v2172_v11 = vadd.f32 %v5645_v58, %v5606_v8  ;;  %v3428_v10 = vld [vmem:[#allocation15 + $0x9b8] sm:$0xff] }
 0x4ad   :  { %v3425_v58 = vld [vmem:[#allocation15 + $0x9a0] sm:$0xff] }
 0x4ae   :  { %3078 = vmatpush.msra.mxu3 %v3055_v2  ;;  %3314 = vmatpush.msra.mxu1 %v3275_v4  ;;  %v2690_v2 = vmax.f32 %v2670_v47, 0.0  ;;  %v3353_v63 = vld [vmem:[#allocation15 + $0x8c0] sm:$0xff] }
 0x4b0   :  { %3079 = vmatpush.msra.mxu3 %v3054_v21  ;;  %3315 = vmatpush.msra.mxu1 %v3274_v60  ;;  %v3427_v21 = vld [vmem:[#allocation15 + $0x9b0] sm:$0xff]  ;;  %v2585_v60 = vpop.f32.mrf.mxu0 }
 0x4b2   :  { %3080 = vmatpush.msra.mxu3 %v3053_v9  ;;  %3316 = vmatpush.msra.mxu1 %v3273_v62  ;;  %v2626_v59 = vpop.f32.mrf.mxu1  ;;  %v3207_v9 = vld [vmem:[#allocation15 + $0x6f0] sm:$0xff]  ;;  %v2313_v62 = vadd.f32 %v5689_v57, %v2172_v11 }
 0x4b3   :  { %v2627_v43 = vadd.f32 %v2626_v59, %v2579_v7  ;;  %v3205_v7 = vld [vmem:[#allocation15 + $0x6e0] sm:$0xff]  ;;  %v3203_v57 = vld [vmem:[#allocation15 + $0x6d0] sm:$0xff] }
 0x4b4   :  { %3081 = vmatpush.msra.mxu3 %v3052_v23  ;;  %3317 = vmatpush.msra.mxu1 %v3272_v54  ;;  %v3426_v23 = vld [vmem:[#allocation15 + $0x9a8] sm:$0xff]  ;;  %v2360_v8 = vadd.f32 %v5696_v30, %v2313_v62  ;;  %v3421_v30 = vld [vmem:[#allocation15 + $0x980] sm:$0xff] }
 0x4b5   :  { %v2650_v53 = vadd.f32 %v2627_v43, %v2354_v41  ;;  %v3206_v54 = vld [vmem:[#allocation15 + $0x6e8] sm:$0xff]  ;;  %v3424_v41 = vld [vmem:[#allocation15 + $0x998] sm:$0xff] }
 0x4b6   :  { %3082 = vmatpush.msra.mxu3 %v3051_v42  ;;  %3318 = vmatpush.msra.mxu1 %v3271_v25  ;;  %v3204_v43 = vld [vmem:[#allocation15 + $0x6d8] sm:$0xff]  ;;  %v3423_v42 = vld [vmem:[#allocation15 + $0x990] sm:$0xff] }
 0x4b7   :  { %v2676_v24 = vadd.f32 %v5706_v12, %v2650_v53  ;;  %v3422_v53 = vld [vmem:[#allocation15 + $0x988] sm:$0xff]  ;;  %v3543_v62 = vld [vmem:[#allocation18 + $0x1d8] sm:$0xff] }
 0x4b8   :  { %3083 = vmatpush.msra.mxu3 %v3050_v56  ;;  %3319 = vmatpush.msra.mxu1 %v3270_v38  ;;  %v3202_v56 = vld [vmem:[#allocation15 + $0x6c8] sm:$0xff]  ;;  %v3201_v38 = vld [vmem:[#allocation15 + $0x6c0] sm:$0xff] }
 0x4b9   :  { %v2696_v5 = vmax.f32 %v2676_v24, 0.0 }
 0x4ba   :  { %3084 = vmatpush.msra.mxu3 %v3049_v39  ;;  %3320 = vmatpush.msra.mxu1 %v3269_v22  ;;  %v5745_v48 = vpop.f32.mrf.mxu1  ;;  %v2163_v39 = vadd.f32 %v5620_v55, %v5560_v27  ;;  %v3200_v22 = vld [vmem:[#allocation15 + $0x6b8] sm:$0xff]  ;;  %v3195_v27 = vld [vmem:[#allocation15 + $0x690] sm:$0xff] }
 0x4bb   :  { %3321 = vmatmul.f32.vlgmr.msra.gmra.mxu1 %v2696_v5  ;;  %v2624_v5 = vadd.f32 %v5732_v52, %v5730_v32  ;;  %v3359_v32 = vld [vmem:[#allocation15 + $0x8f0] sm:$0xff]  ;;  %v3357_v52 = vld [vmem:[#allocation15 + $0x8e0] sm:$0xff]  ;;  %v2630_v47 = vadd.f32 %v5745_v48, %v5747_v44 }
 0x4bc   :  { %3457 = vmatpush.msrb.mxu1 %v3436_v17  ;;  %3085 = vmatpush.msra.mxu3 %v3048_v45  ;;  %v3199_v17 = vld [vmem:[#allocation15 + $0x6b0] sm:$0xff]  ;;  %v2304_v35 = vadd.f32 %v5672_v49, %v2163_v39  ;;  %v3198_v45 = vld [vmem:[#allocation15 + $0x6a8] sm:$0xff] }
 0x4bd   :  { %v3544_v48 = vld [vmem:[#allocation18 + $0x1e0] sm:$0xff]  ;;  %v3545_v44 = vld [vmem:[#allocation18 + $0x1e8] sm:$0xff]  ;;  %v3522_v39 = vld [vmem:[#allocation18 + $0x130] sm:$0xff] }
 0x4be   :  { %3458 = vmatpush.msrb.mxu1 %v3435_v31  ;;  %3086 = vmatpush.msra.mxu3 %v3047_v61  ;;  %v2351_v31 = vadd.f32 %v5684_v15, %v2304_v35  ;;  %v3197_v61 = vld [vmem:[#allocation15 + $0x6a0] sm:$0xff]  ;;  %v3358_v15 = vld [vmem:[#allocation15 + $0x8e8] sm:$0xff] }
 0x4bf   :  { %3558 = vmatpush.msrb.mxu2 %v3544_v48  ;;  %v3517_v35 = vld [vmem:[#allocation18 + $0x108] sm:$0xff]  ;;  %v3490_v48 = vld [vmem:[#allocation18 + $0x30] sm:$0xff] }
 0x4c0   :  { %3459 = vmatpush.msrb.mxu1 %v3434_v40  ;;  %3087 = vmatpush.msra.mxu3 %v3046_v3  ;;  %v2648_v40 = vadd.f32 %v2624_v5, %v2351_v31  ;;  %v3193_v3 = vld [vmem:[#allocation15 + $0x680] sm:$0xff]  ;;  %v3518_v5 = vld [vmem:[#allocation18 + $0x110] sm:$0xff] }
 0x4c1   :  { %v3512_v31 = vld [vmem:[#allocation18 + $0xe0] sm:$0xff] }
 0x4c2   :  { %3460 = vmatpush.msrb.mxu1 %v3433_v28  ;;  %3088 = vmatpush.msra.mxu3 %v3045_v26  ;;  %v2632_v4 = vpop.f32.mrf.mxu1  ;;  %v2674_v55 = vadd.f32 %v5706_v12, %v2648_v40  ;;  %v3360_v28 = vld [vmem:[#allocation15 + $0x8f8] sm:$0xff]  ;;  %v3355_v26 = vld [vmem:[#allocation15 + $0x8d0] sm:$0xff] }
 0x4c3   :  { %v2633_v13 = vadd.f32 %v2632_v4, %v2585_v60  ;;  %v3345_v4 = vld [vmem:[#allocation15 + $0x880] sm:$0xff]  ;;  %v3541_v60 = vld [vmem:[#allocation18 + $0x1c8] sm:$0xff]  ;;  %v3514_v40 = vld [vmem:[#allocation18 + $0xf0] sm:$0xff] }
 0x4c4   :  { %3461 = vmatpush.msrb.mxu1 %v3432_v14  ;;  %3089 = vmatpush.msra.mxu3 %v3044_v18  ;;  %v2694_v49 = vmax.f32 %v2674_v55, 0.0  ;;  %v3354_v14 = vld [vmem:[#allocation15 + $0x8c8] sm:$0xff]  ;;  %v2169_v18 = vadd.f32 %v5633_v51, %v5589_v34 }
 0x4c5   :  { %v2654_v59 = vadd.f32 %v2633_v13, %v2360_v8  ;;  %v3346_v51 = vld [vmem:[#allocation15 + $0x888] sm:$0xff] }
 0x4c6   :  { %3462 = vmatpush.msrb.mxu1 %v3431_v20  ;;  %3090 = vmatpush.msra.mxu3 %v3043_v1  ;;  %v3352_v20 = vld [vmem:[#allocation15 + $0x8b8] sm:$0xff]  ;;  %v3351_v1 = vld [vmem:[#allocation15 + $0x8b0] sm:$0xff]  ;;  %v3532_v8 = vld [vmem:[#allocation18 + $0x180] sm:$0xff] }
 0x4c7   :  { %v2680_v25 = vadd.f32 %v5706_v12, %v2654_v59  ;;  %v3537_v13 = vld [vmem:[#allocation18 + $0x1a8] sm:$0xff]  ;;  %v3535_v59 = vld [vmem:[#allocation18 + $0x198] sm:$0xff] }
 0x4c8   :  { %3463 = vmatpush.msrb.mxu1 %v3430_v33  ;;  %3091 = vmatpush.msra.mxu3 %v3042_v46  ;;  %v2310_v33 = vadd.f32 %v5682_v29, %v2169_v18  ;;  %v3350_v46 = vld [vmem:[#allocation15 + $0x8a8] sm:$0xff] }
 0x4c9   :  { %v2700_v24 = vmax.f32 %v2680_v25, 0.0  ;;  %v3524_v25 = vld [vmem:[#allocation18 + $0x140] sm:$0xff]  ;;  %v3509_v55 = vld [vmem:[#allocation18 + $0xc8] sm:$0xff] }
 0x4ca   :  { %3464 = vmatpush.msrb.mxu1 %v3429_v16  ;;  %3092 = vmatpush.msra.mxu3 %v3041_v19  ;;  %v2357_v16 = vadd.f32 %v5694_v36, %v2310_v33  ;;  %v3349_v19 = vld [vmem:[#allocation15 + $0x8a0] sm:$0xff]  ;;  %v3501_v18 = vld [vmem:[#allocation18 + $0x88] sm:$0xff] }
 0x4cb   :  { %3093 = vmatmul.f32.vlgmr.msra.gmra.mxu3 %v2690_v2  ;;  %v3347_v2 = vld [vmem:[#allocation15 + $0x890] sm:$0xff]  ;;  %v3547_v36 = vld [vmem:[#allocation18 + $0x1f8] sm:$0xff]  ;;  %v3496_v33 = vld [vmem:[#allocation18 + $0x60] sm:$0xff] }
 0x4cc   :  { %3465 = vmatpush.msrb.mxu1 %v3428_v10  ;;  %3229 = vmatpush.msrb.mxu3 %v3208_v37  ;;  %v2652_v11 = vadd.f32 %v2630_v47, %v2357_v16  ;;  %v3348_v10 = vld [vmem:[#allocation15 + $0x898] sm:$0xff]  ;;  %v3497_v47 = vld [vmem:[#allocation18 + $0x68] sm:$0xff] }
 0x4cd   :  { %v3546_v37 = vld [vmem:[#allocation18 + $0x1f0] sm:$0xff]  ;;  %v3499_v16 = vld [vmem:[#allocation18 + $0x78] sm:$0xff] }
 0x4ce   :  { %3466 = vmatpush.msrb.mxu1 %v3427_v21  ;;  %3230 = vmatpush.msrb.mxu3 %v3207_v9  ;;  %v2678_v34 = vadd.f32 %v5706_v12, %v2652_v11  ;;  %v3540_v21 = vld [vmem:[#allocation18 + $0x1c0] sm:$0xff]  ;;  %v3542_v9 = vld [vmem:[#allocation18 + $0x1d0] sm:$0xff]  ;;  %v3493_v11 = vld [vmem:[#allocation18 + $0x48] sm:$0xff] }
 0x4cf   :  { %3598 = vmatpush.msra.mxu0 %v3546_v37  ;;  %v3536_v12 = vld [vmem:[#allocation18 + $0x1a0] sm:$0xff]  ;;  %3559 = vmatpush.msrb.mxu2 %v3540_v21  ;;  %v3491_v37 = vld [vmem:[#allocation18 + $0x38] sm:$0xff] }
 0x4d0   :  { %3467 = vmatpush.msrb.mxu1 %v3426_v23  ;;  %3231 = vmatpush.msrb.mxu3 %v3206_v54  ;;  %v2698_v29 = vmax.f32 %v2678_v34, 0.0  ;;  %v3538_v23 = vld [vmem:[#allocation18 + $0x1b0] sm:$0xff]  ;;  %v3539_v54 = vld [vmem:[#allocation18 + $0x1b8] sm:$0xff]  ;;  %v3484_v21 = vld [vmem:[#allocation18] sm:$0xff] }
 0x4d1   :  { %3599 = vmatpush.msra.mxu0 %v3542_v9  ;;  %3560 = vmatpush.msrb.mxu2 %v3536_v12  ;;  %v3495_v34 = vld [vmem:[#allocation18 + $0x58] sm:$0xff]  ;;  %v3486_v9 = vld [vmem:[#allocation18 + $0x10] sm:$0xff] }
 0x4d2   :  { %3468 = vmatpush.msrb.mxu1 %v3425_v58  ;;  %3232 = vmatpush.msrb.mxu3 %v3205_v7  ;;  %v3533_v58 = vld [vmem:[#allocation18 + $0x188] sm:$0xff]  ;;  %v3534_v7 = vld [vmem:[#allocation18 + $0x190] sm:$0xff]  ;;  %v3487_v12 = vld [vmem:[#allocation18 + $0x18] sm:$0xff] }
 0x4d3   :  { %3600 = vmatpush.msra.mxu0 %v3538_v23  ;;  %3561 = vmatpush.msrb.mxu2 %v3532_v8  ;;  %v3768_v23 = vld [vmem:[#allocation21 + $0x3f0] sm:$0xff] }
 0x4d4   :  { %3469 = vmatpush.msrb.mxu1 %v3424_v41  ;;  %3233 = vmatpush.msrb.mxu3 %v3204_v43  ;;  %v3528_v41 = vld [vmem:[#allocation18 + $0x160] sm:$0xff]  ;;  %v3529_v43 = vld [vmem:[#allocation18 + $0x168] sm:$0xff] }
 0x4d5   :  { %3601 = vmatpush.msra.mxu0 %v3534_v7  ;;  %3562 = vmatpush.msrb.mxu2 %v3528_v41  ;;  %v3766_v7 = vld [vmem:[#allocation21 + $0x3e0] sm:$0xff] }
 0x4d6   :  { %3470 = vmatpush.msrb.mxu1 %v3423_v42  ;;  %3234 = vmatpush.msrb.mxu3 %v3203_v57  ;;  %v3530_v42 = vld [vmem:[#allocation18 + $0x170] sm:$0xff]  ;;  %v3531_v57 = vld [vmem:[#allocation18 + $0x178] sm:$0xff] }
 0x4d7   :  { %3602 = vmatpush.msra.mxu0 %v3530_v42  ;;  %3563 = vmatpush.msrb.mxu2 %v3524_v25  ;;  %v3672_v42 = vld [vmem:[#allocation21 + $0xf0] sm:$0xff] }
 0x4d8   :  { %3471 = vmatpush.msrb.mxu1 %v3422_v53  ;;  %3235 = vmatpush.msrb.mxu3 %v3202_v56  ;;  %v3525_v53 = vld [vmem:[#allocation18 + $0x148] sm:$0xff]  ;;  %v3526_v56 = vld [vmem:[#allocation18 + $0x150] sm:$0xff] }
 0x4d9   :  { %3603 = vmatpush.msra.mxu0 %v3526_v56  ;;  %v3670_v56 = vld [vmem:[#allocation21 + $0xe0] sm:$0xff] }
 0x4da   :  { %3472 = vmatpush.msrb.mxu1 %v3421_v30  ;;  %3236 = vmatpush.msrb.mxu3 %v3201_v38  ;;  %v3527_v30 = vld [vmem:[#allocation18 + $0x158] sm:$0xff]  ;;  %v3520_v38 = vld [vmem:[#allocation18 + $0x120] sm:$0xff] }
 0x4db   :  { %3473 = vmatmul.f32.vlgmr.msrb.gmra.mxu1 %v2700_v24  ;;  %v3521_v24 = vld [vmem:[#allocation18 + $0x128] sm:$0xff]  ;;  %3564 = vmatpush.msrb.mxu2 %v3520_v38 }
 0x4dc   :  { %3237 = vmatpush.msrb.mxu3 %v3200_v22  ;;  %3618 = vmatpush.msra.mxu1 %v3547_v36  ;;  %v3523_v22 = vld [vmem:[#allocation18 + $0x138] sm:$0xff] }
 0x4dd   :  { %3604 = vmatpush.msra.mxu0 %v3522_v39  ;;  %v3762_v39 = vld [vmem:[#allocation21 + $0x3c0] sm:$0xff] }
 0x4de   :  { %3238 = vmatpush.msrb.mxu3 %v3199_v17  ;;  %3619 = vmatpush.msra.mxu1 %v3543_v62  ;;  %v3516_v17 = vld [vmem:[#allocation18 + $0x100] sm:$0xff]  ;;  %v2998_v62 = vpop.f32.mrf.mxu0 }
 0x4df   :  { %3565 = vmatpush.msrb.mxu2 %v3516_v17  ;;  %3605 = vmatpush.msra.mxu0 %v3518_v5  ;;  %v3668_v17 = vld [vmem:[#allocation21 + $0xd0] sm:$0xff] }
 0x4e0   :  { %3239 = vmatpush.msrb.mxu3 %v3198_v45  ;;  %3620 = vmatpush.msra.mxu1 %v3539_v54  ;;  %v3519_v45 = vld [vmem:[#allocation18 + $0x118] sm:$0xff]  ;;  %v3734_v54 = vld [vmem:[#allocation21 + $0x2e0] sm:$0xff] }
 0x4e1   :  { %3566 = vmatpush.msrb.mxu2 %v3512_v31  ;;  %3606 = vmatpush.msra.mxu0 %v3514_v40  ;;  %v3760_v31 = vld [vmem:[#allocation21 + $0x3b0] sm:$0xff] }
 0x4e2   :  { %3240 = vmatpush.msrb.mxu3 %v3197_v61  ;;  %3621 = vmatpush.msra.mxu1 %v3535_v59  ;;  %v3513_v61 = vld [vmem:[#allocation18 + $0xe8] sm:$0xff]  ;;  %v3732_v59 = vld [vmem:[#allocation21 + $0x2d0] sm:$0xff] }
 0x4e4   :  { %3241 = vmatpush.msrb.mxu3 %v3196_v6  ;;  %3622 = vmatpush.msra.mxu1 %v3531_v57  ;;  %v3515_v6 = vld [vmem:[#allocation18 + $0xf8] sm:$0xff] }
 0x4e5   :  { %v3704_v57 = vld [vmem:[#allocation21 + $0x1f0] sm:$0xff] }
 0x4e6   :  { %3242 = vmatpush.msrb.mxu3 %v3195_v27  ;;  %3623 = vmatpush.msra.mxu1 %v3527_v30  ;;  %v3508_v27 = vld [vmem:[#allocation18 + $0xc0] sm:$0xff]  ;;  %v3150_v5 = vpop.f32.mrf.mxu0 }
 0x4e7   :  { %3567 = vmatpush.msrb.mxu2 %v3508_v27  ;;  %v3702_v30 = vld [vmem:[#allocation21 + $0x1e0] sm:$0xff] }
 0x4e8   :  { %3243 = vmatpush.msrb.mxu3 %v3194_v0  ;;  %3624 = vmatpush.msra.mxu1 %v3523_v22  ;;  %v3698_v27 = vld [vmem:[#allocation21 + $0x1c0] sm:$0xff] }
 0x4ea   :  { %3244 = vmatpush.msrb.mxu3 %v3193_v3  ;;  %3625 = vmatpush.msra.mxu1 %v3519_v45  ;;  %v3510_v3 = vld [vmem:[#allocation18 + $0xd0] sm:$0xff] }
 0x4eb   :  { %3245 = vmatmul.f32.vlgmr.msrb.gmra.mxu3 %v2694_v49  ;;  %v3511_v49 = vld [vmem:[#allocation18 + $0xd8] sm:$0xff]  ;;  %3607 = vmatpush.msra.mxu0 %v3510_v3 }
 0x4ec   :  { %3381 = vmatpush.msra.mxu3 %v3360_v28  ;;  %v2807_v28 = vpop.f32.mrf.mxu2  ;;  %3626 = vmatpush.msra.mxu1 %v3515_v6  ;;  %v3728_v45 = vld [vmem:[#allocation21 + $0x2b0] sm:$0xff]  ;;  %v3666_v6 = vld [vmem:[#allocation21 + $0xc0] sm:$0xff] }
 0x4ee   :  { %3382 = vmatpush.msra.mxu3 %v3359_v32  ;;  %3627 = vmatpush.msra.mxu1 %v3511_v49  ;;  %v3664_v49 = vld [vmem:[#allocation21 + $0xb0] sm:$0xff] }
 0x4f0   :  { %3383 = vmatpush.msra.mxu3 %v3358_v15 }
 0x4f2   :  { %3384 = vmatpush.msra.mxu3 %v3357_v52  ;;  %v3504_v52 = vld [vmem:[#allocation18 + $0xa0] sm:$0xff] }
 0x4f3   :  { %3568 = vmatpush.msrb.mxu2 %v3504_v52  ;;  %v3756_v52 = vld [vmem:[#allocation21 + $0x390] sm:$0xff] }
 0x4f4   :  { %3385 = vmatpush.msra.mxu3 %v3356_v50  ;;  %v2847_v15 = vpop.f32.mrf.mxu2  ;;  %v3505_v50 = vld [vmem:[#allocation18 + $0xa8] sm:$0xff] }
 0x4f6   :  { %3386 = vmatpush.msra.mxu3 %v3355_v26  ;;  %v3506_v26 = vld [vmem:[#allocation18 + $0xb0] sm:$0xff] }
 0x4f7   :  { %3608 = vmatpush.msra.mxu0 %v3506_v26 }
 0x4f8   :  { %3387 = vmatpush.msra.mxu3 %v3354_v14  ;;  %v3507_v14 = vld [vmem:[#allocation18 + $0xb8] sm:$0xff] }
 0x4f9   :  { %3628 = vmatpush.msra.mxu1 %v3507_v14  ;;  %v3662_v14 = vld [vmem:[#allocation21 + $0xa0] sm:$0xff] }
 0x4fa   :  { %3388 = vmatpush.msra.mxu3 %v3353_v63  ;;  %v3500_v63 = vld [vmem:[#allocation18 + $0x80] sm:$0xff] }
 0x4fb   :  { %3569 = vmatpush.msrb.mxu2 %v3500_v63  ;;  %v3694_v63 = vld [vmem:[#allocation21 + $0x1a0] sm:$0xff] }
 0x4fc   :  { %3389 = vmatpush.msra.mxu3 %v3352_v20  ;;  %v3502_v20 = vld [vmem:[#allocation18 + $0x90] sm:$0xff] }
 0x4fd   :  { %3609 = vmatpush.msra.mxu0 %v3502_v20  ;;  %3570 = vmatpush.msrb.mxu2 %v3496_v33  ;;  %v3722_v20 = vld [vmem:[#allocation21 + $0x280] sm:$0xff] }
 0x4fe   :  { %3390 = vmatpush.msra.mxu3 %v3351_v1  ;;  %v3503_v1 = vld [vmem:[#allocation18 + $0x98] sm:$0xff] }
 0x4ff   :  { %3629 = vmatpush.msra.mxu1 %v3503_v1  ;;  %v3754_v1 = vld [vmem:[#allocation21 + $0x380] sm:$0xff] }
 0x500   :  { %3391 = vmatpush.msra.mxu3 %v3350_v46  ;;  %v3498_v46 = vld [vmem:[#allocation18 + $0x70] sm:$0xff] }
 0x501   :  { %3610 = vmatpush.msra.mxu0 %v3498_v46  ;;  %3630 = vmatpush.msra.mxu1 %v3499_v16  ;;  %v3660_v46 = vld [vmem:[#allocation21 + $0x90] sm:$0xff] }
 0x502   :  { %3392 = vmatpush.msra.mxu3 %v3349_v19  ;;  %v3492_v19 = vld [vmem:[#allocation18 + $0x40] sm:$0xff]  ;;  %v3692_v16 = vld [vmem:[#allocation21 + $0x190] sm:$0xff] }
 0x503   :  { %3571 = vmatpush.msrb.mxu2 %v3492_v19  ;;  %3631 = vmatpush.msra.mxu1 %v3495_v34  ;;  %v3302_v19 = vpop.f32.mrf.mxu0  ;;  %v3658_v34 = vld [vmem:[#allocation21 + $0x80] sm:$0xff] }
 0x504   :  { %3393 = vmatpush.msra.mxu3 %v3348_v10 }
 0x505   :  { %3632 = vmatpush.msra.mxu1 %v3491_v37  ;;  %v3688_v37 = vld [vmem:[#allocation21 + $0x170] sm:$0xff] }
 0x506   :  { %3394 = vmatpush.msra.mxu3 %v3347_v2  ;;  %v3494_v2 = vld [vmem:[#allocation18 + $0x50] sm:$0xff] }
 0x507   :  { %3611 = vmatpush.msra.mxu0 %v3494_v2  ;;  %3633 = vmatpush.msra.mxu1 %v3487_v12  ;;  %v3686_v12 = vld [vmem:[#allocation21 + $0x160] sm:$0xff] }
 0x508   :  { %3395 = vmatpush.msra.mxu3 %v3346_v51  ;;  %v2922_v51 = vpop.f32.mrf.mxu2 }
 0x509   :  { %3612 = vmatpush.msra.mxu0 %v3490_v48  ;;  %3836 = vmatpush.msrb.mxu1 %v3768_v23 }
 0x50a   :  { %3396 = vmatpush.msra.mxu3 %v3345_v4  ;;  %v3488_v4 = vld [vmem:[#allocation18 + $0x20] sm:$0xff] }
 0x50b   :  { %3397 = vmatmul.f32.vlgmr.msra.gmra.mxu3 %v2698_v29  ;;  %v3489_v29 = vld [vmem:[#allocation18 + $0x28] sm:$0xff]  ;;  %3572 = vmatpush.msrb.mxu2 %v3488_v4 }
 0x50c   :  { %3578 = vmatpush.msrb.mxu3 %v3545_v44  ;;  %3613 = vmatpush.msra.mxu0 %v3486_v9  ;;  %v3718_v4 = vld [vmem:[#allocation21 + $0x260] sm:$0xff] }
 0x50d   :  { %3573 = vmatpush.msrb.mxu2 %v3484_v21  ;;  %3837 = vmatpush.msrb.mxu1 %v3766_v7  ;;  %v3748_v21 = vld [vmem:[#allocation21 + $0x350] sm:$0xff] }
 0x50e   :  { %3579 = vmatpush.msrb.mxu3 %v3541_v60  ;;  %v2827_v0 = vpop.f32.mrf.mxu3  ;;  %v3485_v60 = vld [vmem:[#allocation18 + $0x8] sm:$0xff] }
 0x50f   :  { %v2828_v36 = vadd.f32 %v2827_v0, %v2807_v28  ;;  %3776 = vmatpush.msra.mxu2 %v3672_v42  ;;  %v3758_v0 = vld [vmem:[#allocation21 + $0x3a0] sm:$0xff]  ;;  %v3696_v28 = vld [vmem:[#allocation21 + $0x1b0] sm:$0xff] }
 0x510   :  { %3580 = vmatpush.msrb.mxu3 %v3537_v13  ;;  %v3736_v13 = vld [vmem:[#allocation21 + $0x2f0] sm:$0xff]  ;;  %v3074_v25 = vpop.f32.mrf.mxu2 }
 0x511   :  { %v2848_v8 = vadd.f32 %v2847_v15, %v2828_v36  ;;  %3816 = vmatpush.msrb.mxu0 %v3736_v13  ;;  %3777 = vmatpush.msra.mxu2 %v3670_v56  ;;  %v3724_v15 = vld [vmem:[#allocation21 + $0x290] sm:$0xff]  ;;  %v4047_v56 = vld [vmem:[#allocation16] ss:$0 sm:$0xff] }
 0x512   :  { %3581 = vmatpush.msrb.mxu3 %v3533_v58  ;;  %v3716_v36 = vld [vmem:[#allocation21 + $0x250] sm:$0xff] }
 0x513   :  { %3817 = vmatpush.msrb.mxu0 %v3734_v54  ;;  %3778 = vmatpush.msra.mxu2 %v3668_v17  ;;  %v3714_v54 = vld [vmem:[#allocation21 + $0x240] sm:$0xff]  ;;  %v3712_v42 = vld [vmem:[#allocation21 + $0x230] sm:$0xff] }
 0x514   :  { %3582 = vmatpush.msrb.mxu3 %v3529_v43  ;;  %v3764_v43 = vld [vmem:[#allocation21 + $0x3d0] sm:$0xff] }
 0x515   :  { %3818 = vmatpush.msrb.mxu0 %v3732_v59  ;;  %3838 = vmatpush.msrb.mxu1 %v3764_v43  ;;  %v3652_v59 = vld [vmem:[#allocation21 + $0x50] sm:$0xff]  ;;  %v3454_v43 = vpop.f32.mrf.mxu0 }
 0x516   :  { %3583 = vmatpush.msrb.mxu3 %v3525_v53  ;;  %v5769_v32 = vpop.f32.mrf.mxu3  ;;  %3779 = vmatpush.msra.mxu2 %v3666_v6  ;;  %v3648_v17 = vld [vmem:[#allocation21 + $0x30] sm:$0xff] }
 0x517   :  { %v2868_v53 = vadd.f32 %v5769_v32, %v2848_v8  ;;  %3839 = vmatpush.msrb.mxu1 %v3762_v39  ;;  %v3746_v8 = vld [vmem:[#allocation21 + $0x340] sm:$0xff] }
 0x518   :  { %3584 = vmatpush.msrb.mxu3 %v3521_v24  ;;  %v3018_v44 = vpop.f32.mrf.mxu1  ;;  %v3730_v24 = vld [vmem:[#allocation21 + $0x2c0] sm:$0xff]  ;;  %3780 = vmatpush.msra.mxu2 %v3664_v49  ;;  %v3644_v49 = vld [vmem:[#allocation21 + $0x10] sm:$0xff] }
 0x519   :  { %3819 = vmatpush.msrb.mxu0 %v3730_v24  ;;  %3840 = vmatpush.msrb.mxu1 %v3760_v31  ;;  %v3710_v24 = vld [vmem:[#allocation21 + $0x220] sm:$0xff] }
 0x51a   :  { %3585 = vmatpush.msrb.mxu3 %v3517_v35  ;;  %v3700_v35 = vld [vmem:[#allocation21 + $0x1d0] sm:$0xff]  ;;  %3781 = vmatpush.msra.mxu2 %v3662_v14  ;;  %v3742_v39 = vld [vmem:[#allocation21 + $0x320] sm:$0xff]  ;;  %v3765_v14 = vld [vmem:[#allocation21 + $0x3d8] sm:$0xff] }
 0x51b   :  { %3820 = vmatpush.msrb.mxu0 %v3728_v45  ;;  %3841 = vmatpush.msrb.mxu1 %v3758_v0  ;;  %v3740_v45 = vld [vmem:[#allocation21 + $0x310] sm:$0xff]  ;;  %v3737_v0 = vld [vmem:[#allocation21 + $0x2f8] sm:$0xff] }
 0x51c   :  { %3586 = vmatpush.msrb.mxu3 %v3513_v61  ;;  %v3019_v61 = vadd.f32 %v3018_v44, %v2998_v62  ;;  %3782 = vmatpush.msra.mxu2 %v3660_v46  ;;  %v3656_v44 = vld [vmem:[#allocation21 + $0x70] sm:$0xff]  ;;  %v3654_v62 = vld [vmem:[#allocation21 + $0x60] sm:$0xff]  ;;  %v3729_v46 = vld [vmem:[#allocation21 + $0x2b8] sm:$0xff] }
 0x51d   :  { %3842 = vmatpush.msrb.mxu1 %v3756_v52  ;;  %v3642_v52 = vld [vmem:[#allocation21] sm:$0xff] }
 0x51e   :  { %3587 = vmatpush.msrb.mxu3 %v3509_v55  ;;  %v3726_v55 = vld [vmem:[#allocation21 + $0x2a0] sm:$0xff]  ;;  %3783 = vmatpush.msra.mxu2 %v3658_v34  ;;  %v3667_v34 = vld [vmem:[#allocation21 + $0xc8] sm:$0xff] }
 0x51f   :  { %3821 = vmatpush.msrb.mxu0 %v3726_v55  ;;  %3843 = vmatpush.msrb.mxu1 %v3754_v1  ;;  %v3738_v55 = vld [vmem:[#allocation21 + $0x300] sm:$0xff]  ;;  %v3763_v1 = vld [vmem:[#allocation21 + $0x3c8] sm:$0xff] }
 0x520   :  { %3588 = vmatpush.msrb.mxu3 %v3505_v50  ;;  %v3226_v50 = vpop.f32.mrf.mxu2  ;;  %3784 = vmatpush.msra.mxu2 %v3656_v44  ;;  %v3697_v44 = vld [vmem:[#allocation21 + $0x1b8] sm:$0xff] }
 0x521   :  { %3822 = vmatpush.msrb.mxu0 %v3724_v15  ;;  %v3767_v15 = vld [vmem:[#allocation21 + $0x3e8] sm:$0xff] }
 0x522   :  { %3589 = vmatpush.msrb.mxu3 %v3501_v18  ;;  %3785 = vmatpush.msra.mxu2 %v3654_v62  ;;  %v3753_v62 = vld [vmem:[#allocation21 + $0x378] sm:$0xff] }
 0x523   :  { %3823 = vmatpush.msrb.mxu0 %v3722_v20  ;;  %v3731_v20 = vld [vmem:[#allocation21 + $0x2c8] sm:$0xff] }
 0x524   :  { %3590 = vmatpush.msrb.mxu3 %v3497_v47  ;;  %3786 = vmatpush.msra.mxu2 %v3652_v59  ;;  %v3749_v59 = vld [vmem:[#allocation21 + $0x358] sm:$0xff] }
 0x526   :  { %3591 = vmatpush.msrb.mxu3 %v3493_v11  ;;  %v3720_v11 = vld [vmem:[#allocation21 + $0x270] sm:$0xff] }
 0x527   :  { %3824 = vmatpush.msrb.mxu0 %v3720_v11  ;;  %v3701_v11 = vld [vmem:[#allocation21 + $0x1d8] sm:$0xff] }
 0x528   :  { %3592 = vmatpush.msrb.mxu3 %v3489_v29  ;;  %v3170_v38 = vpop.f32.mrf.mxu1  ;;  %v3750_v29 = vld [vmem:[#allocation21 + $0x360] sm:$0xff] }
 0x529   :  { %v3171_v33 = vadd.f32 %v3170_v38, %v3150_v5  ;;  %3825 = vmatpush.msrb.mxu0 %v3718_v4  ;;  %v3682_v38 = vld [vmem:[#allocation21 + $0x140] sm:$0xff]  ;;  %v3708_v5 = vld [vmem:[#allocation21 + $0x210] sm:$0xff]  ;;  %v3725_v4 = vld [vmem:[#allocation21 + $0x298] sm:$0xff] }
 0x52a   :  { %3593 = vmatpush.msrb.mxu3 %v3485_v60  ;;  %v3378_v60 = vpop.f32.mrf.mxu2 }
 0x52b   :  { %3826 = vmatpush.msrb.mxu0 %v3716_v36  ;;  %v3755_v36 = vld [vmem:[#allocation21 + $0x388] sm:$0xff] }
 0x52c   :  { %3796 = vmatpush.msra.mxu3 %v3704_v57  ;;  %v3744_v57 = vld [vmem:[#allocation21 + $0x330] sm:$0xff] }
 0x52d   :  { %3827 = vmatpush.msrb.mxu0 %v3714_v54  ;;  %v3751_v54 = vld [vmem:[#allocation21 + $0x368] sm:$0xff] }
 0x52e   :  { %v2942_v10 = vpop.f32.mrf.mxu3  ;;  %3797 = vmatpush.msra.mxu3 %v3702_v30  ;;  %v3650_v30 = vld [vmem:[#allocation21 + $0x40] sm:$0xff] }
 0x52f   :  { %v2943_v58 = vadd.f32 %v2942_v10, %v2922_v51  ;;  %v3752_v10 = vld [vmem:[#allocation21 + $0x370] sm:$0xff]  ;;  %v3690_v51 = vld [vmem:[#allocation21 + $0x180] sm:$0xff]  ;;  %3828 = vmatpush.msrb.mxu0 %v3712_v42  ;;  %3787 = vmatpush.msra.mxu2 %v3650_v30  ;;  %v3715_v42 = vld [vmem:[#allocation21 + $0x248] sm:$0xff] }
 0x530   :  { %3798 = vmatpush.msra.mxu3 %v3700_v35  ;;  %3844 = vmatpush.msrb.mxu1 %v3752_v10  ;;  %v3680_v35 = vld [vmem:[#allocation21 + $0x130] sm:$0xff]  ;;  %v3727_v10 = vld [vmem:[#allocation21 + $0x2a8] sm:$0xff]  ;;  %v3745_v30 = vld [vmem:[#allocation21 + $0x338] sm:$0xff] }
 0x531   :  { %v2945_v22 = vadd.f32 %v2943_v58, %v2868_v53  ;;  %3829 = vmatpush.msrb.mxu0 %v3710_v24  ;;  %3788 = vmatpush.msra.mxu2 %v3648_v17  ;;  %v3685_v24 = vld [vmem:[#allocation21 + $0x158] sm:$0xff]  ;;  %v3651_v17 = vld [vmem:[#allocation21 + $0x48] sm:$0xff] }
 0x532   :  { %3799 = vmatpush.msra.mxu3 %v3698_v27  ;;  %3845 = vmatpush.msrb.mxu1 %v3750_v29  ;;  %v3706_v27 = vld [vmem:[#allocation21 + $0x200] sm:$0xff]  ;;  %v3757_v29 = vld [vmem:[#allocation21 + $0x398] sm:$0xff] }
 0x533   :  { %v3021_v3 = vadd.f32 %v3019_v61, %v2945_v22  ;;  %v3646_v61 = vld [vmem:[#allocation21 + $0x20] sm:$0xff]  ;;  %3830 = vmatpush.msrb.mxu0 %v3708_v5  ;;  %v3709_v5 = vld [vmem:[#allocation21 + $0x218] sm:$0xff] }
 0x534   :  { %3800 = vmatpush.msra.mxu3 %v3696_v28  ;;  %3846 = vmatpush.msrb.mxu1 %v3748_v21  ;;  %v3676_v28 = vld [vmem:[#allocation21 + $0x110] sm:$0xff]  ;;  %v3663_v21 = vld [vmem:[#allocation21 + $0xa8] sm:$0xff] }
 0x535   :  { %3789 = vmatpush.msra.mxu2 %v3646_v61  ;;  %3831 = vmatpush.msrb.mxu0 %v3706_v27  ;;  %v3681_v61 = vld [vmem:[#allocation21 + $0x138] sm:$0xff]  ;;  %v3647_v27 = vld [vmem:[#allocation21 + $0x28] sm:$0xff] }
 0x536   :  { %3801 = vmatpush.msra.mxu3 %v3694_v63  ;;  %3847 = vmatpush.msrb.mxu1 %v3746_v8  ;;  %v3673_v63 = vld [vmem:[#allocation21 + $0xf8] sm:$0xff]  ;;  %v3659_v8 = vld [vmem:[#allocation21 + $0x88] sm:$0xff] }
 0x537   :  { %3790 = vmatpush.msra.mxu2 %v3644_v49  ;;  %v3643_v49 = vld [vmem:[#allocation21 + $0x8] sm:$0xff] }
 0x538   :  { %v3322_v18 = vpop.f32.mrf.mxu1  ;;  %3802 = vmatpush.msra.mxu3 %v3692_v16  ;;  %3848 = vmatpush.msrb.mxu1 %v3744_v57  ;;  %v3761_v16 = vld [vmem:[#allocation21 + $0x3b8] sm:$0xff]  ;;  %v3747_v57 = vld [vmem:[#allocation21 + $0x348] sm:$0xff] }
 0x539   :  { %v3323_v9 = vadd.f32 %v3322_v18, %v3302_v19  ;;  %v3705_v18 = vld [vmem:[#allocation21 + $0x1f8] sm:$0xff]  ;;  %3791 = vmatpush.msra.mxu2 %v3642_v52 }
 0x53a   :  { %3803 = vmatpush.msra.mxu3 %v3690_v51  ;;  %3849 = vmatpush.msrb.mxu1 %v3742_v39  ;;  %v3669_v19 = vld [vmem:[#allocation21 + $0xd8] sm:$0xff]  ;;  %v3699_v51 = vld [vmem:[#allocation21 + $0x1c8] sm:$0xff] }
 0x53b   :  { %v3711_v39 = vld [vmem:[#allocation21 + $0x228] sm:$0xff] }
 0x53c   :  { %3804 = vmatpush.msra.mxu3 %v3688_v37  ;;  %3850 = vmatpush.msrb.mxu1 %v3740_v45  ;;  %v3723_v37 = vld [vmem:[#allocation21 + $0x288] sm:$0xff]  ;;  %v3741_v45 = vld [vmem:[#allocation21 + $0x318] sm:$0xff] }
 0x53e   :  { %3805 = vmatpush.msra.mxu3 %v3686_v12  ;;  %3851 = vmatpush.msrb.mxu1 %v3738_v55  ;;  %v3661_v12 = vld [vmem:[#allocation21 + $0x98] sm:$0xff]  ;;  %v3679_v55 = vld [vmem:[#allocation21 + $0x128] sm:$0xff] }
 0x54e   :  { %v3094_v41 = vpop.f32.mrf.mxu3 }
 0x54f   :  { %v3095_v40 = vadd.f32 %v3094_v41, %v3074_v25  ;;  %v3684_v41 = vld [vmem:[#allocation21 + $0x150] sm:$0xff] }
 0x550   :  { %3806 = vmatpush.msra.mxu3 %v3684_v41  ;;  %v3657_v41 = vld [vmem:[#allocation21 + $0x78] sm:$0xff] }
 0x551   :  { %v3097_v26 = vadd.f32 %v3095_v40, %v3021_v3  ;;  %v3678_v40 = vld [vmem:[#allocation21 + $0x120] sm:$0xff]  ;;  %v3769_v3 = vld [vmem:[#allocation21 + $0x3f8] sm:$0xff] }
 0x552   :  { %3807 = vmatpush.msra.mxu3 %v3682_v38  ;;  %v3653_v38 = vld [vmem:[#allocation21 + $0x58] sm:$0xff] }
 0x553   :  { %v3173_v2 = vadd.f32 %v3171_v33, %v3097_v26  ;;  %v3733_v26 = vld [vmem:[#allocation21 + $0x2d8] sm:$0xff]  ;;  %v3671_v33 = vld [vmem:[#allocation21 + $0xe8] sm:$0xff] }
 0x554   :  { %3808 = vmatpush.msra.mxu3 %v3680_v35  ;;  %v3683_v35 = vld [vmem:[#allocation21 + $0x148] sm:$0xff] }
 0x556   :  { %3809 = vmatpush.msra.mxu3 %v3678_v40  ;;  %v3707_v40 = vld [vmem:[#allocation21 + $0x208] sm:$0xff] }
 0x558   :  { %v3474_v13 = vpop.f32.mrf.mxu1  ;;  %3810 = vmatpush.msra.mxu3 %v3676_v28  ;;  %v3675_v28 = vld [vmem:[#allocation21 + $0x108] sm:$0xff] }
 0x559   :  { %v3475_v25 = vadd.f32 %v3474_v13, %v3454_v43  ;;  %v3693_v13 = vld [vmem:[#allocation21 + $0x198] sm:$0xff] }
 0x55a   :  { %v3689_v43 = vld [vmem:[#allocation21 + $0x178] sm:$0xff] }
 0x56e   :  { %v3246_v32 = vpop.f32.mrf.mxu3 }
 0x56f   :  { %v3247_v47 = vadd.f32 %v3246_v32, %v3226_v50  ;;  %v3735_v32 = vld [vmem:[#allocation21 + $0x2e8] sm:$0xff]  ;;  %v3674_v50 = vld [vmem:[#allocation21 + $0x100] sm:$0xff] }
 0x570   :  { %3811 = vmatpush.msra.mxu3 %v3674_v50 }
 0x571   :  { %v3249_v48 = vadd.f32 %v3247_v47, %v3173_v2  ;;  %v3703_v47 = vld [vmem:[#allocation21 + $0x1e8] sm:$0xff] }
 0x572   :  { %v3759_v2 = vld [vmem:[#allocation21 + $0x3a8] sm:$0xff] }
 0x573   :  { %v3325_v58 = vadd.f32 %v3323_v9, %v3249_v48  ;;  %v3665_v48 = vld [vmem:[#allocation21 + $0xb8] sm:$0xff] }
 0x574   :  { %v3721_v9 = vld [vmem:[#allocation21 + $0x278] sm:$0xff] }
 0x58e   :  { %v3398_v23 = vpop.f32.mrf.mxu3 }
 0x58f   :  { %v3399_v7 = vadd.f32 %v3398_v23, %v3378_v60  ;;  %v3695_v60 = vld [vmem:[#allocation21 + $0x1a8] sm:$0xff] }
 0x590   :  { %v3719_v23 = vld [vmem:[#allocation21 + $0x268] sm:$0xff] }
 0x591   :  { %v3401_v53 = vadd.f32 %v3399_v7, %v3325_v58  ;;  %v3691_v58 = vld [vmem:[#allocation21 + $0x188] sm:$0xff]  ;;  %v3717_v7 = vld [vmem:[#allocation21 + $0x258] sm:$0xff] }
 0x593   :  { %v3477_v22 = vadd.f32 %v3475_v25, %v3401_v53  ;;  %v3655_v25 = vld [vmem:[#allocation21 + $0x68] sm:$0xff] }
 0x594   :  { %v3687_v53 = vld [vmem:[#allocation21 + $0x168] sm:$0xff] }
 0x595   :  { %v3482_v31 = vadd.f32 %v4047_v56, %v3477_v22  ;;  %v3713_v56 = vld [vmem:[#allocation21 + $0x238] sm:$0xff]  ;;  %v3743_v22 = vld [vmem:[#allocation21 + $0x328] sm:$0xff] }
 0x597   :  { %v3483_v6 = vmax.f32 %v3482_v31, 0.0  ;;  %v3649_v31 = vld [vmem:[#allocation21 + $0x38] sm:$0xff] }
 0x599   :  { %3574 = vmatmul.f32.vlgmr.msrb.gmra.mxu2 %v3483_v6  ;;  %3594 = vmatmul.f32.vlgmr.msrb.gmra.mxu3 %v3483_v6 }
 0x59a   :  { %3614 = vmatmul.f32.vlgmr.msra.gmra.mxu0 %v3483_v6  ;;  %3634 = vmatmul.f32.vlgmr.msra.gmra.mxu1 %v3483_v6  ;;  %v3739_v6 = vld [vmem:[#allocation21 + $0x308] sm:$0xff] }
 0x59b   :  { %3896 = vmatpush.msra.mxu0 %v3737_v0  ;;  %3916 = vmatpush.msra.mxu1 %v3769_v3  ;;  %v3645_v0 = vld [vmem:[#allocation21 + $0x18] sm:$0xff] }
 0x59c   :  { %3856 = vmatpush.msrb.mxu2 %v3673_v63  ;;  %3876 = vmatpush.msrb.mxu3 %v3705_v18  ;;  %v3677_v3 = vld [vmem:[#allocation21 + $0x118] sm:$0xff] }
 0x59d   :  { %3897 = vmatpush.msra.mxu0 %v3735_v32  ;;  %3917 = vmatpush.msra.mxu1 %v3767_v15  ;;  %v3548_v32 = vld [vmem:[#allocation19] sm:$0xf] }
 0x59e   :  { %3857 = vmatpush.msrb.mxu2 %v3671_v33  ;;  %3877 = vmatpush.msrb.mxu3 %v3703_v47  ;;  %v3552_v15 = vperm.slane %v3548_v32, 2  ;;  %v3553_v52 = vperm.slane %v3548_v32, 3  ;;  %v3550_v18 = vperm.slane %v3548_v32, 0 }
 0x59f   :  { %3898 = vmatpush.msra.mxu0 %v3733_v26  ;;  %3918 = vmatpush.msra.mxu1 %v3765_v14 }
 0x5a0   :  { %3858 = vmatpush.msrb.mxu2 %v3669_v19  ;;  %3878 = vmatpush.msrb.mxu3 %v3701_v11 }
 0x5a1   :  { %3899 = vmatpush.msra.mxu0 %v3731_v20  ;;  %3919 = vmatpush.msra.mxu1 %v3763_v1  ;;  %v3551_v20 = vperm.slane %v3548_v32, 1 }
 0x5a2   :  { %3859 = vmatpush.msrb.mxu2 %v3667_v34  ;;  %3879 = vmatpush.msrb.mxu3 %v3699_v51  ;;  %v3952_v34 = vld [vmem:[#allocation24 + $0x70] sm:$0xff]  ;;  %v3951_v51 = vld [vmem:[#allocation24 + $0x68] sm:$0xff] }
 0x5a3   :  { %3900 = vmatpush.msra.mxu0 %v3729_v46  ;;  %3920 = vmatpush.msra.mxu1 %v3761_v16 }
 0x5a4   :  { %3860 = vmatpush.msrb.mxu2 %v3665_v48  ;;  %3880 = vmatpush.msrb.mxu3 %v3697_v44  ;;  %v3969_v48 = vld [vmem:[#allocation24 + $0xf8] sm:$0xff]  ;;  %v3948_v44 = vld [vmem:[#allocation24 + $0x50] sm:$0xff] }
 0x5a5   :  { %3901 = vmatpush.msra.mxu0 %v3727_v10  ;;  %3921 = vmatpush.msra.mxu1 %v3759_v2  ;;  %v3953_v2 = vld [vmem:[#allocation24 + $0x78] sm:$0xff] }
 0x5a6   :  { %3861 = vmatpush.msrb.mxu2 %v3663_v21  ;;  %3881 = vmatpush.msrb.mxu3 %v3695_v60  ;;  %v3967_v21 = vld [vmem:[#allocation24 + $0xe8] sm:$0xff]  ;;  %v3946_v60 = vld [vmem:[#allocation24 + $0x40] sm:$0xff] }
 0x5a7   :  { %3902 = vmatpush.msra.mxu0 %v3725_v4  ;;  %3922 = vmatpush.msra.mxu1 %v3757_v29  ;;  %v3950_v4 = vld [vmem:[#allocation24 + $0x60] sm:$0xff]  ;;  %v3949_v29 = vld [vmem:[#allocation24 + $0x58] sm:$0xff] }
 0x5a8   :  { %3862 = vmatpush.msrb.mxu2 %v3661_v12  ;;  %3882 = vmatpush.msrb.mxu3 %v3693_v13  ;;  %v3965_v12 = vld [vmem:[#allocation24 + $0xd8] sm:$0xff]  ;;  %v3944_v13 = vld [vmem:[#allocation24 + $0x30] sm:$0xff] }
 0x5a9   :  { %3903 = vmatpush.msra.mxu0 %v3723_v37  ;;  %3923 = vmatpush.msra.mxu1 %v3755_v36  ;;  %v3968_v37 = vld [vmem:[#allocation24 + $0xf0] sm:$0xff]  ;;  %v3947_v36 = vld [vmem:[#allocation24 + $0x48] sm:$0xff] }
 0x5aa   :  { %3863 = vmatpush.msrb.mxu2 %v3659_v8  ;;  %3883 = vmatpush.msrb.mxu3 %v3691_v58  ;;  %v3963_v8 = vld [vmem:[#allocation24 + $0xc8] sm:$0xff]  ;;  %v3942_v58 = vld [vmem:[#allocation24 + $0x20] sm:$0xff] }
 0x5ab   :  { %3904 = vmatpush.msra.mxu0 %v3721_v9  ;;  %3924 = vmatpush.msra.mxu1 %v3753_v62  ;;  %v3966_v9 = vld [vmem:[#allocation24 + $0xe0] sm:$0xff]  ;;  %v3945_v62 = vld [vmem:[#allocation24 + $0x38] sm:$0xff] }
 0x5ac   :  { %3864 = vmatpush.msrb.mxu2 %v3657_v41  ;;  %3884 = vmatpush.msrb.mxu3 %v3689_v43  ;;  %v3961_v41 = vld [vmem:[#allocation24 + $0xb8] sm:$0xff]  ;;  %v3940_v43 = vld [vmem:[#allocation24 + $0x10] sm:$0xff] }
 0x5ad   :  { %3905 = vmatpush.msra.mxu0 %v3719_v23  ;;  %3925 = vmatpush.msra.mxu1 %v3751_v54  ;;  %v3964_v23 = vld [vmem:[#allocation24 + $0xd0] sm:$0xff]  ;;  %v3943_v54 = vld [vmem:[#allocation24 + $0x28] sm:$0xff] }
 0x5ae   :  { %3865 = vmatpush.msrb.mxu2 %v3655_v25  ;;  %3885 = vmatpush.msrb.mxu3 %v3687_v53  ;;  %v3959_v25 = vld [vmem:[#allocation24 + $0xa8] sm:$0xff]  ;;  %v3938_v53 = vld [vmem:[#allocation24] sm:$0xff] }
 0x5af   :  { %3906 = vmatpush.msra.mxu0 %v3717_v7  ;;  %3926 = vmatpush.msra.mxu1 %v3749_v59  ;;  %v3962_v7 = vld [vmem:[#allocation24 + $0xc0] sm:$0xff]  ;;  %v3941_v59 = vld [vmem:[#allocation24 + $0x18] sm:$0xff] }
 0x5b0   :  { %3866 = vmatpush.msrb.mxu2 %v3653_v38  ;;  %3886 = vmatpush.msrb.mxu3 %v3685_v24  ;;  %v3956_v38 = vld [vmem:[#allocation24 + $0x90] sm:$0xff]  ;;  %v3955_v24 = vld [vmem:[#allocation24 + $0x88] sm:$0xff] }
 0x5b1   :  { %3907 = vmatpush.msra.mxu0 %v3715_v42  ;;  %3927 = vmatpush.msra.mxu1 %v3747_v57  ;;  %v3960_v42 = vld [vmem:[#allocation24 + $0xb0] sm:$0xff]  ;;  %v3939_v57 = vld [vmem:[#allocation24 + $0x8] sm:$0xff] }
 0x5b2   :  { %3867 = vmatpush.msrb.mxu2 %v3651_v17  ;;  %3887 = vmatpush.msrb.mxu3 %v3683_v35 }
 0x5b3   :  { %3908 = vmatpush.msra.mxu0 %v3713_v56  ;;  %3928 = vmatpush.msra.mxu1 %v3745_v30  ;;  %v3958_v56 = vld [vmem:[#allocation24 + $0xa0] sm:$0xff]  ;;  %v3957_v30 = vld [vmem:[#allocation24 + $0x98] sm:$0xff] }
 0x5b4   :  { %3868 = vmatpush.msrb.mxu2 %v3649_v31  ;;  %3888 = vmatpush.msrb.mxu3 %v3681_v61 }
 0x5b5   :  { %3909 = vmatpush.msra.mxu0 %v3711_v39  ;;  %3929 = vmatpush.msra.mxu1 %v3743_v22  ;;  %v3954_v39 = vld [vmem:[#allocation24 + $0x80] sm:$0xff]  ;;  %v3770_v22 = vld [vmem:[#allocation22] sm:$0x3] }
 0x5b6   :  { %3869 = vmatpush.msrb.mxu2 %v3647_v27  ;;  %3889 = vmatpush.msrb.mxu3 %v3679_v55  ;;  %v3772_v17 = vperm.slane %v3770_v22, 0  ;;  %v3773_v27 = vperm.slane %v3770_v22, 1 }
 0x5b7   :  { %3910 = vmatpush.msra.mxu0 %v3709_v5  ;;  %3930 = vmatpush.msra.mxu1 %v3741_v45 }
 0x5b8   :  { %3870 = vmatpush.msrb.mxu2 %v3645_v0  ;;  %3890 = vmatpush.msrb.mxu3 %v3677_v3 }
 0x5b9   :  { %3911 = vmatpush.msra.mxu0 %v3707_v40  ;;  %3931 = vmatpush.msra.mxu1 %v3739_v6 }
 0x5ba   :  { %3871 = vmatpush.msrb.mxu2 %v3643_v49  ;;  %3891 = vmatpush.msrb.mxu3 %v3675_v28 }
 0x617   :  { %v3615_v50 = vpop.f32.mrf.mxu0  ;;  %v3635_v26 = vpop.f32.mrf.mxu1 }
 0x618   :  { %v3616_v14 = vadd.f32 %v3615_v50, %v3552_v15  ;;  %v3636_v63 = vadd.f32 %v3635_v26, %v3553_v52 }
 0x61a   :  { %v3640_v1 = vmax.f32 %v3616_v14, 0.0  ;;  %v3641_v33 = vmax.f32 %v3636_v63, 0.0  ;;  %v4048_v63 = vld [vmem:[#allocation25] ss:$0 sm:$0xff] }
 0x61c   :  { %3832 = vmatmul.f32.vlgmr.msrb.gmra.mxu0 %v3640_v1  ;;  %3852 = vmatmul.f32.vlgmr.msrb.gmra.mxu1 %v3641_v33  ;;  %v3575_v47 = vpop.f32.mrf.mxu2  ;;  %v3595_v46 = vpop.f32.mrf.mxu3 }
 0x61d   :  { %v3576_v16 = vadd.f32 %v3575_v47, %v3550_v18  ;;  %v3596_v19 = vadd.f32 %v3595_v46, %v3551_v20 }
 0x61f   :  { %v3638_v11 = vmax.f32 %v3576_v16, 0.0  ;;  %v3639_v10 = vmax.f32 %v3596_v19, 0.0 }
 0x621   :  { %3792 = vmatmul.f32.vlgmr.msra.gmra.mxu2 %v3638_v11  ;;  %3812 = vmatmul.f32.vlgmr.msra.gmra.mxu3 %v3639_v10 }
 0x622   :  { %3974 = vmatpush.msra.mxu2 %v3953_v2  ;;  %3994 = vmatpush.msra.mxu3 %v3969_v48 }
 0x624   :  { %3912 = vmatmul.f32.vlgmr.msra.gmra.mxu0 %v3640_v1  ;;  %3932 = vmatmul.f32.vlgmr.msra.gmra.mxu1 %v3641_v33 }
 0x625   :  { %3975 = vmatpush.msra.mxu2 %v3952_v34  ;;  %3995 = vmatpush.msra.mxu3 %v3968_v37 }
 0x627   :  { %3976 = vmatpush.msra.mxu2 %v3951_v51  ;;  %3996 = vmatpush.msra.mxu3 %v3967_v21 }
 0x629   :  { %3872 = vmatmul.f32.vlgmr.msrb.gmra.mxu2 %v3638_v11  ;;  %3892 = vmatmul.f32.vlgmr.msrb.gmra.mxu3 %v3639_v10 }
 0x62a   :  { %3977 = vmatpush.msra.mxu2 %v3950_v4  ;;  %3997 = vmatpush.msra.mxu3 %v3966_v9 }
 0x62c   :  { %3978 = vmatpush.msra.mxu2 %v3949_v29  ;;  %3998 = vmatpush.msra.mxu3 %v3965_v12 }
 0x62e   :  { %3979 = vmatpush.msra.mxu2 %v3948_v44  ;;  %3999 = vmatpush.msra.mxu3 %v3964_v23 }
 0x630   :  { %3980 = vmatpush.msra.mxu2 %v3947_v36  ;;  %4000 = vmatpush.msra.mxu3 %v3963_v8 }
 0x632   :  { %3981 = vmatpush.msra.mxu2 %v3946_v60  ;;  %4001 = vmatpush.msra.mxu3 %v3962_v7 }
 0x634   :  { %3982 = vmatpush.msra.mxu2 %v3945_v62  ;;  %4002 = vmatpush.msra.mxu3 %v3961_v41 }
 0x636   :  { %3983 = vmatpush.msra.mxu2 %v3944_v13  ;;  %4003 = vmatpush.msra.mxu3 %v3960_v42 }
 0x638   :  { %3984 = vmatpush.msra.mxu2 %v3943_v54  ;;  %4004 = vmatpush.msra.mxu3 %v3959_v25 }
 0x63a   :  { %3985 = vmatpush.msra.mxu2 %v3942_v58  ;;  %4005 = vmatpush.msra.mxu3 %v3958_v56 }
 0x63c   :  { %3986 = vmatpush.msra.mxu2 %v3941_v59  ;;  %4006 = vmatpush.msra.mxu3 %v3957_v30 }
 0x63e   :  { %3987 = vmatpush.msra.mxu2 %v3940_v43  ;;  %4007 = vmatpush.msra.mxu3 %v3956_v38 }
 0x640   :  { %3988 = vmatpush.msra.mxu2 %v3939_v57  ;;  %4008 = vmatpush.msra.mxu3 %v3955_v24 }
 0x642   :  { %3989 = vmatpush.msra.mxu2 %v3938_v53  ;;  %4009 = vmatpush.msra.mxu3 %v3954_v39 }
 0x699   :  { %v3833_v31 = vpop.f32.mrf.mxu0  ;;  %v3853_v40 = vpop.f32.mrf.mxu1 }
 0x6a1   :  { %v3913_v15 = vpop.f32.mrf.mxu0  ;;  %v3933_v50 = vpop.f32.mrf.mxu1 }
 0x6a4   :  { %v3793_v35 = vpop.f32.mrf.mxu2  ;;  %v3813_v5 = vpop.f32.mrf.mxu3 }
 0x6a5   :  { %v3794_v45 = vadd.f32 %v3793_v35, %v3772_v17 }
 0x6a7   :  { %v3814_v61 = vadd.f32 %v3813_v5, %v3794_v45 }
 0x6a9   :  { %v3834_v6 = vadd.f32 %v3833_v31, %v3814_v61 }
 0x6ab   :  { %v3854_v55 = vadd.f32 %v3853_v40, %v3834_v6 }
 0x6ac   :  { %v3873_v0 = vpop.f32.mrf.mxu2  ;;  %v3893_v28 = vpop.f32.mrf.mxu3 }
 0x6ad   :  { %v3936_v3 = vmax.f32 %v3854_v55, 0.0  ;;  %v3874_v49 = vadd.f32 %v3873_v0, %v3773_v27 }
 0x6af   :  { %v3894_v32 = vadd.f32 %v3893_v28, %v3874_v49  ;;  %3990 = vmatmul.f32.vlgmr.msra.gmra.mxu2 %v3936_v3 }
 0x6b1   :  { %v3914_v52 = vadd.f32 %v3913_v15, %v3894_v32 }
 0x6b3   :  { %v3934_v26 = vadd.f32 %v3933_v50, %v3914_v52 }
 0x6b5   :  { %v3937_v14 = vmax.f32 %v3934_v26, 0.0 }
 0x6b7   :  { %4010 = vmatmul.f32.vlgmr.msra.gmra.mxu3 %v3937_v14 }
 0x732   :  { %v3991_v18 = vpop.f32.mrf.mxu2 }
 0x733   :  { %v3992_v20 = vadd.f32 %v4048_v63, %v3991_v18 }
 0x73a   :  { %v4011_v1 = vpop.f32.mrf.mxu3 }
 0x73b   :  { %v4012_v33 = vadd.f32 %v4011_v1, %v3992_v20 }
 0x73d   :  { %4014 = vst [vmem:[%s5790_s15] sm:$0xff] %v4012_v33 }
 0x73e   :  { %4019 = vsyncpa [#allocation6], 1 }
 0x73f   :  { %4020 = vsyncpa [#allocation8], 1 }
 0x740   :  { %4021 = vsyncpa [#allocation11], 1 }
 0x741   :  { %4022 = vsyncpa [#allocation14], 1 }
 0x742   :  { %4023 = vsyncpa [#allocation17], 1 }
 0x743   :  { %4024 = vsyncpa [#allocation20], 1 }
 0x744   :  { %4025 = vsyncpa [#allocation23], 1 }
 0x745   :  { %4026 = vsyncpa [#allocation26], 1 }

</bundles_post_ra>
